<compile_context>
chip_gen: v5e
topology: v5e:2x2
jax: 0.10.0
libtpu: 0.0.40
codegen_flags: <defaults>
</compile_context>

<pallas_src>
import numpy as np
import jax
import jax.numpy as jnp
from jax import lax
from jax.experimental import pallas as pl
from jax.experimental.pallas import tpu as pltpu


# ----------------------------------------------------------------------------
# Host-side constants: PyTorch bilinear (align_corners=False) as a matrix.
# ----------------------------------------------------------------------------
def _bilinear_matrix_np(out_size, in_size):
    scale = in_size / out_size
    dst = np.arange(out_size, dtype=np.float64)
    src = np.maximum((dst + 0.5) * scale - 0.5, 0.0)
    i0 = np.clip(np.floor(src).astype(np.int64), 0, in_size - 1)
    lam = src - i0
    i1 = np.minimum(i0 + 1, in_size - 1)
    cols = np.arange(in_size, dtype=np.int64)[None, :]
    A = ((cols == i0[:, None]) * (1.0 - lam)[:, None] +
         (cols == i1[:, None]) * lam[:, None])
    return A.astype(np.float32)


# ----------------------------------------------------------------------------
# Fused kernel: one grid step == one batch element, everything stays in VMEM.
# ----------------------------------------------------------------------------
def _prompt_gen_kernel(x_ref, wl_ref, bl_ref, p_ref, a3_ref, wk3_ref,
                       o_ref, u_ref, acc_ref):
    # x_ref  : (1, C, H*W)         input image (NCHW, flattened spatial), f32
    # wl_ref : (C, L)              nn.Linear weight, transposed            f32
    # bl_ref : (1, L)              nn.Linear bias                          f32
    # p_ref  : (L, S*S, D)         prompt_param as [len, (s_h, s_w), d]    f32
    # a3_ref : (3, (H+2)*W, S*S)   Kron interp matrix per conv column tap  bf16
    # wk3_ref: (3, 3*D, D)         conv weights regrouped per row tap ky   bf16
    # o_ref  : (1, D, H*W)         output, channel-major (lane-dense H*W)  f32
    # u_ref  : ((H+2)*W, 3*D)      resized+tap-packed prompt (VMEM scratch) bf16
    # acc_ref: (H*W, D)            conv accumulator (VMEM scratch)          f32
    L = p_ref.shape[0]
    D = acc_ref.shape[1]
    HW = acc_ref.shape[0]
    Wd = (u_ref.shape[0] - HW) // 2            # = W  (u has H+2 row-blocks of W rows)
    inv_hw = 1.0 / x_ref.shape[2]

    # --- 1) spatial mean -> linear -> softmax (VPU/XLU/EUP only) -------------
    x2 = x_ref[0]                                               # (C, H*W)
    emb = jnp.sum(x2, axis=1, keepdims=True) * inv_hw           # (C, 1)
    logits = jnp.sum(wl_ref[...] * emb, axis=0, keepdims=True) + bl_ref[...]  # (1, L)
    e = jnp.exp(logits - jnp.max(logits, axis=1, keepdims=True))
    wts = e / jnp.sum(e, axis=1, keepdims=True)                 # exact softmax

    # --- 2) prompt mixing: L-step broadcast-MAC in f32, one bf16 rounding ----
    pm = p_ref[0] * wts[0:1, 0:1]                               # (S*S, D)
    for l in range(1, L):
        pm = pm + p_ref[l] * wts[0:1, l:l + 1]
    pm = pm.astype(jnp.bfloat16)

    # --- 3) bilinear resize: one Kronecker matmul per conv column tap --------
    #     (zero-padding + dx shift baked into a3; stores are 128-lane aligned)
    for kx in range(3):
        u_ref[:, kx * D:(kx + 1) * D] = jnp.dot(
            a3_ref[kx], pm, preferred_element_type=jnp.float32
        ).astype(jnp.bfloat16)

    # --- 4) 3x3 conv as 3 K=3*D matmuls, accumulated in a VMEM f32 ref -------
    acc_ref[...] = jnp.dot(u_ref[0:HW, :], wk3_ref[0],
                           preferred_element_type=jnp.float32)
    for ky in range(1, 3):                      # static, tile-aligned slices
        acc_ref[...] += jnp.dot(u_ref[ky * Wd:ky * Wd + HW, :], wk3_ref[ky],
                                preferred_element_type=jnp.float32)

    # --- 5) channel-major store (NCHW without a wrapper-side transpose) ------
    o_ref[0] = acc_ref[...].T.astype(o_ref.dtype)               # (D, H*W)


# ----------------------------------------------------------------------------
# Forward pass (matches PromptGenBlock.forward semantics, NCHW in / NCHW out).
# ----------------------------------------------------------------------------
@jax.jit
def prompt_gen_block(x, prompt_param, linear_w, linear_b, conv_w):
    B, C, H, W = x.shape
    _, L, D, S, _ = prompt_param.shape

    # Compile-time interpolation constants (no scatters, built host-side).
    ah = _bilinear_matrix_np(H, S)                       # (H, S)
    aw = _bilinear_matrix_np(W, S)                       # (W, S)
    zrow = np.zeros((1, S), np.float32)
    ah_pad = np.concatenate([zrow, ah, zrow], axis=0)    # (H+2, S): conv pad rows
    aw_taps = [np.concatenate([zrow, aw[:-1]], axis=0),  # kx=0: column w-1
               aw,                                       # kx=1: column w
               np.concatenate([aw[1:], zrow], axis=0)]   # kx=2: column w+1
    # Kronecker matrix per column tap: (A3[kx] @ pm) == zero-padded bilinear
    # resize with the kx column shift, rows ordered (h_pad, w) row-major.
    a3_np = np.stack([np.kron(ah_pad, awk) for awk in aw_taps], axis=0)
    a3 = jnp.asarray(a3_np, dtype=jnp.bfloat16)          # (3, (H+2)*W, S*S)

    # Conv weights regrouped per row tap ky, contraction axis = (kx, Cin).
    wk3 = jnp.transpose(conv_w, (2, 3, 1, 0)).reshape(3, 3 * D, D)
    wk3 = wk3.astype(jnp.bfloat16)                       # (3, 3*D, D)

    p_in = jnp.transpose(prompt_param[0], (0, 2, 3, 1)).reshape(L, S * S, D)
    wl_t = linear_w.T                                    # (C, L)
    bl = linear_b.reshape(1, L)
    x_flat = x.reshape(B, C, H * W)

    flops = B * (2 * 3 * H * W * (3 * D) * D             # 3x3 conv
                 + 2 * 3 * (H + 2) * W * S * S * D       # resize
                 + 2 * L * S * S * D                     # prompt mixing
                 + C * H * W)                            # spatial mean
    bytes_accessed = (x_flat.size * 4 + p_in.size * 4 + a3.size * 2
                      + wk3.size * 2 + wl_t.size * 4 + B * D * H * W * 4)
    cost = pl.CostEstimate(flops=int(flops), transcendentals=int(B * L),
                           bytes_accessed=int(bytes_accessed))

    out_flat = pl.pallas_call(
        _prompt_gen_kernel,
        out_shape=jax.ShapeDtypeStruct((B, D, H * W), jnp.float32),
        grid=(B,),
        in_specs=[
            pl.BlockSpec((1, C, H * W), lambda b: (b, 0, 0)),        # x (one image)
            pl.BlockSpec((C, L), lambda b: (0, 0)),                  # linear W^T
            pl.BlockSpec((1, L), lambda b: (0, 0)),                  # linear bias
            pl.BlockSpec((L, S * S, D), lambda b: (0, 0, 0)),        # prompts
            pl.BlockSpec((3, (H + 2) * W, S * S), lambda b: (0, 0, 0)),  # Kron interp
            pl.BlockSpec((3, 3 * D, D), lambda b: (0, 0, 0)),        # conv taps
        ],
        out_specs=pl.BlockSpec((1, D, H * W), lambda b: (b, 0, 0)),
        scratch_shapes=[
            pltpu.VMEM(((H + 2) * W, 3 * D), jnp.bfloat16),          # resized prompt
            pltpu.VMEM((H * W, D), jnp.float32),                     # conv accumulator
        ],
        compiler_params=pltpu.CompilerParams(
            dimension_semantics=("parallel",)),
        cost_estimate=cost,
    )(x_flat, wl_t, bl, p_in, a3, wk3)

    return out_flat.reshape(B, D, H, W)                  # pure reshape, NCHW out


# ----------------------------------------------------------------------------
# Pure-JAX reference for the self-check.
# ----------------------------------------------------------------------------
def reference(x, prompt_param, linear_w, linear_b, conv_w):
    B, C, H, W = x.shape
    _, L, D, S, _ = prompt_param.shape
    emb = x.mean(axis=(2, 3))
    wts = jax.nn.softmax(emb @ linear_w.T + linear_b, axis=1)
    prompt = jnp.einsum('bl,ldsr->bdsr', wts, prompt_param[0])
    Ah = jnp.asarray(_bilinear_matrix_np(H, S))
    Aw = jnp.asarray(_bilinear_matrix_np(W, S))
    up = jnp.einsum('hs,bdsr,wr->bdhw', Ah, prompt, Aw,
                    precision=lax.Precision.HIGHEST)
    return lax.conv_general_dilated(
        up, conv_w, window_strides=(1, 1), padding=((1, 1), (1, 1)),
        dimension_numbers=('NCHW', 'OIHW', 'NCHW'),
        precision=lax.Precision.HIGHEST)


if __name__ == "__main__":
    # Small, forward-consistent sizes (prompt_dim kept at the module default
    # 128 so the channel/lane axis is dense; lin_dim at the module default 192).
    B, H, W = 2, 16, 16
    prompt_dim, prompt_len, prompt_size, lin_dim = 128, 5, 8, 192

    key = jax.random.PRNGKey(0)
    k_x, k_p, k_lw, k_lb, k_c = jax.random.split(key, 5)

    x = jax.random.normal(k_x, (B, lin_dim, H, W), jnp.float32)
    prompt_param = jax.random.uniform(
        k_p, (1, prompt_len, prompt_dim, prompt_size, prompt_size), jnp.float32)
    k_lin = 1.0 / np.sqrt(lin_dim)
    linear_w = jax.random.uniform(k_lw, (prompt_len, lin_dim), jnp.float32,
                                  -k_lin, k_lin)
    linear_b = jax.random.uniform(k_lb, (prompt_len,), jnp.float32,
                                  -k_lin, k_lin)
    k_conv = 1.0 / np.sqrt(prompt_dim * 9)
    conv_w = jax.random.uniform(k_c, (prompt_dim, prompt_dim, 3, 3), jnp.float32,
                                -k_conv, k_conv)

    out = prompt_gen_block(x, prompt_param, linear_w, linear_b, conv_w)
    out = jax.block_until_ready(out)
    assert out.shape == (B, prompt_dim, H, W)

    ref = reference(x, prompt_param, linear_w, linear_b, conv_w)
    max_err = float(jnp.max(jnp.abs(out - ref)))
    # Tolerance covers the bf16 MXU operands (f32 accumulation, exact softmax).
    if max_err > 2e-2:
        raise AssertionError(f"Pallas output mismatch vs reference: {max_err}")

    print("KERNEL_OK")
</pallas_src>

<mosaic_0001>
module attributes {stable_mosaic.version = 11 : i64} {
  func.func @_prompt_gen_kernel(%arg0: i32, %arg1: memref<1x192x256xf32, #tpu.memory_space<vmem>>, %arg2: memref<192x5xf32, #tpu.memory_space<vmem>>, %arg3: memref<1x5xf32, #tpu.memory_space<vmem>>, %arg4: memref<5x64x128xf32, #tpu.memory_space<vmem>>, %arg5: memref<3x288x64xbf16, #tpu.memory_space<vmem>>, %arg6: memref<3x384x128xbf16, #tpu.memory_space<vmem>>, %arg7: memref<1x128x256xf32, #tpu.memory_space<vmem>>, %arg8: memref<288x384xbf16, #tpu.memory_space<vmem>>, %arg9: memref<256x128xf32, #tpu.memory_space<vmem>>) attributes {dimension_semantics = [#tpu.dimension_semantics<parallel>], iteration_bounds = array<i64: 2>, scalar_prefetch = 0 : i64, scratch_operands = 2 : i64, tpu.core_type = #tpu.core_type<tc>, window_params = [{transform_indices = @transform_0, window_bounds = array<i64: 1, 192, 256>}, {pipeline_mode = #tpu.pipeline_mode<synchronous>, transform_indices = @transform_1, window_bounds = array<i64: 192, 5>}, {pipeline_mode = #tpu.pipeline_mode<synchronous>, transform_indices = @transform_2, window_bounds = array<i64: 1, 5>}, {pipeline_mode = #tpu.pipeline_mode<synchronous>, transform_indices = @transform_3, window_bounds = array<i64: 5, 64, 128>}, {pipeline_mode = #tpu.pipeline_mode<synchronous>, transform_indices = @transform_4, window_bounds = array<i64: 3, 288, 64>}, {pipeline_mode = #tpu.pipeline_mode<synchronous>, transform_indices = @transform_5, window_bounds = array<i64: 3, 384, 128>}, {transform_indices = @transform_6, window_bounds = array<i64: 1, 128, 256>}]} {
    %c0 = arith.constant 0 : index
    %c0_0 = arith.constant 0 : index
    %c0_1 = arith.constant 0 : index
    %0 = vector.load %arg1[%c0, %c0_0, %c0_1] : memref<1x192x256xf32, #tpu.memory_space<vmem>>, vector<1x192x256xf32>
    %1 = vector.shape_cast %0 : vector<1x192x256xf32> to vector<192x256xf32>
    %cst = arith.constant dense<0.000000e+00> : vector<192xf32>
    %2 = vector.multi_reduction <add>, %1, %cst [1] : vector<192x256xf32> to vector<192xf32>
    %3 = vector.shape_cast %2 : vector<192xf32> to vector<192x1xf32>
    %cst_2 = arith.constant 3.906250e-03 : f32
    %4 = vector.broadcast %cst_2 : f32 to vector<192x1xf32>
    %5 = arith.mulf %3, %4 : vector<192x1xf32>
    %c0_3 = arith.constant 0 : index
    %c0_4 = arith.constant 0 : index
    %6 = vector.load %arg2[%c0_3, %c0_4] : memref<192x5xf32, #tpu.memory_space<vmem>>, vector<192x5xf32>
    %7 = vector.broadcast %5 : vector<192x1xf32> to vector<192x5xf32>
    %8 = arith.mulf %6, %7 : vector<192x5xf32>
    %cst_5 = arith.constant dense<0.000000e+00> : vector<5xf32>
    %9 = vector.multi_reduction <add>, %8, %cst_5 [0] : vector<192x5xf32> to vector<5xf32>
    %10 = vector.shape_cast %9 : vector<5xf32> to vector<1x5xf32>
    %c0_6 = arith.constant 0 : index
    %c0_7 = arith.constant 0 : index
    %11 = vector.load %arg3[%c0_6, %c0_7] : memref<1x5xf32, #tpu.memory_space<vmem>>, vector<1x5xf32>
    %12 = arith.addf %10, %11 : vector<1x5xf32>
    %cst_8 = arith.constant dense<0xFF800000> : vector<1xf32>
    %13 = vector.multi_reduction <maximumf>, %12, %cst_8 [1] : vector<1x5xf32> to vector<1xf32>
    %14 = vector.shape_cast %13 : vector<1xf32> to vector<1x1xf32>
    %15 = vector.broadcast %14 : vector<1x1xf32> to vector<1x5xf32>
    %16 = arith.subf %12, %15 : vector<1x5xf32>
    %17 = math.exp %16 : vector<1x5xf32>
    %cst_9 = arith.constant dense<0.000000e+00> : vector<1xf32>
    %18 = vector.multi_reduction <add>, %17, %cst_9 [1] : vector<1x5xf32> to vector<1xf32>
    %19 = vector.shape_cast %18 : vector<1xf32> to vector<1x1xf32>
    %20 = vector.broadcast %19 : vector<1x1xf32> to vector<1x5xf32>
    %21 = arith.divf %17, %20 : vector<1x5xf32>
    %c0_10 = arith.constant 0 : index
    %c0_11 = arith.constant 0 : index
    %c0_12 = arith.constant 0 : index
    %22 = vector.load %arg4[%c0_10, %c0_11, %c0_12] : memref<5x64x128xf32, #tpu.memory_space<vmem>>, vector<1x64x128xf32>
    %23 = vector.shape_cast %22 : vector<1x64x128xf32> to vector<64x128xf32>
    %24 = vector.extract_strided_slice %21 {offsets = [0, 0], sizes = [1, 1], strides = [1, 1]} : vector<1x5xf32> to vector<1x1xf32>
    %25 = vector.broadcast %24 : vector<1x1xf32> to vector<64x128xf32>
    %26 = arith.mulf %23, %25 : vector<64x128xf32>
    %c1 = arith.constant 1 : index
    %c0_13 = arith.constant 0 : index
    %c0_14 = arith.constant 0 : index
    %27 = vector.load %arg4[%c1, %c0_13, %c0_14] : memref<5x64x128xf32, #tpu.memory_space<vmem>>, vector<1x64x128xf32>
    %28 = vector.shape_cast %27 : vector<1x64x128xf32> to vector<64x128xf32>
    %29 = vector.extract_strided_slice %21 {offsets = [0, 1], sizes = [1, 1], strides = [1, 1]} : vector<1x5xf32> to vector<1x1xf32>
    %30 = vector.broadcast %29 : vector<1x1xf32> to vector<64x128xf32>
    %31 = arith.mulf %28, %30 : vector<64x128xf32>
    %32 = arith.addf %26, %31 : vector<64x128xf32>
    %c2 = arith.constant 2 : index
    %c0_15 = arith.constant 0 : index
    %c0_16 = arith.constant 0 : index
    %33 = vector.load %arg4[%c2, %c0_15, %c0_16] : memref<5x64x128xf32, #tpu.memory_space<vmem>>, vector<1x64x128xf32>
    %34 = vector.shape_cast %33 : vector<1x64x128xf32> to vector<64x128xf32>
    %35 = vector.extract_strided_slice %21 {offsets = [0, 2], sizes = [1, 1], strides = [1, 1]} : vector<1x5xf32> to vector<1x1xf32>
    %36 = vector.broadcast %35 : vector<1x1xf32> to vector<64x128xf32>
    %37 = arith.mulf %34, %36 : vector<64x128xf32>
    %38 = arith.addf %32, %37 : vector<64x128xf32>
    %c3 = arith.constant 3 : index
    %c0_17 = arith.constant 0 : index
    %c0_18 = arith.constant 0 : index
    %39 = vector.load %arg4[%c3, %c0_17, %c0_18] : memref<5x64x128xf32, #tpu.memory_space<vmem>>, vector<1x64x128xf32>
    %40 = vector.shape_cast %39 : vector<1x64x128xf32> to vector<64x128xf32>
    %41 = vector.extract_strided_slice %21 {offsets = [0, 3], sizes = [1, 1], strides = [1, 1]} : vector<1x5xf32> to vector<1x1xf32>
    %42 = vector.broadcast %41 : vector<1x1xf32> to vector<64x128xf32>
    %43 = arith.mulf %40, %42 : vector<64x128xf32>
    %44 = arith.addf %38, %43 : vector<64x128xf32>
    %c4 = arith.constant 4 : index
    %c0_19 = arith.constant 0 : index
    %c0_20 = arith.constant 0 : index
    %45 = vector.load %arg4[%c4, %c0_19, %c0_20] : memref<5x64x128xf32, #tpu.memory_space<vmem>>, vector<1x64x128xf32>
    %46 = vector.shape_cast %45 : vector<1x64x128xf32> to vector<64x128xf32>
    %47 = vector.extract_strided_slice %21 {offsets = [0, 4], sizes = [1, 1], strides = [1, 1]} : vector<1x5xf32> to vector<1x1xf32>
    %48 = vector.broadcast %47 : vector<1x1xf32> to vector<64x128xf32>
    %49 = arith.mulf %46, %48 : vector<64x128xf32>
    %50 = arith.addf %44, %49 : vector<64x128xf32>
    %51 = arith.truncf %50 : vector<64x128xf32> to vector<64x128xbf16>
    %c0_21 = arith.constant 0 : index
    %c0_22 = arith.constant 0 : index
    %c0_23 = arith.constant 0 : index
    %52 = vector.load %arg5[%c0_21, %c0_22, %c0_23] : memref<3x288x64xbf16, #tpu.memory_space<vmem>>, vector<1x288x64xbf16>
    %53 = vector.shape_cast %52 : vector<1x288x64xbf16> to vector<288x64xbf16>
    %cst_24 = arith.constant dense<0.000000e+00> : vector<288x128xf32>
    %54 = tpu.matmul %53, %51, %cst_24 {dimension_numbers = #tpu.dot_dimension_numbers<[1], [0], [0], [1], [0, 0, 1, 1], [], []>} : vector<288x64xbf16>, vector<64x128xbf16>, vector<288x128xf32> -> vector<288x128xf32>
    %55 = arith.truncf %54 : vector<288x128xf32> to vector<288x128xbf16>
    %c0_25 = arith.constant 0 : index
    %c0_26 = arith.constant 0 : index
    %56 = vector.load %arg8[%c0_25, %c0_26] : memref<288x384xbf16, #tpu.memory_space<vmem>>, vector<288x128xbf16>
    tpu.vector_store %arg8[%c0_25, %c0_26], %55 {strides = array<i32>} : memref<288x384xbf16, #tpu.memory_space<vmem>>, vector<288x128xbf16>,
    %c1_27 = arith.constant 1 : index
    %c0_28 = arith.constant 0 : index
    %c0_29 = arith.constant 0 : index
    %57 = vector.load %arg5[%c1_27, %c0_28, %c0_29] : memref<3x288x64xbf16, #tpu.memory_space<vmem>>, vector<1x288x64xbf16>
    %58 = vector.shape_cast %57 : vector<1x288x64xbf16> to vector<288x64xbf16>
    %cst_30 = arith.constant dense<0.000000e+00> : vector<288x128xf32>
    %59 = tpu.matmul %58, %51, %cst_30 {dimension_numbers = #tpu.dot_dimension_numbers<[1], [0], [0], [1], [0, 0, 1, 1], [], []>} : vector<288x64xbf16>, vector<64x128xbf16>, vector<288x128xf32> -> vector<288x128xf32>
    %60 = arith.truncf %59 : vector<288x128xf32> to vector<288x128xbf16>
    %c0_31 = arith.constant 0 : index
    %c128 = arith.constant 128 : index
    %61 = vector.load %arg8[%c0_31, %c128] : memref<288x384xbf16, #tpu.memory_space<vmem>>, vector<288x128xbf16>
    tpu.vector_store %arg8[%c0_31, %c128], %60 {strides = array<i32>} : memref<288x384xbf16, #tpu.memory_space<vmem>>, vector<288x128xbf16>,
    %c2_32 = arith.constant 2 : index
    %c0_33 = arith.constant 0 : index
    %c0_34 = arith.constant 0 : index
    %62 = vector.load %arg5[%c2_32, %c0_33, %c0_34] : memref<3x288x64xbf16, #tpu.memory_space<vmem>>, vector<1x288x64xbf16>
    %63 = vector.shape_cast %62 : vector<1x288x64xbf16> to vector<288x64xbf16>
    %cst_35 = arith.constant dense<0.000000e+00> : vector<288x128xf32>
    %64 = tpu.matmul %63, %51, %cst_35 {dimension_numbers = #tpu.dot_dimension_numbers<[1], [0], [0], [1], [0, 0, 1, 1], [], []>} : vector<288x64xbf16>, vector<64x128xbf16>, vector<288x128xf32> -> vector<288x128xf32>
    %65 = arith.truncf %64 : vector<288x128xf32> to vector<288x128xbf16>
    %c0_36 = arith.constant 0 : index
    %c256 = arith.constant 256 : index
    %66 = vector.load %arg8[%c0_36, %c256] : memref<288x384xbf16, #tpu.memory_space<vmem>>, vector<288x128xbf16>
    tpu.vector_store %arg8[%c0_36, %c256], %65 {strides = array<i32>} : memref<288x384xbf16, #tpu.memory_space<vmem>>, vector<288x128xbf16>,
    %c0_37 = arith.constant 0 : index
    %c0_38 = arith.constant 0 : index
    %67 = vector.load %arg8[%c0_37, %c0_38] : memref<288x384xbf16, #tpu.memory_space<vmem>>, vector<256x384xbf16>
    %c0_39 = arith.constant 0 : index
    %c0_40 = arith.constant 0 : index
    %c0_41 = arith.constant 0 : index
    %68 = vector.load %arg6[%c0_39, %c0_40, %c0_41] : memref<3x384x128xbf16, #tpu.memory_space<vmem>>, vector<1x384x128xbf16>
    %69 = vector.shape_cast %68 : vector<1x384x128xbf16> to vector<384x128xbf16>
    %cst_42 = arith.constant dense<0.000000e+00> : vector<256x128xf32>
    %70 = tpu.matmul %67, %69, %cst_42 {dimension_numbers = #tpu.dot_dimension_numbers<[1], [0], [0], [1], [0, 0, 1, 1], [], []>} : vector<256x384xbf16>, vector<384x128xbf16>, vector<256x128xf32> -> vector<256x128xf32>
    %c0_43 = arith.constant 0 : index
    %c0_44 = arith.constant 0 : index
    %71 = vector.load %arg9[%c0_43, %c0_44] : memref<256x128xf32, #tpu.memory_space<vmem>>, vector<256x128xf32>
    tpu.vector_store %arg9[%c0_43, %c0_44], %70 {strides = array<i32>} : memref<256x128xf32, #tpu.memory_space<vmem>>, vector<256x128xf32>,
    %c0_45 = arith.constant 0 : index
    %c0_46 = arith.constant 0 : index
    %72 = vector.load %arg9[%c0_45, %c0_46] : memref<256x128xf32, #tpu.memory_space<vmem>>, vector<256x128xf32>
    %c16 = arith.constant 16 : index
    %c0_47 = arith.constant 0 : index
    %73 = vector.load %arg8[%c16, %c0_47] : memref<288x384xbf16, #tpu.memory_space<vmem>>, vector<256x384xbf16>
    %c1_48 = arith.constant 1 : index
    %c0_49 = arith.constant 0 : index
    %c0_50 = arith.constant 0 : index
    %74 = vector.load %arg6[%c1_48, %c0_49, %c0_50] : memref<3x384x128xbf16, #tpu.memory_space<vmem>>, vector<1x384x128xbf16>
    %75 = vector.shape_cast %74 : vector<1x384x128xbf16> to vector<384x128xbf16>
    %cst_51 = arith.constant dense<0.000000e+00> : vector<256x128xf32>
    %76 = tpu.matmul %73, %75, %cst_51 {dimension_numbers = #tpu.dot_dimension_numbers<[1], [0], [0], [1], [0, 0, 1, 1], [], []>} : vector<256x384xbf16>, vector<384x128xbf16>, vector<256x128xf32> -> vector<256x128xf32>
    %77 = arith.addf %72, %76 : vector<256x128xf32>
    %c0_52 = arith.constant 0 : index
    %c0_53 = arith.constant 0 : index
    %78 = vector.load %arg9[%c0_52, %c0_53] : memref<256x128xf32, #tpu.memory_space<vmem>>, vector<256x128xf32>
    tpu.vector_store %arg9[%c0_52, %c0_53], %77 {strides = array<i32>} : memref<256x128xf32, #tpu.memory_space<vmem>>, vector<256x128xf32>,
    %c0_54 = arith.constant 0 : index
    %c0_55 = arith.constant 0 : index
    %79 = vector.load %arg9[%c0_54, %c0_55] : memref<256x128xf32, #tpu.memory_space<vmem>>, vector<256x128xf32>
    %c32 = arith.constant 32 : index
    %c0_56 = arith.constant 0 : index
    %80 = vector.load %arg8[%c32, %c0_56] : memref<288x384xbf16, #tpu.memory_space<vmem>>, vector<256x384xbf16>
    %c2_57 = arith.constant 2 : index
    %c0_58 = arith.constant 0 : index
    %c0_59 = arith.constant 0 : index
    %81 = vector.load %arg6[%c2_57, %c0_58, %c0_59] : memref<3x384x128xbf16, #tpu.memory_space<vmem>>, vector<1x384x128xbf16>
    %82 = vector.shape_cast %81 : vector<1x384x128xbf16> to vector<384x128xbf16>
    %cst_60 = arith.constant dense<0.000000e+00> : vector<256x128xf32>
    %83 = tpu.matmul %80, %82, %cst_60 {dimension_numbers = #tpu.dot_dimension_numbers<[1], [0], [0], [1], [0, 0, 1, 1], [], []>} : vector<256x384xbf16>, vector<384x128xbf16>, vector<256x128xf32> -> vector<256x128xf32>
    %84 = arith.addf %79, %83 : vector<256x128xf32>
    %c0_61 = arith.constant 0 : index
    %c0_62 = arith.constant 0 : index
    %85 = vector.load %arg9[%c0_61, %c0_62] : memref<256x128xf32, #tpu.memory_space<vmem>>, vector<256x128xf32>
    tpu.vector_store %arg9[%c0_61, %c0_62], %84 {strides = array<i32>} : memref<256x128xf32, #tpu.memory_space<vmem>>, vector<256x128xf32>,
    %c0_63 = arith.constant 0 : index
    %c0_64 = arith.constant 0 : index
    %86 = vector.load %arg9[%c0_63, %c0_64] : memref<256x128xf32, #tpu.memory_space<vmem>>, vector<256x128xf32>
    %87 = tpu.transpose %86, [1, 0] : vector<256x128xf32> -> vector<128x256xf32>
    %c0_65 = arith.constant 0 : index
    %c0_66 = arith.constant 0 : index
    %c0_67 = arith.constant 0 : index
    %88 = vector.load %arg7[%c0_65, %c0_66, %c0_67] : memref<1x128x256xf32, #tpu.memory_space<vmem>>, vector<1x128x256xf32>
    %89 = vector.shape_cast %88 : vector<1x128x256xf32> to vector<128x256xf32>
    %90 = vector.shape_cast %87 : vector<128x256xf32> to vector<1x128x256xf32>
    tpu.vector_store %arg7[%c0_65, %c0_66, %c0_67], %90 {strides = array<i32>} : memref<1x128x256xf32, #tpu.memory_space<vmem>>, vector<1x128x256xf32>,
    return
  }
  func.func @transform_0(%arg0: i32) -> (i32, i32, i32) {
    %c0_i32 = arith.constant 0 : i32
    %c0_i32_0 = arith.constant 0 : i32
    %c0_i32_1 = arith.constant 0 : i32
    return %arg0, %c0_i32, %c0_i32_0 : i32, i32, i32
  }
  func.func @transform_1(%arg0: i32) -> (i32, i32) {
    %c0_i32 = arith.constant 0 : i32
    %c0_i32_0 = arith.constant 0 : i32
    %c0_i32_1 = arith.constant 0 : i32
    return %c0_i32, %c0_i32_0 : i32, i32
  }
  func.func @transform_2(%arg0: i32) -> (i32, i32) {
    %c0_i32 = arith.constant 0 : i32
    %c0_i32_0 = arith.constant 0 : i32
    %c0_i32_1 = arith.constant 0 : i32
    return %c0_i32, %c0_i32_0 : i32, i32
  }
  func.func @transform_3(%arg0: i32) -> (i32, i32, i32) {
    %c0_i32 = arith.constant 0 : i32
    %c0_i32_0 = arith.constant 0 : i32
    %c0_i32_1 = arith.constant 0 : i32
    %c0_i32_2 = arith.constant 0 : i32
    return %c0_i32, %c0_i32_0, %c0_i32_1 : i32, i32, i32
  }
  func.func @transform_4(%arg0: i32) -> (i32, i32, i32) {
    %c0_i32 = arith.constant 0 : i32
    %c0_i32_0 = arith.constant 0 : i32
    %c0_i32_1 = arith.constant 0 : i32
    %c0_i32_2 = arith.constant 0 : i32
    return %c0_i32, %c0_i32_0, %c0_i32_1 : i32, i32, i32
  }
  func.func @transform_5(%arg0: i32) -> (i32, i32, i32) {
    %c0_i32 = arith.constant 0 : i32
    %c0_i32_0 = arith.constant 0 : i32
    %c0_i32_1 = arith.constant 0 : i32
    %c0_i32_2 = arith.constant 0 : i32
    return %c0_i32, %c0_i32_0, %c0_i32_1 : i32, i32, i32
  }
  func.func @transform_6(%arg0: i32) -> (i32, i32, i32) {
    %c0_i32 = arith.constant 0 : i32
    %c0_i32_0 = arith.constant 0 : i32
    %c0_i32_1 = arith.constant 0 : i32
    return %arg0, %c0_i32, %c0_i32_0 : i32, i32, i32
  }
}

</mosaic_0001>

<bundles_post_ra>
// kernel: prompt_gen_block.1
= control target key start
LH: loop header
LB: loop body
LE: loop exit
PB: predicated region body
PF: predicated region fallthrough
CT: control target
= control target key end

     0   :  { %s6161_s21 = smov 0   ;;  %s7460_s0 = inlined_call_operand.vmem [shape: f32[2,192,256], index: 0, kind: input, shape index: {}]   ;;  %s7461_s1 = inlined_call_operand.vmem [shape: f32[192,5], index: 1, kind: input, shape index: {}]   ;;  %s7462_s2 = inlined_call_operand.vmem [shape: f32[1,5], index: 2, kind: input, shape index: {}]   ;;  %s7463_s3 = inlined_call_operand.vmem [shape: f32[5,64,128], index: 3, kind: input, shape index: {}]   ;;  %s7464_s4 = inlined_call_operand.vmem [shape: bf16[3,288,64], index: 4, kind: input, shape index: {}]   ;;  %s7465_s5 = inlined_call_operand.vmem [shape: bf16[3,384,128], index: 5, kind: input, shape index: {}]   ;;  %s7466_s6 = inlined_call_operand.vmem [shape: f32[2,128,256], index: 6, kind: output, shape index: {}]  }
   0x1 LB: > { %s4472_s22 = sadd.s32 4294967295, %s6120_s21   ;;  %p4476_p0 = scmp.ge.s32.totalorder %s6120_s21, 1  ;;  %s6120_s21 = sphi %s6161_s21, %s16_s21  }
   0x2   : > { %p212_p1 = scmp.lt.s32.totalorder %s6120_s21, 3 }
   0x4   : > { %p213_p2 = pnand %p4476_p0, %p212_p1 }
   0x6   : > { %216 = sbr.rel (%p213_p2) target bundleno = 1872 (0x750), region = 44 }
   0xb   : > { %p242_p3 = scmp.lt.s32.totalorder %s4472_s22, 1  ;;  %vm445_vm0 = vcmask 39936   ;;  %vm501_vm1 = vcmask 32768   ;;  %s6122_s9 = smov 125   ;;  %vm796_vm6 = vcmask 523264  }
   0xc   : > { %s6123_s10 = smov 126   ;;  %s6124_s11 = smov 127  }
   0xd   : > { %s7674_s22 = smov (!%p242_p3, %s4472_s22), 1  ;;  %s6125_s12 = smov 124  }
   0xe   : > { %s6087_s23 = smul.u32 384, %s7674_s22  ;;  %s5816_s20 = sshll.u32 %s7674_s22, 8 }
   0xf   : > { %s7409_s25 = scalar_lea.vmem %s7466_s6, %s5816_s20 }
  0x10   : > { %s6175_s26 = scalar_lea.vmem %s7460_s0, %s6087_s23 }
  0x11   : > { %v253_v0 = vld [vmem:[%s6175_s26] sm:$0xff]  ;;  %v254_v1 = vld [vmem:[%s6175_s26 + $0x8] sm:$0xff]  ;;  %v255_v9 = vld [vmem:[%s6175_s26 + $0x10] sm:$0xff] }
  0x12   : > { %v257_v2 = vld [vmem:[%s6175_s26 + $0x20] sm:$0xff]  ;;  %v301_v3 = vadd.f32 %v254_v1, %v253_v0  ;;  %v258_v4 = vld [vmem:[%s6175_s26 + $0x28] sm:$0xff]  ;;  %v256_v10 = vld [vmem:[%s6175_s26 + $0x18] sm:$0xff] }
  0x13   : > { %v261_v5 = vld [vmem:[%s6175_s26 + $0x40] sm:$0xff]  ;;  %v262_v6 = vld [vmem:[%s6175_s26 + $0x48] sm:$0xff]  ;;  %v307_v7 = vadd.f32 %v258_v4, %v257_v2  ;;  %v259_v11 = vld [vmem:[%s6175_s26 + $0x30] sm:$0xff]  ;;  %v304_v15 = vadd.f32 %v256_v10, %v255_v9 }
  0x14   : > { %v313_v8 = vadd.f32 %v262_v6, %v261_v5  ;;  %302 = vadd.xlane.f32.xlu0 %v301_v3  ;;  %v260_v12 = vld [vmem:[%s6175_s26 + $0x38] sm:$0xff]  ;;  %v263_v13 = vld [vmem:[%s6175_s26 + $0x50] sm:$0xff]  ;;  %v265_v18 = vld [vmem:[%s6175_s26 + $0x60] sm:$0xff] }
  0x15   : > { %308 = vadd.xlane.f32.xlu1 %v307_v7  ;;  %v264_v14 = vld [vmem:[%s6175_s26 + $0x58] sm:$0xff]  ;;  %v310_v16 = vadd.f32 %v260_v12, %v259_v11  ;;  %v266_v19 = vld [vmem:[%s6175_s26 + $0x68] sm:$0xff]  ;;  %v267_v20 = vld [vmem:[%s6175_s26 + $0x70] sm:$0xff] }
  0x16   : > { %314 = vadd.xlane.f32.xlu2 %v313_v8  ;;  %v316_v17 = vadd.f32 %v264_v14, %v263_v13  ;;  %v268_v21 = vld [vmem:[%s6175_s26 + $0x78] sm:$0xff]  ;;  %v269_v22 = vld [vmem:[%s6175_s26 + $0x80] sm:$0xff]  ;;  %v270_v23 = vld [vmem:[%s6175_s26 + $0x88] sm:$0xff]  ;;  %v319_v24 = vadd.f32 %v266_v19, %v265_v18 }
  0x17   : > { %v322_v25 = vadd.f32 %v268_v21, %v267_v20  ;;  %v325_v26 = vadd.f32 %v270_v23, %v269_v22  ;;  %v271_v27 = vld [vmem:[%s6175_s26 + $0x90] sm:$0xff]  ;;  %v272_v28 = vld [vmem:[%s6175_s26 + $0x98] sm:$0xff]  ;;  %v273_v29 = vld [vmem:[%s6175_s26 + $0xa0] sm:$0xff] }
  0x18   : > { %v274_v30 = vld [vmem:[%s6175_s26 + $0xa8] sm:$0xff]  ;;  %v275_v31 = vld [vmem:[%s6175_s26 + $0xb0] sm:$0xff]  ;;  %v276_v32 = vld [vmem:[%s6175_s26 + $0xb8] sm:$0xff]  ;;  %v328_v33 = vadd.f32 %v272_v28, %v271_v27 }
  0x19   : > { %v331_v34 = vadd.f32 %v274_v30, %v273_v29  ;;  %v334_v35 = vadd.f32 %v276_v32, %v275_v31  ;;  %v277_v36 = vld [vmem:[%s6175_s26 + $0xc0] sm:$0xff]  ;;  %v278_v37 = vld [vmem:[%s6175_s26 + $0xc8] sm:$0xff]  ;;  %v279_v38 = vld [vmem:[%s6175_s26 + $0xd0] sm:$0xff] }
  0x1a   : > { %v280_v39 = vld [vmem:[%s6175_s26 + $0xd8] sm:$0xff]  ;;  %v281_v40 = vld [vmem:[%s6175_s26 + $0xe0] sm:$0xff]  ;;  %v282_v41 = vld [vmem:[%s6175_s26 + $0xe8] sm:$0xff]  ;;  %v337_v42 = vadd.f32 %v278_v37, %v277_v36 }
  0x1b   : > { %v340_v43 = vadd.f32 %v280_v39, %v279_v38  ;;  %v343_v44 = vadd.f32 %v282_v41, %v281_v40  ;;  %v283_v45 = vld [vmem:[%s6175_s26 + $0xf0] sm:$0xff]  ;;  %v284_v46 = vld [vmem:[%s6175_s26 + $0xf8] sm:$0xff]  ;;  %v285_v47 = vld [vmem:[%s6175_s26 + $0x100] sm:$0xff] }
  0x1c   : > { %305 = vadd.xlane.f32.xlu0 %v304_v15  ;;  %v286_v48 = vld [vmem:[%s6175_s26 + $0x108] sm:$0xff]  ;;  %v287_v49 = vld [vmem:[%s6175_s26 + $0x110] sm:$0xff]  ;;  %v288_v50 = vld [vmem:[%s6175_s26 + $0x118] sm:$0xff]  ;;  %v346_v51 = vadd.f32 %v284_v46, %v283_v45 }
  0x1d   : > { %311 = vadd.xlane.f32.xlu1 %v310_v16  ;;  %v349_v52 = vadd.f32 %v286_v48, %v285_v47  ;;  %v352_v53 = vadd.f32 %v288_v50, %v287_v49  ;;  %v289_v54 = vld [vmem:[%s6175_s26 + $0x120] sm:$0xff]  ;;  %v290_v55 = vld [vmem:[%s6175_s26 + $0x128] sm:$0xff]  ;;  %v291_v56 = vld [vmem:[%s6175_s26 + $0x130] sm:$0xff] }
  0x1e   : > { %317 = vadd.xlane.f32.xlu2 %v316_v17  ;;  %v292_v57 = vld [vmem:[%s6175_s26 + $0x138] sm:$0xff]  ;;  %v293_v58 = vld [vmem:[%s6175_s26 + $0x140] sm:$0xff]  ;;  %v294_v59 = vld [vmem:[%s6175_s26 + $0x148] sm:$0xff]  ;;  %v355_v60 = vadd.f32 %v290_v55, %v289_v54 }
  0x1f   : > { %v358_v61 = vadd.f32 %v292_v57, %v291_v56  ;;  %v361_v62 = vadd.f32 %v294_v59, %v293_v58  ;;  %v295_v63 = vld [vmem:[%s6175_s26 + $0x150] sm:$0xff]  ;;  %v296_v0 = vld [vmem:[%s6175_s26 + $0x158] sm:$0xff]  ;;  %v297_v1 = vld [vmem:[%s6175_s26 + $0x160] sm:$0xff] }
  0x20   : > { %v298_v2 = vld [vmem:[%s6175_s26 + $0x168] sm:$0xff]  ;;  %v299_v3 = vld [vmem:[%s6175_s26 + $0x170] sm:$0xff]  ;;  %v300_v4 = vld [vmem:[%s6175_s26 + $0x178] sm:$0xff]  ;;  %v364_v5 = vadd.f32 %v296_v0, %v295_v63 }
  0x21   : > { %v367_v6 = vadd.f32 %v298_v2, %v297_v1  ;;  %v370_v7 = vadd.f32 %v300_v4, %v299_v3  ;;  %v397_v12 = vld [vmem:[%s7461_s1] sm:$0xff]  ;;  %v399_v14 = vld [vmem:[%s7461_s1 + $0x10] sm:$0xff]  ;;  %v398_v15 = vld [vmem:[%s7461_s1 + $0x8] sm:$0xff] }
  0x22   : > { %v400_v21 = vld [vmem:[%s7461_s1 + $0x18] sm:$0xff]  ;;  %v402_v32 = vld [vmem:[%s7461_s1 + $0x28] sm:$0xff]  ;;  %v403_v36 = vld [vmem:[%s7461_s1 + $0x30] sm:$0xff] }
  0x23   : > { %v405_v50 = vld [vmem:[%s7461_s1 + $0x40] sm:$0xff]  ;;  %v406_v57 = vld [vmem:[%s7461_s1 + $0x48] sm:$0xff]  ;;  %v408_v2 = vld [vmem:[%s7461_s1 + $0x58] sm:$0xff] }
  0x24   : > { %320 = vadd.xlane.f32.xlu0 %v319_v24 }
  0x25   : > { %323 = vadd.xlane.f32.xlu1 %v322_v25 }
  0x26   : > { %326 = vadd.xlane.f32.xlu2 %v325_v26  ;;  %v401_v26 = vld [vmem:[%s7461_s1 + $0x20] sm:$0xff] }
  0x2c   : > { %329 = vadd.xlane.f32.xlu0 %v328_v33 }
  0x2d   : > { %332 = vadd.xlane.f32.xlu1 %v331_v34 }
  0x2e   : > { %335 = vadd.xlane.f32.xlu2 %v334_v35 }
  0x34   : > { %338 = vadd.xlane.f32.xlu0 %v337_v42 }
  0x35   : > { %341 = vadd.xlane.f32.xlu1 %v340_v43 }
  0x36   : > { %344 = vadd.xlane.f32.xlu2 %v343_v44  ;;  %v404_v44 = vld [vmem:[%s7461_s1 + $0x38] sm:$0xff] }
  0x3c   : > { %347 = vadd.xlane.f32.xlu0 %v346_v51 }
  0x3d   : > { %350 = vadd.xlane.f32.xlu1 %v349_v52 }
  0x3e   : > { %353 = vadd.xlane.f32.xlu2 %v352_v53 }
  0x44   : > { %356 = vadd.xlane.f32.xlu0 %v355_v60 }
  0x45   : > { %359 = vadd.xlane.f32.xlu1 %v358_v61  ;;  %v407_v61 = vld [vmem:[%s7461_s1 + $0x50] sm:$0xff] }
  0x46   : > { %362 = vadd.xlane.f32.xlu2 %v361_v62 }
  0x4c   : > { %365 = vadd.xlane.f32.xlu0 %v364_v5 }
  0x4d   : > { %368 = vadd.xlane.f32.xlu1 %v367_v6 }
  0x4e   : > { %371 = vadd.xlane.f32.xlu2 %v370_v7 }
  0x87   : > { %v303_v8 = vpop.xlane.xlu0 %302 }
  0x88   : > { %v309_v9 = vpop.xlane.xlu1 %308  ;;  %v373_v11 = vmul.f32 0.00390625, %v303_v8 }
  0x89   : > { %v315_v10 = vpop.xlane.xlu2 %314  ;;  %v375_v13 = vmul.f32 0.00390625, %v309_v9 }
  0x8a   : > { %v421_v17 = vmul.f32 %v397_v12, %v373_v11  ;;  %v377_v24 = vmul.f32 0.00390625, %v315_v10 }
  0x8b   : > { %v423_v23 = vmul.f32 %v399_v14, %v375_v13  ;;  %v409_v13 = vld [vmem:[%s7461_s1 + $0x60] sm:$0xff] }
  0x8c   : > { %v446_v27 = vsel %vm445_vm0, %v421_v17, 0.0  ;;  %v425_v34 = vmul.f32 %v401_v26, %v377_v24  ;;  %v410_v17 = vld [vmem:[%s7461_s1 + $0x68] sm:$0xff] }
  0x8d   : > { %v449_v33 = vsel %vm445_vm0, %v423_v23, 0.0 }
  0x8e   : > { %v453_v46 = vsel %vm445_vm0, %v425_v34, 0.0 }
  0x8f   : > { %v306_v16 = vpop.xlane.xlu0 %305 }
  0x90   : > { %v374_v18 = vmul.f32 0.00390625, %v306_v16  ;;  %v312_v19 = vpop.xlane.xlu1 %311 }
  0x91   : > { %v318_v20 = vpop.xlane.xlu2 %317  ;;  %v376_v22 = vmul.f32 0.00390625, %v312_v19 }
  0x92   : > { %v422_v25 = vmul.f32 %v398_v15, %v374_v18  ;;  %v378_v30 = vmul.f32 0.00390625, %v318_v20 }
  0x93   : > { %v424_v29 = vmul.f32 %v400_v21, %v376_v22  ;;  %v411_v21 = vld [vmem:[%s7461_s1 + $0x70] sm:$0xff] }
  0x94   : > { %v447_v28 = vsel %vm445_vm0, %v422_v25, 0.0  ;;  %v426_v39 = vmul.f32 %v402_v32, %v378_v30 }
  0x95   : > { %v448_v31 = vadd.f32 %v447_v28, %v446_v27  ;;  %v451_v38 = vsel %vm445_vm0, %v424_v29, 0.0 }
  0x96   : > { %v455_v51 = vsel %vm445_vm0, %v426_v39, 0.0  ;;  %v414_v39 = vld [vmem:[%s7461_s1 + $0x88] sm:$0xff] }
  0x97   : > { %v450_v35 = vadd.f32 %v449_v33, %v448_v31  ;;  %v321_v37 = vpop.xlane.xlu0 %320  ;;  %v412_v31 = vld [vmem:[%s7461_s1 + $0x78] sm:$0xff] }
  0x98   : > { %v379_v40 = vmul.f32 0.00390625, %v321_v37  ;;  %v324_v41 = vpop.xlane.xlu1 %323 }
  0x99   : > { %v327_v42 = vpop.xlane.xlu2 %326  ;;  %v452_v43 = vadd.f32 %v451_v38, %v450_v35  ;;  %v380_v45 = vmul.f32 0.00390625, %v324_v41  ;;  %v413_v35 = vld [vmem:[%s7461_s1 + $0x80] sm:$0xff] }
  0x9a   : > { %v427_v47 = vmul.f32 %v403_v36, %v379_v40  ;;  %v381_v48 = vmul.f32 0.00390625, %v327_v42 }
  0x9b   : > { %v454_v49 = vadd.f32 %v453_v46, %v452_v43  ;;  %v428_v52 = vmul.f32 %v404_v44, %v380_v45 }
  0x9c   : > { %v457_v54 = vsel %vm445_vm0, %v427_v47, 0.0  ;;  %v429_v55 = vmul.f32 %v405_v50, %v381_v48 }
  0x9d   : > { %v456_v53 = vadd.f32 %v455_v51, %v454_v49  ;;  %v459_v59 = vsel %vm445_vm0, %v428_v52, 0.0  ;;  %v415_v49 = vld [vmem:[%s7461_s1 + $0x90] sm:$0xff] }
  0x9e   : > { %v461_v4 = vsel %vm445_vm0, %v429_v55, 0.0 }
  0x9f   : > { %v458_v56 = vadd.f32 %v457_v54, %v456_v53  ;;  %v330_v58 = vpop.xlane.xlu0 %329  ;;  %v416_v53 = vld [vmem:[%s7461_s1 + $0x98] sm:$0xff] }
  0xa0   : > { %v382_v60 = vmul.f32 0.00390625, %v330_v58  ;;  %v333_v62 = vpop.xlane.xlu1 %332 }
  0xa1   : > { %v336_v63 = vpop.xlane.xlu2 %335  ;;  %v460_v0 = vadd.f32 %v459_v59, %v458_v56  ;;  %v383_v1 = vmul.f32 0.00390625, %v333_v62 }
  0xa2   : > { %v384_v3 = vmul.f32 0.00390625, %v336_v63  ;;  %v430_v5 = vmul.f32 %v406_v57, %v382_v60  ;;  %v417_v57 = vld [vmem:[%s7461_s1 + $0xa0] sm:$0xff] }
  0xa3   : > { %v462_v6 = vadd.f32 %v461_v4, %v460_v0  ;;  %v431_v7 = vmul.f32 %v407_v61, %v383_v1 }
  0xa4   : > { %v463_v8 = vsel %vm445_vm0, %v430_v5, 0.0  ;;  %v432_v9 = vmul.f32 %v408_v2, %v384_v3  ;;  %v418_v3 = vld [vmem:[%s7461_s1 + $0xa8] sm:$0xff] }
  0xa5   : > { %v464_v10 = vadd.f32 %v463_v8, %v462_v6  ;;  %v465_v11 = vsel %vm445_vm0, %v431_v7, 0.0  ;;  %v419_v7 = vld [vmem:[%s7461_s1 + $0xb0] sm:$0xff] }
  0xa6   : > { %v467_v15 = vsel %vm445_vm0, %v432_v9, 0.0  ;;  %v420_v9 = vld [vmem:[%s7461_s1 + $0xb8] sm:$0xff] }
  0xa7   : > { %v466_v12 = vadd.f32 %v465_v11, %v464_v10  ;;  %v339_v14 = vpop.xlane.xlu0 %338 }
  0xa8   : > { %v385_v16 = vmul.f32 0.00390625, %v339_v14  ;;  %v342_v18 = vpop.xlane.xlu1 %341 }
  0xa9   : > { %v345_v19 = vpop.xlane.xlu2 %344  ;;  %v386_v20 = vmul.f32 0.00390625, %v342_v18  ;;  %v468_v24 = vadd.f32 %v467_v15, %v466_v12 }
  0xaa   : > { %v387_v22 = vmul.f32 0.00390625, %v345_v19  ;;  %v433_v23 = vmul.f32 %v409_v13, %v385_v16 }
  0xab   : > { %v434_v25 = vmul.f32 %v410_v17, %v386_v20 }
  0xac   : > { %v469_v26 = vsel %vm445_vm0, %v433_v23, 0.0  ;;  %v435_v27 = vmul.f32 %v411_v21, %v387_v22 }
  0xad   : > { %v470_v28 = vadd.f32 %v469_v26, %v468_v24  ;;  %v471_v29 = vsel %vm445_vm0, %v434_v25, 0.0 }
  0xae   : > { %v473_v33 = vsel %vm445_vm0, %v435_v27, 0.0 }
  0xaf   : > { %v472_v30 = vadd.f32 %v471_v29, %v470_v28  ;;  %v348_v32 = vpop.xlane.xlu0 %347  ;;  %v499_v28 = vld [vmem:[%s7462_s2] sm:$0x1] }
  0xb0   : > { %v388_v34 = vmul.f32 0.00390625, %v348_v32  ;;  %v351_v36 = vpop.xlane.xlu1 %350 }
  0xb1   : > { %v354_v37 = vpop.xlane.xlu2 %353  ;;  %v389_v38 = vmul.f32 0.00390625, %v351_v36  ;;  %v474_v42 = vadd.f32 %v473_v33, %v472_v30 }
  0xb2   : > { %v390_v40 = vmul.f32 0.00390625, %v354_v37  ;;  %v436_v41 = vmul.f32 %v412_v31, %v388_v34 }
  0xb3   : > { %v437_v43 = vmul.f32 %v413_v35, %v389_v38 }
  0xb4   : > { %v475_v44 = vsel %vm445_vm0, %v436_v41, 0.0  ;;  %v438_v45 = vmul.f32 %v414_v39, %v390_v40 }
  0xb5   : > { %v476_v46 = vadd.f32 %v475_v44, %v474_v42  ;;  %v477_v47 = vsel %vm445_vm0, %v437_v43, 0.0 }
  0xb6   : > { %v479_v51 = vsel %vm445_vm0, %v438_v45, 0.0 }
  0xb7   : > { %v478_v48 = vadd.f32 %v477_v47, %v476_v46  ;;  %v357_v50 = vpop.xlane.xlu0 %356 }
  0xb8   : > { %v391_v52 = vmul.f32 0.00390625, %v357_v50  ;;  %v360_v54 = vpop.xlane.xlu1 %359 }
  0xb9   : > { %v363_v55 = vpop.xlane.xlu2 %362  ;;  %v392_v56 = vmul.f32 0.00390625, %v360_v54  ;;  %v480_v60 = vadd.f32 %v479_v51, %v478_v48 }
  0xba   : > { %v393_v58 = vmul.f32 0.00390625, %v363_v55  ;;  %v439_v59 = vmul.f32 %v415_v49, %v391_v52  ;;  %v533_v55 = vld [vmem:[%s7463_s3 + $0x38] sm:$0xff] }
  0xbb   : > { %v440_v61 = vmul.f32 %v416_v53, %v392_v56  ;;  %v532_v53 = vld [vmem:[%s7463_s3 + $0x30] sm:$0xff] }
  0xbc   : > { %v481_v62 = vsel %vm445_vm0, %v439_v59, 0.0  ;;  %v441_v63 = vmul.f32 %v417_v57, %v393_v58  ;;  %v4486_v56 = vld [vmem:[%s7463_s3 + $0x70] sm:$0xff]  ;;  %v4487_v57 = vld [vmem:[%s7463_s3 + $0x78] sm:$0xff]  ;;  %v530_v58 = vld [vmem:[%s7463_s3 + $0x20] sm:$0xff] }
  0xbd   : > { %v482_v0 = vadd.f32 %v481_v62, %v480_v60  ;;  %v483_v1 = vsel %vm445_vm0, %v440_v61, 0.0  ;;  %v4484_v59 = vld [vmem:[%s7463_s3 + $0x60] sm:$0xff]  ;;  %v4485_v61 = vld [vmem:[%s7463_s3 + $0x68] sm:$0xff]  ;;  %v4482_v62 = vld [vmem:[%s7463_s3 + $0x50] sm:$0xff] }
  0xbe   : > { %v485_v5 = vsel %vm445_vm0, %v441_v63, 0.0  ;;  %v4483_v63 = vld [vmem:[%s7463_s3 + $0x58] sm:$0xff] }
  0xbf   : > { %v484_v2 = vadd.f32 %v483_v1, %v482_v0  ;;  %v366_v4 = vpop.xlane.xlu0 %365  ;;  %v531_v0 = vld [vmem:[%s7463_s3 + $0x28] sm:$0xff]  ;;  %v528_v1 = vld [vmem:[%s7463_s3 + $0x10] sm:$0xff] }
  0xc0   : > { %v394_v6 = vmul.f32 0.00390625, %v366_v4  ;;  %v369_v8 = vpop.xlane.xlu1 %368 }
  0xc1   : > { %v372_v10 = vpop.xlane.xlu2 %371  ;;  %v395_v11 = vmul.f32 0.00390625, %v369_v8  ;;  %v486_v14 = vadd.f32 %v485_v5, %v484_v2  ;;  %v529_v2 = vld [vmem:[%s7463_s3 + $0x18] sm:$0xff]  ;;  %v4481_v8 = vld [vmem:[%s7463_s3 + $0x48] sm:$0xff] }
  0xc2   : > { %v396_v12 = vmul.f32 0.00390625, %v372_v10  ;;  %v442_v13 = vmul.f32 %v418_v3, %v394_v6  ;;  %v526_v6 = vld [vmem:[%s7463_s3] sm:$0xff] }
  0xc3   : > { %v443_v15 = vmul.f32 %v419_v7, %v395_v11  ;;  %v4480_v7 = vld [vmem:[%s7463_s3 + $0x40] sm:$0xff] }
  0xc4   : > { %v444_v16 = vmul.f32 %v420_v9, %v396_v12  ;;  %v487_v17 = vsel %vm445_vm0, %v442_v13, 0.0  ;;  %v527_v13 = vld [vmem:[%s7463_s3 + $0x8] sm:$0xff] }
  0xc5   : > { %v488_v18 = vadd.f32 %v487_v17, %v486_v14  ;;  %v489_v19 = vsel %vm445_vm0, %v443_v15, 0.0 }
  0xc6   : > { %v491_v20 = vsel %vm445_vm0, %v444_v16, 0.0 }
  0xc7   : > { %v490_v21 = vadd.f32 %v489_v19, %v488_v18  ;;  %v4494_v18 = vld [vmem:[%s7463_s3 + $0xb0] sm:$0xff]  ;;  %v4495_v19 = vld [vmem:[%s7463_s3 + $0xb8] sm:$0xff] }
  0xc9   : > { %v492_v22 = vadd.f32 %v491_v20, %v490_v21  ;;  %v4492_v20 = vld [vmem:[%s7463_s3 + $0xa0] sm:$0xff] }
  0xcb   : > { %v493_v23 = vrot.slane %v492_v22, 4 }
  0xcd   : > { %v494_v24 = vadd.f32 %v493_v23, %v492_v22 }
  0xcf   : > { %v495_v25 = vrot.slane %v494_v24, 2 }
  0xd1   : > { %v496_v26 = vadd.f32 %v495_v25, %v494_v24 }
  0xd3   : > { %v497_v27 = vrot.slane %v496_v26, 1 }
  0xd5   : > { %v498_v29 = vadd.f32 %v497_v27, %v496_v26 }
  0xd7   : > { %v500_v30 = vadd.f32 %v499_v28, %v498_v29  ;;  %v4493_v28 = vld [vmem:[%s7463_s3 + $0xa8] sm:$0xff] }
  0xd9   : > { %v502_v31 = vsel %vm501_vm1, %v500_v30, -inf }
  0xda   : > { %503 = vmax.xlane.f32.xlu0 %v502_v31  ;;  %v4502_v31 = vld [vmem:[%s7463_s3 + $0xf0] sm:$0xff] }
 0x14d   : > { %v504_v32 = vpop.xlane.xlu0 %503 }
 0x14e   : > { %v505_v33 = vsub.f32 %v500_v30, %v504_v32  ;;  %v4503_v32 = vld [vmem:[%s7463_s3 + $0xf8] sm:$0xff] }
 0x150   : > { %v506_v34 = vmul.f32 1.442695, %v505_v33 }
 0x152   : > { %6110 = vpow2.f32 %v506_v34 }
 0x158   : > { %v6111_v35 = vpop.eup %6110 }
 0x159   : > { %v508_v36 = vsel %vm501_vm1, %v6111_v35, 0.0 }
 0x15a   : > { %509 = vadd.xlane.f32.xlu1 %v508_v36 }
 0x1cd   : > { %v510_v37 = vpop.xlane.xlu1 %509 }
 0x1ce   : > { %6112 = vrcp.f32 %v510_v37  ;;  %v522_v41 = vand.u32 2147483648, %v510_v37  ;;  %v520_v43 = vand.u32 2147483647, %v510_v37  ;;  %vm516_vm3 = vweird.f32 %v510_v37 }
 0x1d0   : > { %v523_v45 = vor.u32 1.1754944e-38, %v522_v41  ;;  %vm521_vm5 = vcmp.eq.f32.partialorder %v520_v43, 8.507059e+37  ;;  %v4501_v41 = vld [vmem:[%s7463_s3 + $0xe8] sm:$0xff]  ;;  %v4510_v43 = vld [vmem:[%s7463_s3 + $0x130] sm:$0xff] }
 0x1d4   : > { %v6113_v38 = vpop.eup %6112 }
 0x1d5   : > { %v512_v39 = vmul.f32 %v6113_v38, %v510_v37  ;;  %vm517_vm2 = vweird.f32 %v6113_v38 }
 0x1d6   : > { %vm518_vm4 = vmor %vm516_vm3, %vm517_vm2 }
 0x1d7   : > { %v513_v40 = vsub.f32 1.0, %v512_v39 }
 0x1d9   : > { %v514_v42 = vmul.f32 %v6113_v38, %v513_v40  ;;  %v4500_v40 = vld [vmem:[%s7463_s3 + $0xe0] sm:$0xff] }
 0x1db   : > { %v515_v44 = vadd.f32 %v6113_v38, %v514_v42 }
 0x1dd   : > { %v519_v46 = vsel %vm518_vm4, %v6113_v38, %v515_v44  ;;  %v4511_v44 = vld [vmem:[%s7463_s3 + $0x138] sm:$0xff] }
 0x1de   : > { %v524_v47 = vsel %vm521_vm5, %v523_v45, %v519_v46 }
 0x1df   : > { %v525_v48 = vmul.f32 %v6111_v35, %v524_v47 }
 0x1e1   : > { %615 = vrot.lane.b32.xlu1 %v525_v48, %s6122_s9  ;;  %585 = vrot.lane.b32.xlu0 %v525_v48, %s6123_s10  ;;  %6088 = vpush %v525_v48 }
 0x1e2   : > { %555 = vrot.lane.b32.xlu2 %v525_v48, %s6124_s11 }
 0x1ea   : > { %645 = vrot.lane.b32.xlu2 %v525_v48, %s6125_s12 }
 0x212   : > { %s6089_s13 = spop %6088 }
 0x213   : > { %v536_v60 = vstv %s6089_s13 }
 0x214   : > { %v544_v9 = vmul.f32 %v536_v60, %v532_v53  ;;  %v545_v14 = vmul.f32 %v536_v60, %v533_v55  ;;  %v542_v15 = vmul.f32 %v536_v60, %v530_v58  ;;  %v543_v16 = vmul.f32 %v536_v60, %v531_v0  ;;  %v4491_v53 = vld [vmem:[%s7463_s3 + $0x98] sm:$0xff]  ;;  %v4508_v58 = vld [vmem:[%s7463_s3 + $0x120] sm:$0xff]  ;;  %v4498_v0 = vld [vmem:[%s7463_s3 + $0xd0] sm:$0xff] }
 0x215   : > { %v540_v17 = vmul.f32 %v536_v60, %v528_v1  ;;  %v541_v21 = vmul.f32 %v536_v60, %v529_v2  ;;  %v538_v22 = vmul.f32 %v536_v60, %v526_v6  ;;  %v539_v29 = vmul.f32 %v536_v60, %v527_v13  ;;  %v4499_v1 = vld [vmem:[%s7463_s3 + $0xd8] sm:$0xff]  ;;  %v4488_v6 = vld [vmem:[%s7463_s3 + $0x80] sm:$0xff] }
 0x23c   : > { %v556_v49 = vpop.permute.xlu2 %555 }
 0x23d   : > { %6090 = vpush %v556_v49 }
 0x244   : > { %v646_v52 = vpop.permute.xlu2 %645 }
 0x253   : > { %v616_v50 = vpop.permute.xlu1 %615  ;;  %v586_v51 = vpop.permute.xlu0 %585 }
 0x254   : > { %6092 = vpush %v586_v51 }
 0x255   : > { %6094 = vpush %v616_v50 }
 0x256   : > { %6096 = vpush %v646_v52  ;;  %v4490_v52 = vld [vmem:[%s7463_s3 + $0x90] sm:$0xff] }
 0x26e   : > { %s6091_s14 = spop %6090 }
 0x26f   : > { %v558_v54 = vstv %s6091_s14 }
 0x270   : > { %v566_v3 = vmul.f32 %v4486_v56, %v558_v54  ;;  %v567_v4 = vmul.f32 %v4487_v57, %v558_v54  ;;  %v564_v5 = vmul.f32 %v4484_v59, %v558_v54  ;;  %v565_v10 = vmul.f32 %v4485_v61, %v558_v54  ;;  %v4509_v59 = vld [vmem:[%s7463_s3 + $0x128] sm:$0xff] }
 0x271   : > { %v562_v11 = vmul.f32 %v4482_v62, %v558_v54  ;;  %v563_v12 = vmul.f32 %v4483_v63, %v558_v54  ;;  %v560_v23 = vmul.f32 %v4480_v7, %v558_v54  ;;  %v561_v24 = vmul.f32 %v4481_v8, %v558_v54 }
 0x272   : > { %v574_v25 = vadd.f32 %v566_v3, %v544_v9  ;;  %v575_v26 = vadd.f32 %v567_v4, %v545_v14  ;;  %v572_v27 = vadd.f32 %v564_v5, %v542_v15  ;;  %v573_v33 = vadd.f32 %v565_v10, %v543_v16 }
 0x273   : > { %v570_v34 = vadd.f32 %v562_v11, %v540_v17  ;;  %v571_v35 = vadd.f32 %v563_v12, %v541_v21  ;;  %v568_v46 = vadd.f32 %v560_v23, %v538_v22  ;;  %v569_v47 = vadd.f32 %v561_v24, %v539_v29  ;;  %v4506_v11 = vld [vmem:[%s7463_s3 + $0x110] sm:$0xff]  ;;  %v4489_v12 = vld [vmem:[%s7463_s3 + $0x88] sm:$0xff]  ;;  %v4507_v17 = vld [vmem:[%s7463_s3 + $0x118] sm:$0xff] }
 0x274   : > { %v4497_v23 = vld [vmem:[%s7463_s3 + $0xc8] sm:$0xff] }
 0x285   : > { %s6093_s9 = spop %6092 }
 0x286   : > { %v6384_v30 = vstv %s6093_s9  ;;  %s6095_s12 = spop %6094 }
 0x287   : > { %v6392_v36 = vstv %s6095_s12  ;;  %s6097_s17 = spop %6096  ;;  %v596_v37 = vmul.f32 %v4494_v18, %v6384_v30  ;;  %v597_v38 = vmul.f32 %v4495_v19, %v6384_v30  ;;  %v594_v39 = vmul.f32 %v4492_v20, %v6384_v30  ;;  %v4496_v18 = vld [vmem:[%s7463_s3 + $0xc0] sm:$0xff] }
 0x288   : > { %v6403_v42 = vstv %s6097_s17  ;;  %v595_v45 = vmul.f32 %v4493_v28, %v6384_v30  ;;  %v626_v50 = vmul.f32 %v4502_v31, %v6392_v36  ;;  %v627_v51 = vmul.f32 %v4503_v32, %v6392_v36 }
 0x289   : > { %v604_v48 = vadd.f32 %v596_v37, %v574_v25  ;;  %v605_v49 = vadd.f32 %v597_v38, %v575_v26  ;;  %v602_v54 = vadd.f32 %v594_v39, %v572_v27  ;;  %v624_v56 = vmul.f32 %v4500_v40, %v6392_v36 }
 0x28a   : > { %v603_v55 = vadd.f32 %v595_v45, %v573_v33  ;;  %v625_v57 = vmul.f32 %v4501_v41, %v6392_v36  ;;  %v656_v62 = vmul.f32 %v4510_v43, %v6403_v42  ;;  %v657_v63 = vmul.f32 %v4511_v44, %v6403_v42 }
 0x28b   : > { %v634_v60 = vadd.f32 %v626_v50, %v604_v48  ;;  %v635_v61 = vadd.f32 %v627_v51, %v605_v49  ;;  %v632_v2 = vadd.f32 %v624_v56, %v602_v54  ;;  %v592_v4 = vmul.f32 %v4490_v52, %v6384_v30  ;;  %v5835_v48 = vld [vmem:[%s7464_s4 + $0x90] sm:$0xff]  ;;  %v5818_v49 = vld [vmem:[%s7464_s4 + $0x8] sm:$0xff]  ;;  %v5836_v50 = vld [vmem:[%s7464_s4 + $0x98] sm:$0xff] }
 0x28c   : > { %v633_v3 = vadd.f32 %v625_v57, %v603_v55  ;;  %v593_v5 = vmul.f32 %v4491_v53, %v6384_v30  ;;  %v654_v9 = vmul.f32 %v4508_v58, %v6403_v42  ;;  %v655_v10 = vmul.f32 %v4509_v59, %v6403_v42  ;;  %v5854_v51 = vld [vmem:[%s7464_s4 + $0x128] sm:$0xff]  ;;  %v5819_v52 = vld [vmem:[%s7464_s4 + $0x10] sm:$0xff]  ;;  %v5837_v53 = vld [vmem:[%s7464_s4 + $0xa0] sm:$0xff] }
 0x28d   : > { %v664_v7 = vadd.f32 %v656_v62, %v634_v60  ;;  %v665_v8 = vadd.f32 %v657_v63, %v635_v61  ;;  %v600_v13 = vadd.f32 %v592_v4, %v570_v34  ;;  %v622_v15 = vmul.f32 %v4498_v0, %v6392_v36  ;;  %v4504_v34 = vld [vmem:[%s7463_s3 + $0x100] sm:$0xff]  ;;  %v5855_v54 = vld [vmem:[%s7464_s4 + $0x130] sm:$0xff]  ;;  %v5820_v55 = vld [vmem:[%s7464_s4 + $0x18] sm:$0xff] }
 0x28e   : > { %v601_v14 = vadd.f32 %v593_v5, %v571_v35  ;;  %v623_v16 = vmul.f32 %v4499_v1, %v6392_v36  ;;  %v662_v20 = vadd.f32 %v654_v9, %v632_v2  ;;  %v663_v21 = vadd.f32 %v655_v10, %v633_v3  ;;  %v4505_v35 = vld [vmem:[%s7463_s3 + $0x108] sm:$0xff]  ;;  %v5856_v57 = vld [vmem:[%s7464_s4 + $0x138] sm:$0xff]  ;;  %v5821_v58 = vld [vmem:[%s7464_s4 + $0x20] sm:$0xff] }
 0x28f   : > { %v669_v19 = vpack.c.bf16 %v665_v8, %v664_v7  ;;  %v590_v22 = vmul.f32 %v4488_v6, %v6384_v30  ;;  %v630_v24 = vadd.f32 %v622_v15, %v600_v13  ;;  %v652_v26 = vmul.f32 %v4506_v11, %v6403_v42  ;;  %v5838_v56 = vld [vmem:[%s7464_s4 + $0xa8] sm:$0xff]  ;;  %v5839_v59 = vld [vmem:[%s7464_s4 + $0xb0] sm:$0xff]  ;;  %v5857_v60 = vld [vmem:[%s7464_s4 + $0x140] sm:$0xff] }
 0x290   : > { %v631_v25 = vadd.f32 %v623_v16, %v601_v14  ;;  %v591_v27 = vmul.f32 %v4489_v12, %v6384_v30  ;;  %v653_v28 = vmul.f32 %v4507_v17, %v6403_v42  ;;  %v620_v31 = vmul.f32 %v4496_v18, %v6392_v36  ;;  %v5822_v61 = vld [vmem:[%s7464_s4 + $0x28] sm:$0xff]  ;;  %v5840_v62 = vld [vmem:[%s7464_s4 + $0xb8] sm:$0xff]  ;;  %v5925_v4 = vld [vmem:[%s7465_s5 + $0x30] sm:$0xff] }
 0x291   : > { %855 = vmatpush.bf16.msra.mxu0 %v669_v19  ;;  %1207 = vmatpush.bf16.msra.mxu1 %v669_v19  ;;  %v598_v29 = vadd.f32 %v590_v22, %v568_v46  ;;  %v621_v33 = vmul.f32 %v4497_v23, %v6392_v36  ;;  %v668_v30 = vpack.c.bf16 %v663_v21, %v662_v20  ;;  %v5858_v63 = vld [vmem:[%s7464_s4 + $0x148] sm:$0xff]  ;;  %v5926_v0 = vld [vmem:[%s7465_s5 + $0x38] sm:$0xff]  ;;  %v5823_v6 = vld [vmem:[%s7464_s4 + $0x30] sm:$0xff] }
 0x292   : > { %1559 = vmatpush.bf16.msra.mxu2 %v669_v19  ;;  %v599_v32 = vadd.f32 %v591_v27, %v569_v47  ;;  %v660_v37 = vadd.f32 %v652_v26, %v630_v24  ;;  %v661_v38 = vadd.f32 %v653_v28, %v631_v25  ;;  %v650_v41 = vmul.f32 %v4504_v34, %v6403_v42  ;;  %v5817_v47 = vld [vmem:[%s7464_s4] sm:$0xff]  ;;  %v6006_v1 = vld [vmem:[%s7465_s5 + $0x138] sm:$0xff]  ;;  %v5924_v5 = vld [vmem:[%s7465_s5 + $0x28] sm:$0xff] }
 0x293   : > { %v628_v39 = vadd.f32 %v620_v31, %v598_v29  ;;  %v651_v43 = vmul.f32 %v4505_v35, %v6403_v42  ;;  %v5853_v42 = vld [vmem:[%s7464_s4 + $0x120] sm:$0xff]  ;;  %v5942_v2 = vld [vmem:[%s7465_s5 + $0xb8] sm:$0xff]  ;;  %2238 = vmatpush.bf16.msra.mxu3 %v5926_v0  ;;  %v5859_v8 = vld [vmem:[%s7464_s4 + $0x150] sm:$0xff] }
 0x294   : > { %v629_v40 = vadd.f32 %v621_v33, %v599_v32  ;;  %v667_v36 = vpack.c.bf16 %v661_v38, %v660_v37  ;;  %v5998_v3 = vld [vmem:[%s7465_s5 + $0xf8] sm:$0xff]  ;;  %v5841_v7 = vld [vmem:[%s7464_s4 + $0xc0] sm:$0xff]  ;;  %v5921_v11 = vld [vmem:[%s7465_s5 + $0x10] sm:$0xff] }
 0x295   : > { %856 = vmatpush.bf16.msra.mxu0 %v668_v30  ;;  %1208 = vmatpush.bf16.msra.mxu1 %v668_v30  ;;  %v658_v44 = vadd.f32 %v650_v41, %v628_v39  ;;  %v5923_v9 = vld [vmem:[%s7465_s5 + $0x20] sm:$0xff]  ;;  %v5922_v10 = vld [vmem:[%s7465_s5 + $0x18] sm:$0xff]  ;;  %v5842_v13 = vld [vmem:[%s7464_s4 + $0xc8] sm:$0xff] }
 0x296   : > { %1560 = vmatpush.bf16.msra.mxu2 %v668_v30  ;;  %v659_v45 = vadd.f32 %v651_v43, %v629_v40  ;;  %v5824_v12 = vld [vmem:[%s7464_s4 + $0x38] sm:$0xff]  ;;  %v5920_v15 = vld [vmem:[%s7465_s5 + $0x8] sm:$0xff]  ;;  %v5919_v16 = vld [vmem:[%s7465_s5] sm:$0xff] }
 0x297   : > { %2239 = vmatpush.bf16.msra.mxu3 %v5925_v4  ;;  %v5860_v14 = vld [vmem:[%s7464_s4 + $0x158] sm:$0xff]  ;;  %v6005_v18 = vld [vmem:[%s7465_s5 + $0x130] sm:$0xff]  ;;  %v5825_v19 = vld [vmem:[%s7464_s4 + $0x40] sm:$0xff] }
 0x298   : > { %v666_v46 = vpack.c.bf16 %v659_v45, %v658_v44  ;;  %v5934_v17 = vld [vmem:[%s7465_s5 + $0x78] sm:$0xff]  ;;  %v5843_v20 = vld [vmem:[%s7464_s4 + $0xd0] sm:$0xff]  ;;  %v5861_v23 = vld [vmem:[%s7464_s4 + $0x160] sm:$0xff] }
 0x299   : > { %857 = vmatpush.bf16.msra.mxu0 %v667_v36  ;;  %1209 = vmatpush.bf16.msra.mxu1 %v667_v36  ;;  %v5941_v26 = vld [vmem:[%s7465_s5 + $0xb0] sm:$0xff]  ;;  %v5826_v30 = vld [vmem:[%s7464_s4 + $0x48] sm:$0xff]  ;;  %v5844_v37 = vld [vmem:[%s7464_s4 + $0xd8] sm:$0xff] }
 0x29a   : > { %1561 = vmatpush.bf16.msra.mxu2 %v667_v36  ;;  %v5997_v27 = vld [vmem:[%s7465_s5 + $0xf0] sm:$0xff]  ;;  %v5862_v41 = vld [vmem:[%s7464_s4 + $0x168] sm:$0xff] }
 0x29b   : > { %2240 = vmatpush.bf16.msra.mxu3 %v5924_v5  ;;  %v6004_v0 = vld [vmem:[%s7465_s5 + $0x128] sm:$0xff] }
 0x29d   : > { %858 = vmatpush.bf16.msra.mxu0 %v666_v46  ;;  %1210 = vmatpush.bf16.msra.mxu1 %v666_v46 }
 0x29e   : > { %1562 = vmatpush.bf16.msra.mxu2 %v666_v46 }
 0x29f   : > { %2241 = vmatpush.bf16.msra.mxu3 %v5923_v9 }
 0x2a0   : > { %4584 = vmatmul.msk.bf16.vlgmr.msra.gmra.mxu0 %vm796_vm6, %v5817_v47  ;;  %4710 = vmatmul.msk.bf16.vlgmr.msra.gmra.mxu1 %vm796_vm6, %v5835_v48  ;;  %v5933_v47 = vld [vmem:[%s7465_s5 + $0x70] sm:$0xff] }
 0x2a1   : > { %4836 = vmatmul.msk.bf16.vlgmr.msra.gmra.mxu2 %vm796_vm6, %v5853_v42  ;;  %2416 = vmatpush.bf16.msrb.mxu0 %v5942_v2  ;;  %v5940_v2 = vld [vmem:[%s7465_s5 + $0xa8] sm:$0xff] }
 0x2a2   : > { %3171 = vmatpush.bf16.msrb.mxu2 %v6006_v1  ;;  %3082 = vmatpush.bf16.msrb.mxu1 %v5998_v3  ;;  %v5996_v3 = vld [vmem:[%s7465_s5 + $0xe8] sm:$0xff] }
 0x2a3   : > { %2242 = vmatpush.bf16.msra.mxu3 %v5922_v10 }
 0x2a5   : > { %2417 = vmatpush.bf16.msrb.mxu0 %v5941_v26 }
 0x2a6   : > { %3172 = vmatpush.bf16.msrb.mxu2 %v6005_v18  ;;  %3083 = vmatpush.bf16.msrb.mxu1 %v5997_v27 }
 0x2a7   : > { %2243 = vmatpush.bf16.msra.mxu3 %v5921_v11  ;;  %v5828_v11 = vld [vmem:[%s7464_s4 + $0x58] sm:$0xff] }
 0x2a9   : > { %2418 = vmatpush.bf16.msrb.mxu0 %v5940_v2 }
 0x2aa   : > { %3173 = vmatpush.bf16.msrb.mxu2 %v6004_v0  ;;  %3084 = vmatpush.bf16.msrb.mxu1 %v5996_v3 }
 0x2ab   : > { %2244 = vmatpush.bf16.msra.mxu3 %v5920_v15 }
 0x2af   : > { %2245 = vmatpush.bf16.msra.mxu3 %v5919_v16  ;;  %v5864_v16 = vld [vmem:[%s7464_s4 + $0x178] sm:$0xff] }
 0x2b0   : > { %4585 = vmatmul.msk.bf16.gmra.mxu0 %vm796_vm6, %v5818_v49  ;;  %4711 = vmatmul.msk.bf16.gmra.mxu1 %vm796_vm6, %v5836_v50 }
 0x2b1   : > { %4837 = vmatmul.msk.bf16.gmra.mxu2 %vm796_vm6, %v5854_v51 }
 0x2b3   : > { %2327 = vmatpush.bf16.msrb.mxu3 %v5934_v17 }
 0x2b7   : > { %2328 = vmatpush.bf16.msrb.mxu3 %v5933_v47 }
 0x2c0   : > { %4586 = vmatmul.msk.bf16.gmra.mxu0 %vm796_vm6, %v5819_v52  ;;  %4712 = vmatmul.msk.bf16.gmra.mxu1 %vm796_vm6, %v5837_v53 }
 0x2c1   : > { %4838 = vmatmul.msk.bf16.gmra.mxu2 %vm796_vm6, %v5855_v54  ;;  %v5827_v54 = vld [vmem:[%s7464_s4 + $0x50] sm:$0xff] }
 0x2d0   : > { %4587 = vmatmul.msk.bf16.gmra.mxu0 %vm796_vm6, %v5820_v55  ;;  %4713 = vmatmul.msk.bf16.gmra.mxu1 %vm796_vm6, %v5838_v56  ;;  %v5845_v55 = vld [vmem:[%s7464_s4 + $0xe0] sm:$0xff] }
 0x2d1   : > { %4839 = vmatmul.msk.bf16.gmra.mxu2 %vm796_vm6, %v5856_v57 }
 0x2e0   : > { %4588 = vmatmul.msk.bf16.gmra.mxu0 %vm796_vm6, %v5821_v58  ;;  %4714 = vmatmul.msk.bf16.gmra.mxu1 %vm796_vm6, %v5839_v59  ;;  %v5863_v59 = vld [vmem:[%s7464_s4 + $0x170] sm:$0xff] }
 0x2e1   : > { %4840 = vmatmul.msk.bf16.gmra.mxu2 %vm796_vm6, %v5857_v60 }
 0x2f0   : > { %4589 = vmatmul.msk.bf16.gmra.mxu0 %vm796_vm6, %v5822_v61  ;;  %4715 = vmatmul.msk.bf16.gmra.mxu1 %vm796_vm6, %v5840_v62 }
 0x2f1   : > { %4841 = vmatmul.msk.bf16.gmra.mxu2 %vm796_vm6, %v5858_v63 }
 0x300   : > { %4590 = vmatmul.msk.bf16.gmra.mxu0 %vm796_vm6, %v5823_v6  ;;  %4716 = vmatmul.msk.bf16.gmra.mxu1 %vm796_vm6, %v5841_v7 }
 0x301   : > { %4842 = vmatmul.msk.bf16.gmra.mxu2 %vm796_vm6, %v5859_v8 }
 0x310   : > { %4591 = vmatmul.msk.bf16.gmra.mxu0 %vm796_vm6, %v5824_v12  ;;  %4717 = vmatmul.msk.bf16.gmra.mxu1 %vm796_vm6, %v5842_v13  ;;  %v5846_v12 = vld [vmem:[%s7464_s4 + $0xe8] sm:$0xff] }
 0x311   : > { %4843 = vmatmul.msk.bf16.gmra.mxu2 %vm796_vm6, %v5860_v14 }
 0x31d   : > { %v860_v21 = vpop.f32.mrf.mxu0  ;;  %v1212_v22 = vpop.f32.mrf.mxu1 }
 0x31e   : > { %v950_v24 = vpack.c.bf16 %v860_v21, %v860_v21  ;;  %v1302_v25 = vpack.c.bf16 %v1212_v22, %v1212_v22  ;;  %v5932_v22 = vld [vmem:[%s7465_s5 + $0x68] sm:$0xff] }
 0x31f   : > { %2329 = vmatpush.bf16.msrb.mxu3 %v5932_v22 }
 0x320   : > { %986 = vst [vmem:[#allocation2] sm:$0xf] %v950_v24  ;;  %4592 = vmatmul.msk.bf16.gmra.mxu0 %vm796_vm6, %v5825_v19  ;;  %4718 = vmatmul.msk.bf16.gmra.mxu1 %vm796_vm6, %v5843_v20 }
 0x321   : > { %1338 = vst [vmem:[#allocation2 + $0x4] sm:$0xf] %v1302_v25  ;;  %4844 = vmatmul.msk.bf16.gmra.mxu2 %vm796_vm6, %v5861_v23 }
 0x324   : > { %v1564_v28 = vpop.f32.mrf.mxu2 }
 0x325   : > { %v1654_v29 = vpack.c.bf16 %v1564_v28, %v1564_v28  ;;  %v862_v31 = vpop.f32.mrf.mxu0  ;;  %v1214_v32 = vpop.f32.mrf.mxu1 }
 0x326   : > { %v951_v33 = vpack.c.bf16 %v862_v31, %v862_v31  ;;  %v1303_v34 = vpack.c.bf16 %v1214_v32, %v1214_v32  ;;  %v5829_v31 = vld [vmem:[%s7464_s4 + $0x60] sm:$0xff]  ;;  %v5847_v32 = vld [vmem:[%s7464_s4 + $0xf0] sm:$0xff] }
 0x327   : > { %1690 = vst [vmem:[#allocation2 + $0x8] sm:$0xf] %v1654_v29  ;;  %v4856_v44 = vld [vmem:[#allocation2] sm:$0xf] }
 0x328   : > { %987 = vst [vmem:[#allocation2 + $0xc] sm:$0xf] %v951_v33 }
 0x329   : > { %1339 = vst [vmem:[#allocation2 + $0x10] sm:$0xf] %v1303_v34 }
 0x32c   : > { %v1566_v35 = vpop.f32.mrf.mxu2 }
 0x32d   : > { %v1655_v38 = vpack.c.bf16 %v1566_v35, %v1566_v35  ;;  %v865_v39 = vpop.f32.mrf.mxu0  ;;  %v1217_v40 = vpop.f32.mrf.mxu1 }
 0x32e   : > { %v952_v43 = vpack.c.bf16 %v865_v39, %v865_v39  ;;  %v1304_v36 = vpack.c.bf16 %v1217_v40, %v1217_v40 }
 0x32f   : > { %1691 = vst [vmem:[#allocation2 + $0x14] sm:$0xf] %v1655_v38  ;;  %v5872_v45 = vld [vmem:[#allocation2 + $0x8] sm:$0xf0] }
 0x330   : > { %988 = vst [vmem:[#allocation2 + $0x18] sm:$0xf] %v952_v43  ;;  %4593 = vmatmul.msk.bf16.gmra.mxu0 %vm796_vm6, %v5826_v30  ;;  %4719 = vmatmul.msk.bf16.gmra.mxu1 %vm796_vm6, %v5844_v37  ;;  %v4857_v46 = vor.u32 %v5872_v45, %v4856_v44  ;;  %v5865_v30 = vld [vmem:[%s7464_s4 + $0x180] sm:$0xff] }
 0x331   : > { %1340 = vst [vmem:[#allocation2 + $0x1c] sm:$0xf] %v1304_v36  ;;  %4845 = vmatmul.msk.bf16.gmra.mxu2 %vm796_vm6, %v5862_v41  ;;  %v6003_v43 = vld [vmem:[%s7465_s5 + $0x120] sm:$0xff] }
 0x332   : > { %2246 = vmatmul.bf16.vlgmr.msra.gmra.mxu3 %v4857_v46  ;;  %3174 = vmatpush.bf16.msrb.mxu2 %v6003_v43 }
 0x334   : > { %v1569_v48 = vpop.f32.mrf.mxu2 }
 0x335   : > { %v1656_v42 = vpack.c.bf16 %v1569_v48, %v1569_v48  ;;  %v867_v49 = vpop.f32.mrf.mxu0  ;;  %v1219_v50 = vpop.f32.mrf.mxu1 }
 0x336   : > { %v953_v51 = vpack.c.bf16 %v867_v49, %v867_v49  ;;  %v1305_v52 = vpack.c.bf16 %v1219_v50, %v1219_v50  ;;  %v5995_v49 = vld [vmem:[%s7465_s5 + $0xe0] sm:$0xff] }
 0x337   : > { %1692 = vst [vmem:[#allocation2 + $0x20] sm:$0xf] %v1656_v42  ;;  %v4868_v62 = vld [vmem:[#allocation2 + $0x18] sm:$0xf]  ;;  %v5939_v42 = vld [vmem:[%s7465_s5 + $0xa0] sm:$0xff]  ;;  %3085 = vmatpush.bf16.msrb.mxu1 %v5995_v49  ;;  %v5992_v49 = vld [vmem:[%s7465_s5 + $0xc8] sm:$0xff] }
 0x338   : > { %989 = vst [vmem:[#allocation2 + $0x24] sm:$0xf] %v953_v51  ;;  %2419 = vmatpush.bf16.msrb.mxu0 %v5939_v42  ;;  %v5830_v51 = vld [vmem:[%s7464_s4 + $0x68] sm:$0xff] }
 0x339   : > { %1341 = vst [vmem:[#allocation2 + $0x28] sm:$0xf] %v1305_v52  ;;  %v5848_v52 = vld [vmem:[%s7464_s4 + $0xf8] sm:$0xff]  ;;  %v5936_v42 = vld [vmem:[%s7465_s5 + $0x88] sm:$0xff] }
 0x33c   : > { %v1571_v53 = vpop.f32.mrf.mxu2 }
 0x33d   : > { %v1657_v56 = vpack.c.bf16 %v1571_v53, %v1571_v53  ;;  %v870_v57 = vpop.f32.mrf.mxu0  ;;  %v1222_v58 = vpop.f32.mrf.mxu1 }
 0x33e   : > { %v954_v60 = vpack.c.bf16 %v870_v57, %v870_v57  ;;  %v1306_v61 = vpack.c.bf16 %v1222_v58, %v1222_v58 }
 0x33f   : > { %1693 = vst [vmem:[#allocation2 + $0x2c] sm:$0xf] %v1657_v56  ;;  %v5875_v63 = vld [vmem:[#allocation2 + $0x20] sm:$0xf0]  ;;  %v5866_v56 = vld [vmem:[%s7464_s4 + $0x188] sm:$0xff] }
 0x340   : > { %990 = vst [vmem:[#allocation2 + $0x30] sm:$0xf] %v954_v60  ;;  %4594 = vmatmul.msk.bf16.gmra.mxu0 %vm796_vm6, %v5827_v54  ;;  %4720 = vmatmul.msk.bf16.gmra.mxu1 %vm796_vm6, %v5845_v55  ;;  %v4869_v1 = vor.u32 %v5875_v63, %v4868_v62  ;;  %v5931_v62 = vld [vmem:[%s7465_s5 + $0x60] sm:$0xff] }
 0x341   : > { %1342 = vst [vmem:[#allocation2 + $0x34] sm:$0xf] %v1306_v61  ;;  %4846 = vmatmul.msk.bf16.gmra.mxu2 %vm796_vm6, %v5863_v59  ;;  %2330 = vmatpush.bf16.msrb.mxu3 %v5931_v62 }
 0x342   : > { %2251 = vmatmul.bf16.gmra.mxu3 %v4869_v1 }
 0x344   : > { %v1574_v4 = vpop.f32.mrf.mxu2 }
 0x345   : > { %v1658_v5 = vpack.c.bf16 %v1574_v4, %v1574_v4  ;;  %v872_v6 = vpop.f32.mrf.mxu0  ;;  %v1224_v7 = vpop.f32.mrf.mxu1 }
 0x346   : > { %v955_v8 = vpack.c.bf16 %v872_v6, %v872_v6  ;;  %v1307_v9 = vpack.c.bf16 %v1224_v7, %v1224_v7  ;;  %v5831_v6 = vld [vmem:[%s7464_s4 + $0x70] sm:$0xff]  ;;  %v5849_v7 = vld [vmem:[%s7464_s4 + $0x100] sm:$0xff] }
 0x347   : > { %1694 = vst [vmem:[#allocation2 + $0x38] sm:$0xf] %v1658_v5  ;;  %v4880_v19 = vld [vmem:[#allocation2 + $0x30] sm:$0xf] }
 0x348   : > { %991 = vst [vmem:[#allocation2 + $0x3c] sm:$0xf] %v955_v8 }
 0x349   : > { %1343 = vst [vmem:[#allocation2 + $0x40] sm:$0xf] %v1307_v9 }
 0x34c   : > { %v1576_v10 = vpop.f32.mrf.mxu2 }
 0x34d   : > { %v1659_v13 = vpack.c.bf16 %v1576_v10, %v1576_v10  ;;  %v875_v14 = vpop.f32.mrf.mxu0  ;;  %v1227_v15 = vpop.f32.mrf.mxu1 }
 0x34e   : > { %v956_v17 = vpack.c.bf16 %v875_v14, %v875_v14  ;;  %v1308_v18 = vpack.c.bf16 %v1227_v15, %v1227_v15 }
 0x34f   : > { %1695 = vst [vmem:[#allocation2 + $0x44] sm:$0xf] %v1659_v13  ;;  %v5878_v20 = vld [vmem:[#allocation2 + $0x38] sm:$0xf0] }
 0x350   : > { %992 = vst [vmem:[#allocation2 + $0x48] sm:$0xf] %v956_v17  ;;  %4595 = vmatmul.msk.bf16.gmra.mxu0 %vm796_vm6, %v5828_v11  ;;  %4721 = vmatmul.msk.bf16.gmra.mxu1 %vm796_vm6, %v5846_v12  ;;  %v4881_v21 = vor.u32 %v5878_v20, %v4880_v19  ;;  %v5867_v11 = vld [vmem:[%s7464_s4 + $0x190] sm:$0xff] }
 0x351   : > { %1344 = vst [vmem:[#allocation2 + $0x4c] sm:$0xf] %v1308_v18  ;;  %4847 = vmatmul.msk.bf16.gmra.mxu2 %vm796_vm6, %v5864_v16 }
 0x352   : > { %2256 = vmatmul.bf16.gmra.mxu3 %v4881_v21 }
 0x354   : > { %v1579_v23 = vpop.f32.mrf.mxu2 }
 0x355   : > { %v1660_v24 = vpack.c.bf16 %v1579_v23, %v1579_v23  ;;  %v877_v25 = vpop.f32.mrf.mxu0  ;;  %v1229_v26 = vpop.f32.mrf.mxu1  ;;  %v6002_v23 = vld [vmem:[%s7465_s5 + $0x118] sm:$0xff] }
 0x356   : > { %v957_v27 = vpack.c.bf16 %v877_v25, %v877_v25  ;;  %v1309_v28 = vpack.c.bf16 %v1229_v26, %v1229_v26  ;;  %3175 = vmatpush.bf16.msrb.mxu2 %v6002_v23  ;;  %v5994_v25 = vld [vmem:[%s7465_s5 + $0xd8] sm:$0xff] }
 0x357   : > { %1696 = vst [vmem:[#allocation2 + $0x50] sm:$0xf] %v1660_v24  ;;  %v4892_v39 = vld [vmem:[#allocation2 + $0x48] sm:$0xf]  ;;  %v5938_v24 = vld [vmem:[%s7465_s5 + $0x98] sm:$0xff]  ;;  %3086 = vmatpush.bf16.msrb.mxu1 %v5994_v25 }
 0x358   : > { %993 = vst [vmem:[#allocation2 + $0x54] sm:$0xf] %v957_v27  ;;  %2420 = vmatpush.bf16.msrb.mxu0 %v5938_v24  ;;  %v5832_v27 = vld [vmem:[%s7464_s4 + $0x78] sm:$0xff] }
 0x359   : > { %1345 = vst [vmem:[#allocation2 + $0x58] sm:$0xf] %v1309_v28  ;;  %v5850_v28 = vld [vmem:[%s7464_s4 + $0x108] sm:$0xff] }
 0x35c   : > { %v1581_v29 = vpop.f32.mrf.mxu2 }
 0x35d   : > { %v1661_v33 = vpack.c.bf16 %v1581_v29, %v1581_v29  ;;  %v880_v34 = vpop.f32.mrf.mxu0  ;;  %v1232_v35 = vpop.f32.mrf.mxu1 }
 0x35e   : > { %v958_v37 = vpack.c.bf16 %v880_v34, %v880_v34  ;;  %v1310_v38 = vpack.c.bf16 %v1232_v35, %v1232_v35 }
 0x35f   : > { %1697 = vst [vmem:[#allocation2 + $0x5c] sm:$0xf] %v1661_v33  ;;  %v5881_v40 = vld [vmem:[#allocation2 + $0x50] sm:$0xf0]  ;;  %v5868_v33 = vld [vmem:[%s7464_s4 + $0x198] sm:$0xff] }
 0x360   : > { %994 = vst [vmem:[#allocation2 + $0x60] sm:$0xf] %v958_v37  ;;  %4596 = vmatmul.msk.bf16.gmra.mxu0 %vm796_vm6, %v5829_v31  ;;  %4722 = vmatmul.msk.bf16.gmra.mxu1 %vm796_vm6, %v5847_v32  ;;  %v4893_v41 = vor.u32 %v5881_v40, %v4892_v39  ;;  %v5930_v39 = vld [vmem:[%s7465_s5 + $0x58] sm:$0xff] }
 0x361   : > { %1346 = vst [vmem:[#allocation2 + $0x64] sm:$0xf] %v1310_v38  ;;  %4848 = vmatmul.msk.bf16.gmra.mxu2 %vm796_vm6, %v5865_v30  ;;  %2331 = vmatpush.bf16.msrb.mxu3 %v5930_v39 }
 0x362   : > { %2261 = vmatmul.bf16.gmra.mxu3 %v4893_v41 }
 0x364   : > { %v1584_v36 = vpop.f32.mrf.mxu2 }
 0x365   : > { %v1662_v44 = vpack.c.bf16 %v1584_v36, %v1584_v36  ;;  %v882_v45 = vpop.f32.mrf.mxu0  ;;  %v1234_v46 = vpop.f32.mrf.mxu1 }
 0x366   : > { %v959_v47 = vpack.c.bf16 %v882_v45, %v882_v45  ;;  %v1311_v48 = vpack.c.bf16 %v1234_v46, %v1234_v46  ;;  %v5937_v46 = vld [vmem:[%s7465_s5 + $0x90] sm:$0xff] }
 0x367   : > { %1698 = vst [vmem:[#allocation2 + $0x68] sm:$0xf] %v1662_v44  ;;  %v4904_v59 = vld [vmem:[#allocation2 + $0x60] sm:$0xf]  ;;  %2421 = vmatpush.bf16.msrb.mxu0 %v5937_v46 }
 0x368   : > { %995 = vst [vmem:[#allocation2 + $0x6c] sm:$0xf] %v959_v47  ;;  %v5993_v47 = vld [vmem:[%s7465_s5 + $0xd0] sm:$0xff] }
 0x369   : > { %1347 = vst [vmem:[#allocation2 + $0x70] sm:$0xf] %v1311_v48  ;;  %v6001_v48 = vld [vmem:[%s7465_s5 + $0x110] sm:$0xff]  ;;  %3087 = vmatpush.bf16.msrb.mxu1 %v5993_v47 }
 0x36a   : > { %3176 = vmatpush.bf16.msrb.mxu2 %v6001_v48 }
 0x36b   : > { %2422 = vmatpush.bf16.msrb.mxu0 %v5936_v42 }
 0x36c   : > { %v1586_v50 = vpop.f32.mrf.mxu2 }
 0x36d   : > { %v1663_v53 = vpack.c.bf16 %v1586_v50, %v1586_v50  ;;  %v885_v54 = vpop.f32.mrf.mxu0  ;;  %v1237_v55 = vpop.f32.mrf.mxu1  ;;  %3088 = vmatpush.bf16.msrb.mxu1 %v5992_v49 }
 0x36e   : > { %v960_v57 = vpack.c.bf16 %v885_v54, %v885_v54  ;;  %v1312_v58 = vpack.c.bf16 %v1237_v55, %v1237_v55 }
 0x36f   : > { %1699 = vst [vmem:[#allocation2 + $0x74] sm:$0xf] %v1663_v53  ;;  %v5884_v60 = vld [vmem:[#allocation2 + $0x68] sm:$0xf0] }
 0x370   : > { %996 = vst [vmem:[#allocation2 + $0x78] sm:$0xf] %v960_v57  ;;  %4597 = vmatmul.msk.bf16.gmra.mxu0 %vm796_vm6, %v5830_v51  ;;  %4723 = vmatmul.msk.bf16.gmra.mxu1 %vm796_vm6, %v5848_v52  ;;  %v4905_v61 = vor.u32 %v5884_v60, %v4904_v59  ;;  %v5833_v51 = vld [vmem:[%s7464_s4 + $0x80] sm:$0xff]  ;;  %v5851_v52 = vld [vmem:[%s7464_s4 + $0x110] sm:$0xff]  ;;  %v6000_v59 = vld [vmem:[%s7465_s5 + $0x108] sm:$0xff] }
 0x371   : > { %1348 = vst [vmem:[#allocation2 + $0x7c] sm:$0xf] %v1312_v58  ;;  %4849 = vmatmul.msk.bf16.gmra.mxu2 %vm796_vm6, %v5866_v56  ;;  %v5869_v56 = vld [vmem:[%s7464_s4 + $0x1a0] sm:$0xff] }
 0x372   : > { %2266 = vmatmul.bf16.gmra.mxu3 %v4905_v61  ;;  %3177 = vmatpush.bf16.msrb.mxu2 %v6000_v59  ;;  %v5206_v59 = vld [vmem:[#allocation2 + $0x3c] sm:$0xf0] }
 0x374   : > { %v1589_v63 = vpop.f32.mrf.mxu2 }
 0x375   : > { %v1664_v0 = vpack.c.bf16 %v1589_v63, %v1589_v63  ;;  %v887_v1 = vpop.f32.mrf.mxu0  ;;  %v1239_v2 = vpop.f32.mrf.mxu1  ;;  %v5935_v63 = vld [vmem:[%s7465_s5 + $0x80] sm:$0xff] }
 0x376   : > { %v961_v3 = vpack.c.bf16 %v887_v1, %v887_v1  ;;  %v1313_v4 = vpack.c.bf16 %v1239_v2, %v1239_v2  ;;  %v5999_v1 = vld [vmem:[%s7465_s5 + $0x100] sm:$0xff]  ;;  %2423 = vmatpush.bf16.msrb.mxu0 %v5935_v63  ;;  %v5204_v63 = vld [vmem:[#allocation2 + $0x30] sm:$0xf] }
 0x377   : > { %1700 = vst [vmem:[#allocation2 + $0x80] sm:$0xf] %v1664_v0  ;;  %v4916_v14 = vld [vmem:[#allocation2 + $0x78] sm:$0xf]  ;;  %v5991_v0 = vld [vmem:[%s7465_s5 + $0xc0] sm:$0xff]  ;;  %3178 = vmatpush.bf16.msrb.mxu2 %v5999_v1 }
 0x378   : > { %997 = vst [vmem:[#allocation2 + $0x84] sm:$0xf] %v961_v3  ;;  %3089 = vmatpush.bf16.msrb.mxu1 %v5991_v0 }
 0x379   : > { %1349 = vst [vmem:[#allocation2 + $0x88] sm:$0xf] %v1313_v4 }
 0x37c   : > { %v1591_v5 = vpop.f32.mrf.mxu2 }
 0x37d   : > { %v1665_v8 = vpack.c.bf16 %v1591_v5, %v1591_v5  ;;  %v890_v9 = vpop.f32.mrf.mxu0  ;;  %v1242_v10 = vpop.f32.mrf.mxu1 }
 0x37e   : > { %v962_v12 = vpack.c.bf16 %v890_v9, %v890_v9  ;;  %v1314_v13 = vpack.c.bf16 %v1242_v10, %v1242_v10  ;;  %v5834_v9 = vld [vmem:[%s7464_s4 + $0x88] sm:$0xff]  ;;  %v5852_v10 = vld [vmem:[%s7464_s4 + $0x118] sm:$0xff] }
 0x37f   : > { %1701 = vst [vmem:[#allocation2 + $0x8c] sm:$0xf] %v1665_v8  ;;  %v5887_v15 = vld [vmem:[#allocation2 + $0x80] sm:$0xf0] }
 0x380   : > { %998 = vst [vmem:[#allocation2 + $0x90] sm:$0xf] %v962_v12  ;;  %4598 = vmatmul.msk.bf16.gmra.mxu0 %vm796_vm6, %v5831_v6  ;;  %4724 = vmatmul.msk.bf16.gmra.mxu1 %vm796_vm6, %v5849_v7  ;;  %v4917_v16 = vor.u32 %v5887_v15, %v4916_v14  ;;  %v5870_v14 = vld [vmem:[%s7464_s4 + $0x1a8] sm:$0xff] }
 0x381   : > { %1350 = vst [vmem:[#allocation2 + $0x94] sm:$0xf] %v1314_v13  ;;  %4850 = vmatmul.msk.bf16.gmra.mxu2 %vm796_vm6, %v5867_v11 }
 0x382   : > { %2271 = vmatmul.bf16.gmra.mxu3 %v4917_v16 }
 0x384   : > { %v1594_v17 = vpop.f32.mrf.mxu2 }
 0x385   : > { %v1666_v18 = vpack.c.bf16 %v1594_v17, %v1594_v17  ;;  %v892_v19 = vpop.f32.mrf.mxu0  ;;  %v1244_v20 = vpop.f32.mrf.mxu1 }
 0x386   : > { %v963_v21 = vpack.c.bf16 %v892_v19, %v892_v19  ;;  %v1315_v22 = vpack.c.bf16 %v1244_v20, %v1244_v20  ;;  %v5929_v20 = vld [vmem:[%s7465_s5 + $0x50] sm:$0xff] }
 0x387   : > { %1702 = vst [vmem:[#allocation2 + $0x98] sm:$0xf] %v1666_v18  ;;  %v4928_v30 = vld [vmem:[#allocation2 + $0x90] sm:$0xf]  ;;  %2332 = vmatpush.bf16.msrb.mxu3 %v5929_v20 }
 0x388   : > { %999 = vst [vmem:[#allocation2 + $0x9c] sm:$0xf] %v963_v21 }
 0x389   : > { %1351 = vst [vmem:[#allocation2 + $0xa0] sm:$0xf] %v1315_v22 }
 0x38c   : > { %v1596_v26 = vpop.f32.mrf.mxu2 }
 0x38d   : > { %v1667_v29 = vpack.c.bf16 %v1596_v26, %v1596_v26  ;;  %v895_v31 = vpop.f32.mrf.mxu0  ;;  %v1247_v32 = vpop.f32.mrf.mxu1 }
 0x38e   : > { %v964_v34 = vpack.c.bf16 %v895_v31, %v895_v31  ;;  %v1316_v35 = vpack.c.bf16 %v1247_v32, %v1247_v32  ;;  %v5944_v31 = vld [vmem:[#allocation2 + $0x20] sm:$0xf0] }
 0x38f   : > { %1703 = vst [vmem:[#allocation2 + $0xa4] sm:$0xf] %v1667_v29  ;;  %v5890_v37 = vld [vmem:[#allocation2 + $0x98] sm:$0xf0]  ;;  %v5873_v29 = vld [vmem:[#allocation2 + $0x10] sm:$0xf0] }
 0x390   : > { %1000 = vst [vmem:[#allocation2 + $0xa8] sm:$0xf] %v964_v34  ;;  %4599 = vmatmul.msk.bf16.gmra.mxu0 %vm796_vm6, %v5832_v27  ;;  %4725 = vmatmul.msk.bf16.gmra.mxu1 %vm796_vm6, %v5850_v28  ;;  %v4929_v38 = vor.u32 %v5890_v37, %v4928_v30  ;;  %v4864_v28 = vld [vmem:[#allocation2 + $0x8] sm:$0xf] }
 0x391   : > { %1352 = vst [vmem:[#allocation2 + $0xac] sm:$0xf] %v1316_v35  ;;  %4851 = vmatmul.msk.bf16.gmra.mxu2 %vm796_vm6, %v5868_v33  ;;  %v5943_v33 = vld [vmem:[#allocation2 + $0x1c] sm:$0xf]  ;;  %v5194_v34 = vld [vmem:[#allocation2 + $0x24] sm:$0xf0] }
 0x392   : > { %2276 = vmatmul.bf16.gmra.mxu3 %v4929_v38  ;;  %v5192_v38 = vld [vmem:[#allocation2 + $0x18] sm:$0xf] }
 0x394   : > { %v1599_v40 = vpop.f32.mrf.mxu2 }
 0x395   : > { %v1668_v41 = vpack.c.bf16 %v1599_v40, %v1599_v40  ;;  %v897_v43 = vpop.f32.mrf.mxu0  ;;  %v1249_v36 = vpop.f32.mrf.mxu1 }
 0x396   : > { %v965_v44 = vpack.c.bf16 %v897_v43, %v897_v43  ;;  %v1317_v45 = vpack.c.bf16 %v1249_v36, %v1249_v36  ;;  %v4865_v43 = vor.u32 %v5873_v29, %v4864_v28  ;;  %v5193_v36 = vor.u32 %v5944_v31, %v5192_v38 }
 0x397   : > { %1704 = vst [vmem:[#allocation2 + $0xb0] sm:$0xf] %v1668_v41  ;;  %v4940_v60 = vld [vmem:[#allocation2 + $0xa8] sm:$0xf] }
 0x398   : > { %1001 = vst [vmem:[#allocation2 + $0xb4] sm:$0xf] %v965_v44  ;;  %v5197_v44 = vor.u32 %v5943_v33, %v5194_v34 }
 0x399   : > { %1353 = vst [vmem:[#allocation2 + $0xb8] sm:$0xf] %v1317_v45 }
 0x39c   : > { %v1601_v50 = vpop.f32.mrf.mxu2 }
 0x39d   : > { %v1669_v53 = vpack.c.bf16 %v1601_v50, %v1601_v50  ;;  %v900_v54 = vpop.f32.mrf.mxu0  ;;  %v1252_v55 = vpop.f32.mrf.mxu1 }
 0x39e   : > { %v966_v57 = vpack.c.bf16 %v900_v54, %v900_v54  ;;  %v1318_v58 = vpack.c.bf16 %v1252_v55, %v1252_v55  ;;  %v4876_v54 = vld [vmem:[#allocation2 + $0x20] sm:$0xf]  ;;  %v5876_v55 = vld [vmem:[#allocation2 + $0x28] sm:$0xf0] }
 0x39f   : > { %1705 = vst [vmem:[#allocation2 + $0xbc] sm:$0xf] %v1669_v53  ;;  %v5893_v61 = vld [vmem:[#allocation2 + $0xb0] sm:$0xf0] }
 0x3a0   : > { %1002 = vst [vmem:[#allocation2 + $0xc0] sm:$0xf] %v966_v57  ;;  %4600 = vmatmul.msk.bf16.gmra.mxu0 %vm796_vm6, %v5833_v51  ;;  %4726 = vmatmul.msk.bf16.gmra.mxu1 %vm796_vm6, %v5851_v52  ;;  %v4941_v62 = vor.u32 %v5893_v61, %v4940_v60 }
 0x3a1   : > { %1354 = vst [vmem:[#allocation2 + $0xc4] sm:$0xf] %v1318_v58  ;;  %4852 = vmatmul.msk.bf16.gmra.mxu2 %vm796_vm6, %v5869_v56  ;;  %v5947_v56 = vld [vmem:[#allocation2 + $0x38] sm:$0xf0]  ;;  %v5946_v58 = vld [vmem:[#allocation2 + $0x34] sm:$0xf] }
 0x3a2   : > { %2281 = vmatmul.bf16.gmra.mxu3 %v4941_v62 }
 0x3a4   : > { %v1604_v2 = vpop.f32.mrf.mxu2 }
 0x3a5   : > { %v1670_v3 = vpack.c.bf16 %v1604_v2, %v1604_v2  ;;  %v902_v4 = vpop.f32.mrf.mxu0  ;;  %v1254_v5 = vpop.f32.mrf.mxu1 }
 0x3a6   : > { %v967_v6 = vpack.c.bf16 %v902_v4, %v902_v4  ;;  %v1319_v7 = vpack.c.bf16 %v1254_v5, %v1254_v5  ;;  %v5205_v4 = vor.u32 %v5947_v56, %v5204_v63  ;;  %v5209_v5 = vor.u32 %v5946_v58, %v5206_v59 }
 0x3a7   : > { %1706 = vst [vmem:[#allocation2 + $0xc8] sm:$0xf] %v1670_v3  ;;  %v4952_v17 = vld [vmem:[#allocation2 + $0xc0] sm:$0xf]  ;;  %v4877_v3 = vor.u32 %v5876_v55, %v4876_v54 }
 0x3a8   : > { %1003 = vst [vmem:[#allocation2 + $0xcc] sm:$0xf] %v967_v6  ;;  %v5228_v55 = vld [vmem:[#allocation2 + $0x60] sm:$0xf] }
 0x3a9   : > { %1355 = vst [vmem:[#allocation2 + $0xd0] sm:$0xf] %v1319_v7 }
 0x3ac   : > { %v1606_v8 = vpop.f32.mrf.mxu2 }
 0x3ad   : > { %v1671_v11 = vpack.c.bf16 %v1606_v8, %v1606_v8  ;;  %v905_v12 = vpop.f32.mrf.mxu0  ;;  %v1257_v13 = vpop.f32.mrf.mxu1 }
 0x3ae   : > { %v968_v15 = vpack.c.bf16 %v905_v12, %v905_v12  ;;  %v1320_v16 = vpack.c.bf16 %v1257_v13, %v1257_v13 }
 0x3af   : > { %1707 = vst [vmem:[#allocation2 + $0xd4] sm:$0xf] %v1671_v11  ;;  %v5896_v18 = vld [vmem:[#allocation2 + $0xc8] sm:$0xf0] }
 0x3b0   : > { %1004 = vst [vmem:[#allocation2 + $0xd8] sm:$0xf] %v968_v15  ;;  %4601 = vmatmul.msk.bf16.gmra.mxu0 %vm796_vm6, %v5834_v9  ;;  %4727 = vmatmul.msk.bf16.gmra.mxu1 %vm796_vm6, %v5852_v10  ;;  %v4953_v19 = vor.u32 %v5896_v18, %v4952_v17  ;;  %v5928_v9 = vld [vmem:[%s7465_s5 + $0x48] sm:$0xff]  ;;  %v4888_v17 = vld [vmem:[#allocation2 + $0x38] sm:$0xf] }
 0x3b1   : > { %1356 = vst [vmem:[#allocation2 + $0xdc] sm:$0xf] %v1320_v16  ;;  %4853 = vmatmul.msk.bf16.gmra.mxu2 %vm796_vm6, %v5870_v14  ;;  %2333 = vmatpush.bf16.msrb.mxu3 %v5928_v9  ;;  %v5879_v18 = vld [vmem:[#allocation2 + $0x40] sm:$0xf0] }
 0x3b2   : > { %2286 = vmatmul.bf16.gmra.mxu3 %v4953_v19  ;;  %v5950_v19 = vld [vmem:[#allocation2 + $0x50] sm:$0xf0] }
 0x3b4   : > { %v1609_v21 = vpop.f32.mrf.mxu2 }
 0x3b5   : > { %v1672_v22 = vpack.c.bf16 %v1609_v21, %v1609_v21  ;;  %v907_v23 = vpop.f32.mrf.mxu0  ;;  %v1259_v24 = vpop.f32.mrf.mxu1  ;;  %v5949_v21 = vld [vmem:[#allocation2 + $0x4c] sm:$0xf] }
 0x3b6   : > { %v969_v25 = vpack.c.bf16 %v907_v23, %v907_v23  ;;  %v1321_v26 = vpack.c.bf16 %v1259_v24, %v1259_v24  ;;  %v6804_v27 = vpop.f32.mrf.mxu3 }
 0x3b7   : > { %1708 = vst [vmem:[#allocation2 + $0xe0] sm:$0xf] %v1672_v22  ;;  %v4964_v45 = vld [vmem:[#allocation2 + $0xd8] sm:$0xf] }
 0x3b8   : > { %1005 = vst [vmem:[#allocation2 + $0xe4] sm:$0xf] %v969_v25  ;;  %v5218_v22 = vld [vmem:[#allocation2 + $0x54] sm:$0xf0] }
 0x3b9   : > { %1357 = vst [vmem:[#allocation2 + $0xe8] sm:$0xf] %v1321_v26  ;;  %v5216_v26 = vld [vmem:[#allocation2 + $0x48] sm:$0xf]  ;;  %v5221_v34 = vor.u32 %v5949_v21, %v5218_v22 }
 0x3ba   : > { %v5217_v33 = vor.u32 %v5950_v19, %v5216_v26 }
 0x3bc   : > { %v1611_v32 = vpop.f32.mrf.mxu2 }
 0x3bd   : > { %v1673_v35 = vpack.c.bf16 %v1611_v32, %v1611_v32  ;;  %v910_v30 = vpop.f32.mrf.mxu0  ;;  %v1262_v37 = vpop.f32.mrf.mxu1  ;;  %v4889_v32 = vor.u32 %v5879_v18, %v4888_v17 }
 0x3be   : > { %v970_v39 = vpack.c.bf16 %v910_v30, %v910_v30  ;;  %v1322_v40 = vpack.c.bf16 %v1262_v37, %v1262_v37  ;;  %v6806_v41 = vpop.f32.mrf.mxu3 }
 0x3bf   : > { %1709 = vst [vmem:[#allocation2 + $0xec] sm:$0xf] %v1673_v35  ;;  %v5899_v46 = vld [vmem:[#allocation2 + $0xe0] sm:$0xf0] }
 0x3c0   : > { %1006 = vst [vmem:[#allocation2 + $0xf0] sm:$0xf] %v970_v39  ;;  %2424 = vmatmul.bf16.vlgmr.msrb.gmra.mxu0 %v4865_v43  ;;  %3090 = vmatmul.bf16.vlgmr.msrb.gmra.mxu1 %v5193_v36  ;;  %v4965_v47 = vor.u32 %v5899_v46, %v4964_v45  ;;  %v4900_v46 = vld [vmem:[#allocation2 + $0x50] sm:$0xf] }
 0x3c1   : > { %1358 = vst [vmem:[#allocation2 + $0xf4] sm:$0xf] %v1322_v40  ;;  %3179 = vmatmul.bf16.vlgmr.msrb.gmra.mxu2 %v5197_v44 }
 0x3c2   : > { %2291 = vmatmul.bf16.gmra.mxu3 %v4965_v47  ;;  %v5882_v47 = vld [vmem:[#allocation2 + $0x58] sm:$0xf0] }
 0x3c3   : > { %v4901_v59 = vor.u32 %v5882_v47, %v4900_v46  ;;  %v5958_v46 = vld [vmem:[#allocation2 + $0x94] sm:$0xf]  ;;  %v5254_v47 = vld [vmem:[#allocation2 + $0x9c] sm:$0xf0] }
 0x3c4   : > { %v1614_v48 = vpop.f32.mrf.mxu2 }
 0x3c5   : > { %v1674_v42 = vpack.c.bf16 %v1614_v48, %v1614_v48  ;;  %v912_v49 = vpop.f32.mrf.mxu0  ;;  %v1264_v50 = vpop.f32.mrf.mxu1  ;;  %v5953_v48 = vld [vmem:[#allocation2 + $0x68] sm:$0xf0] }
 0x3c6   : > { %v971_v51 = vpack.c.bf16 %v912_v49, %v912_v49  ;;  %v1323_v52 = vpack.c.bf16 %v1264_v50, %v1264_v50  ;;  %v6808_v53 = vpop.f32.mrf.mxu3  ;;  %v5952_v49 = vld [vmem:[#allocation2 + $0x64] sm:$0xf]  ;;  %v5230_v50 = vld [vmem:[#allocation2 + $0x6c] sm:$0xf0] }
 0x3c7   : > { %1710 = vst [vmem:[#allocation2 + $0xf8] sm:$0xf] %v1674_v42  ;;  %v4976_v6 = vld [vmem:[#allocation2 + $0xf0] sm:$0xf] }
 0x3c8   : > { %1007 = vst [vmem:[#allocation2 + $0xfc] sm:$0xf] %v971_v51 }
 0x3c9   : > { %1359 = vst [vmem:[#allocation2 + $0x100] sm:$0xf] %v1323_v52 }
 0x3cc   : > { %v1616_v57 = vpop.f32.mrf.mxu2 }
 0x3cd   : > { %v1675_v60 = vpack.c.bf16 %v1616_v57, %v1616_v57  ;;  %v915_v61 = vpop.f32.mrf.mxu0  ;;  %v1267_v62 = vpop.f32.mrf.mxu1 }
 0x3ce   : > { %v972_v0 = vpack.c.bf16 %v915_v61, %v915_v61  ;;  %v1324_v1 = vpack.c.bf16 %v1267_v62, %v1267_v62  ;;  %v6810_v2 = vpop.f32.mrf.mxu3  ;;  %v5233_v61 = vor.u32 %v5952_v49, %v5230_v50  ;;  %v5252_v50 = vld [vmem:[#allocation2 + $0x90] sm:$0xf] }
 0x3cf   : > { %1711 = vst [vmem:[#allocation2 + $0x104] sm:$0xf] %v1675_v60  ;;  %v5902_v7 = vld [vmem:[#allocation2 + $0xf8] sm:$0xf0]  ;;  %v5229_v60 = vor.u32 %v5953_v48, %v5228_v55 }
 0x3d0   : > { %1008 = vst [vmem:[#allocation2 + $0x108] sm:$0xf] %v972_v0  ;;  %2429 = vmatmul.bf16.gmra.mxu0 %v4877_v3  ;;  %3095 = vmatmul.bf16.gmra.mxu1 %v5205_v4  ;;  %v4977_v8 = vor.u32 %v5902_v7, %v4976_v6 }
 0x3d1   : > { %1360 = vst [vmem:[#allocation2 + $0x10c] sm:$0xf] %v1324_v1  ;;  %3184 = vmatmul.bf16.gmra.mxu2 %v5209_v5  ;;  %v5927_v1 = vld [vmem:[%s7465_s5 + $0x40] sm:$0xff] }
 0x3d2   : > { %2296 = vmatmul.bf16.gmra.mxu3 %v4977_v8 }
 0x3d3   : > { %2334 = vmatpush.bf16.msrb.mxu3 %v5927_v1 }
 0x3d4   : > { %v1619_v10 = vpop.f32.mrf.mxu2 }
 0x3d5   : > { %v1676_v11 = vpack.c.bf16 %v1619_v10, %v1619_v10  ;;  %v917_v12 = vpop.f32.mrf.mxu0  ;;  %v1269_v13 = vpop.f32.mrf.mxu1  ;;  %v4912_v10 = vld [vmem:[#allocation2 + $0x68] sm:$0xf] }
 0x3d6   : > { %v973_v14 = vpack.c.bf16 %v917_v12, %v917_v12  ;;  %v1325_v15 = vpack.c.bf16 %v1269_v13, %v1269_v13  ;;  %v6815_v16 = vpop.f32.mrf.mxu3  ;;  %v5956_v12 = vld [vmem:[#allocation2 + $0x80] sm:$0xf0] }
 0x3d7   : > { %1712 = vst [vmem:[#allocation2 + $0x110] sm:$0xf] %v1676_v11  ;;  %v4988_v35 = vld [vmem:[#allocation2 + $0x108] sm:$0xf]  ;;  %v5885_v11 = vld [vmem:[#allocation2 + $0x70] sm:$0xf0] }
 0x3d8   : > { %1009 = vst [vmem:[#allocation2 + $0x114] sm:$0xf] %v973_v14  ;;  %v5955_v14 = vld [vmem:[#allocation2 + $0x7c] sm:$0xf] }
 0x3d9   : > { %1361 = vst [vmem:[#allocation2 + $0x118] sm:$0xf] %v1325_v15  ;;  %v5242_v15 = vld [vmem:[#allocation2 + $0x84] sm:$0xf0] }
 0x3da   : > { %v5245_v26 = vor.u32 %v5955_v14, %v5242_v15  ;;  %v5961_v15 = vld [vmem:[#allocation2 + $0xac] sm:$0xf] }
 0x3dc   : > { %v1621_v20 = vpop.f32.mrf.mxu2 }
 0x3dd   : > { %v1677_v23 = vpack.c.bf16 %v1621_v20, %v1621_v20  ;;  %v920_v24 = vpop.f32.mrf.mxu0  ;;  %v1272_v25 = vpop.f32.mrf.mxu1  ;;  %v5240_v20 = vld [vmem:[#allocation2 + $0x78] sm:$0xf] }
 0x3de   : > { %v974_v28 = vpack.c.bf16 %v920_v24, %v920_v24  ;;  %v1326_v29 = vpack.c.bf16 %v1272_v25, %v1272_v25  ;;  %v6817_v31 = vpop.f32.mrf.mxu3  ;;  %v4913_v24 = vor.u32 %v5885_v11, %v4912_v10  ;;  %v5241_v25 = vor.u32 %v5956_v12, %v5240_v20  ;;  %v6078_v10 = vld [vmem:[%s7465_s5 + $0x1f8] sm:$0xff]  ;;  %v5891_v12 = vld [vmem:[#allocation2 + $0xa0] sm:$0xf0] }
 0x3df   : > { %1713 = vst [vmem:[#allocation2 + $0x11c] sm:$0xf] %v1677_v23  ;;  %v5905_v30 = vld [vmem:[#allocation2 + $0x110] sm:$0xf0]  ;;  %v4936_v11 = vld [vmem:[#allocation2 + $0x98] sm:$0xf]  ;;  %4047 = vmatpush.bf16.msra.mxu1 %v6078_v10 }
 0x3e0   : > { %1010 = vst [vmem:[#allocation2 + $0x120] sm:$0xf] %v974_v28  ;;  %2434 = vmatmul.bf16.gmra.mxu0 %v4889_v32  ;;  %3100 = vmatmul.bf16.gmra.mxu1 %v5217_v33  ;;  %v4989_v37 = vor.u32 %v5905_v30, %v4988_v35  ;;  %v6085_v10 = vld [vmem:[%s7465_s5 + $0x230] sm:$0xff] }
 0x3e1   : > { %1362 = vst [vmem:[#allocation2 + $0x124] sm:$0xf] %v1326_v29  ;;  %3189 = vmatmul.bf16.gmra.mxu2 %v5221_v34 }
 0x3e2   : > { %2301 = vmatmul.bf16.gmra.mxu3 %v4989_v37 }
 0x3e4   : > { %v1624_v38 = vpop.f32.mrf.mxu2 }
 0x3e5   : > { %v1678_v39 = vpack.c.bf16 %v1624_v38, %v1624_v38  ;;  %v922_v40 = vpop.f32.mrf.mxu0  ;;  %v1274_v43 = vpop.f32.mrf.mxu1 }
 0x3e6   : > { %v975_v36 = vpack.c.bf16 %v922_v40, %v922_v40  ;;  %v1327_v44 = vpack.c.bf16 %v1274_v43, %v1274_v43  ;;  %v6819_v45 = vpop.f32.mrf.mxu3  ;;  %v4924_v40 = vld [vmem:[#allocation2 + $0x80] sm:$0xf]  ;;  %v5888_v43 = vld [vmem:[#allocation2 + $0x88] sm:$0xf0] }
 0x3e7   : > { %1714 = vst [vmem:[#allocation2 + $0x128] sm:$0xf] %v1678_v39  ;;  %v5000_v62 = vld [vmem:[#allocation2 + $0x120] sm:$0xf]  ;;  %v4925_v55 = vor.u32 %v5888_v43, %v4924_v40 }
 0x3e8   : > { %1011 = vst [vmem:[#allocation2 + $0x12c] sm:$0xf] %v975_v36  ;;  %v5959_v36 = vld [vmem:[#allocation2 + $0x98] sm:$0xf0] }
 0x3e9   : > { %1363 = vst [vmem:[#allocation2 + $0x130] sm:$0xf] %v1327_v44 }
 0x3ec   : > { %v1626_v42 = vpop.f32.mrf.mxu2 }
 0x3ed   : > { %v1679_v51 = vpack.c.bf16 %v1626_v42, %v1626_v42  ;;  %v925_v52 = vpop.f32.mrf.mxu0  ;;  %v1277_v54 = vpop.f32.mrf.mxu1 }
 0x3ee   : > { %v976_v56 = vpack.c.bf16 %v925_v52, %v925_v52  ;;  %v1328_v57 = vpack.c.bf16 %v1277_v54, %v1277_v54  ;;  %v6821_v58 = vpop.f32.mrf.mxu3 }
 0x3ef   : > { %7467 = vst [vmem:[#allocation4_spill] sm:$0xff] %v6821_v58  ;;  %v5908_v63 = vld [vmem:[#allocation2 + $0x128] sm:$0xf0] }
 0x3f0   : > { %1715 = vst [vmem:[#allocation2 + $0x134] sm:$0xf] %v1679_v51  ;;  %2439 = vmatmul.bf16.gmra.mxu0 %v4901_v59  ;;  %3105 = vmatmul.bf16.gmra.mxu1 %v5229_v60  ;;  %v5001_v0 = vor.u32 %v5908_v63, %v5000_v62  ;;  %v6014_v62 = vld [vmem:[%s7465_s5 + $0x178] sm:$0xff] }
 0x3f1   : > { %1012 = vst [vmem:[#allocation2 + $0x138] sm:$0xf] %v976_v56  ;;  %3194 = vmatmul.bf16.gmra.mxu2 %v5233_v61  ;;  %v5253_v56 = vor.u32 %v5959_v36, %v5252_v50  ;;  %3260 = vmatpush.bf16.msra.mxu3 %v6014_v62 }
 0x3f2   : > { %1364 = vst [vmem:[#allocation2 + $0x13c] sm:$0xf] %v1328_v57  ;;  %2306 = vmatmul.bf16.gmra.mxu3 %v5001_v0  ;;  %v5257_v57 = vor.u32 %v5958_v46, %v5254_v47  ;;  %v5894_v46 = vld [vmem:[#allocation2 + $0xb8] sm:$0xf0]  ;;  %v5965_v47 = vld [vmem:[#allocation2 + $0xc8] sm:$0xf0] }
 0x3f4   : > { %v1629_v3 = vpop.f32.mrf.mxu2 }
 0x3f5   : > { %v1680_v4 = vpack.c.bf16 %v1629_v3, %v1629_v3  ;;  %v927_v5 = vpop.f32.mrf.mxu0  ;;  %v1279_v6 = vpop.f32.mrf.mxu1 }
 0x3f6   : > { %v977_v7 = vpack.c.bf16 %v927_v5, %v927_v5  ;;  %v1329_v8 = vpack.c.bf16 %v1279_v6, %v1279_v6  ;;  %v6826_v9 = vpop.f32.mrf.mxu3 }
 0x3f7   : > { %7468 = vst [vmem:[#allocation5_spill] sm:$0xff] %v6826_v9 }
 0x3f8   : > { %1716 = vst [vmem:[#allocation2 + $0x140] sm:$0xf] %v1680_v4  ;;  %v5012_v28 = vld [vmem:[#allocation2 + $0x138] sm:$0xf] }
 0x3f9   : > { %1013 = vst [vmem:[#allocation2 + $0x144] sm:$0xf] %v977_v7  ;;  %v6086_v7 = vld [vmem:[%s7465_s5 + $0x238] sm:$0xff] }
 0x3fa   : > { %1365 = vst [vmem:[#allocation2 + $0x148] sm:$0xf] %v1329_v8  ;;  %4136 = vmatpush.bf16.msra.mxu2 %v6086_v7  ;;  %v6070_v8 = vld [vmem:[%s7465_s5 + $0x1b8] sm:$0xff] }
 0x3fb   : > { %3958 = vmatpush.bf16.msra.mxu0 %v6070_v8 }
 0x3fc   : > { %v1631_v13 = vpop.f32.mrf.mxu2 }
 0x3fd   : > { %v1681_v17 = vpack.c.bf16 %v1631_v13, %v1631_v13  ;;  %v930_v18 = vpop.f32.mrf.mxu0  ;;  %v1282_v19 = vpop.f32.mrf.mxu1  ;;  %v5962_v13 = vld [vmem:[#allocation2 + $0xb0] sm:$0xf0] }
 0x3fe   : > { %v978_v21 = vpack.c.bf16 %v930_v18, %v930_v18  ;;  %v1330_v22 = vpack.c.bf16 %v1282_v19, %v1282_v19  ;;  %v6828_v23 = vpop.f32.mrf.mxu3  ;;  %4137 = vmatpush.bf16.msra.mxu2 %v6085_v10 }
 0x3ff   : > { %7469 = vst [vmem:[#allocation6_spill] sm:$0xff] %v6828_v23 }
 0x400   : > { %1717 = vst [vmem:[#allocation2 + $0x14c] sm:$0xf] %v1681_v17  ;;  %v5911_v29 = vld [vmem:[#allocation2 + $0x140] sm:$0xf0]  ;;  %2444 = vmatmul.bf16.gmra.mxu0 %v4913_v24  ;;  %3110 = vmatmul.bf16.gmra.mxu1 %v5241_v25  ;;  %v5266_v17 = vld [vmem:[#allocation2 + $0xb4] sm:$0xf0] }
 0x401   : > { %1014 = vst [vmem:[#allocation2 + $0x150] sm:$0xf] %v978_v21  ;;  %v5013_v32 = vor.u32 %v5911_v29, %v5012_v28  ;;  %3199 = vmatmul.bf16.gmra.mxu2 %v5245_v26  ;;  %v5264_v21 = vld [vmem:[#allocation2 + $0xa8] sm:$0xf]  ;;  %v4937_v26 = vor.u32 %v5891_v12, %v4936_v11  ;;  %v5269_v29 = vor.u32 %v5961_v15, %v5266_v17  ;;  %v6077_v15 = vld [vmem:[%s7465_s5 + $0x1f0] sm:$0xff] }
 0x402   : > { %1366 = vst [vmem:[#allocation2 + $0x154] sm:$0xf] %v1330_v22  ;;  %v5265_v28 = vor.u32 %v5962_v13, %v5264_v21  ;;  %4048 = vmatpush.bf16.msra.mxu1 %v6077_v15  ;;  %v4960_v17 = vld [vmem:[#allocation2 + $0xc8] sm:$0xf]  ;;  %v5967_v21 = vld [vmem:[#allocation2 + $0xdc] sm:$0xf] }
 0x403   : > { %2311 = vmatmul.bf16.gmra.mxu3 %v5013_v32  ;;  %v6068_v15 = vld [vmem:[%s7465_s5 + $0x1a8] sm:$0xff] }
 0x404   : > { %v1634_v33 = vpop.f32.mrf.mxu2 }
 0x405   : > { %v1682_v34 = vpack.c.bf16 %v1634_v33, %v1634_v33  ;;  %v932_v35 = vpop.f32.mrf.mxu0  ;;  %v1284_v30 = vpop.f32.mrf.mxu1 }
 0x406   : > { %v979_v37 = vpack.c.bf16 %v932_v35, %v932_v35  ;;  %v1331_v38 = vpack.c.bf16 %v1284_v30, %v1284_v30  ;;  %v6830_v39 = vpop.f32.mrf.mxu3 }
 0x407   : > { %7470 = vst [vmem:[#allocation7_spill] sm:$0xff] %v6830_v39 }
 0x408   : > { %1718 = vst [vmem:[#allocation2 + $0x158] sm:$0xf] %v1682_v34  ;;  %v5024_v59 = vld [vmem:[#allocation2 + $0x150] sm:$0xf] }
 0x409   : > { %1015 = vst [vmem:[#allocation2 + $0x15c] sm:$0xf] %v979_v37 }
 0x40a   : > { %1367 = vst [vmem:[#allocation2 + $0x160] sm:$0xf] %v1331_v38 }
 0x40c   : > { %v1636_v44 = vpop.f32.mrf.mxu2 }
 0x40d   : > { %v1683_v48 = vpack.c.bf16 %v1636_v44, %v1636_v44  ;;  %v935_v42 = vpop.f32.mrf.mxu0  ;;  %v1287_v49 = vpop.f32.mrf.mxu1  ;;  %v4948_v44 = vld [vmem:[#allocation2 + $0xb0] sm:$0xf] }
 0x40e   : > { %v980_v51 = vpack.c.bf16 %v935_v42, %v935_v42  ;;  %v1332_v52 = vpack.c.bf16 %v1287_v49, %v1287_v49  ;;  %v6832_v54 = vpop.f32.mrf.mxu3  ;;  %v5964_v42 = vld [vmem:[#allocation2 + $0xc4] sm:$0xf]  ;;  %v5278_v49 = vld [vmem:[#allocation2 + $0xcc] sm:$0xf0]  ;;  %v4949_v62 = vor.u32 %v5894_v46, %v4948_v44 }
 0x40f   : > { %7471 = vst [vmem:[#allocation8_spill] sm:$0xff] %v6832_v54  ;;  %v5590_v54 = vld [vmem:[#allocation2 + $0xb4] sm:$0xf0] }
 0x410   : > { %1719 = vst [vmem:[#allocation2 + $0x164] sm:$0xf] %v1683_v48  ;;  %v5914_v60 = vld [vmem:[#allocation2 + $0x158] sm:$0xf0]  ;;  %2449 = vmatmul.bf16.gmra.mxu0 %v4925_v55  ;;  %3115 = vmatmul.bf16.gmra.mxu1 %v5253_v56  ;;  %v5276_v55 = vld [vmem:[#allocation2 + $0xc0] sm:$0xf] }
 0x411   : > { %1016 = vst [vmem:[#allocation2 + $0x168] sm:$0xf] %v980_v51  ;;  %v5025_v61 = vor.u32 %v5914_v60, %v5024_v59  ;;  %3204 = vmatmul.bf16.gmra.mxu2 %v5257_v57  ;;  %v5871_v56 = vld [vmem:[#allocation2 + $0x4] sm:$0xf]  ;;  %v4858_v57 = vld [vmem:[#allocation2 + $0xc] sm:$0xf0] }
 0x412   : > { %1368 = vst [vmem:[#allocation2 + $0x16c] sm:$0xf] %v1332_v52 }
 0x413   : > { %2316 = vmatmul.bf16.gmra.mxu3 %v5025_v61 }
 0x414   : > { %v1639_v63 = vpop.f32.mrf.mxu2 }
 0x415   : > { %v1684_v0 = vpack.c.bf16 %v1639_v63, %v1639_v63  ;;  %v937_v1 = vpop.f32.mrf.mxu0  ;;  %v1289_v3 = vpop.f32.mrf.mxu1  ;;  %v5277_v63 = vor.u32 %v5965_v47, %v5276_v55 }
 0x416   : > { %v981_v4 = vpack.c.bf16 %v937_v1, %v937_v1  ;;  %v1333_v5 = vpack.c.bf16 %v1289_v3, %v1289_v3  ;;  %v6837_v6 = vpop.f32.mrf.mxu3  ;;  %v4861_v1 = vor.u32 %v5871_v56, %v4858_v57  ;;  %v6013_v3 = vld [vmem:[%s7465_s5 + $0x170] sm:$0xff] }
 0x417   : > { %7472 = vst [vmem:[#allocation9_spill] sm:$0xff] %v6837_v6  ;;  %3261 = vmatpush.bf16.msra.mxu3 %v6013_v3 }
 0x418   : > { %1720 = vst [vmem:[#allocation2 + $0x170] sm:$0xf] %v1684_v0  ;;  %v5036_v32 = vld [vmem:[#allocation2 + $0x168] sm:$0xf]  ;;  %v5281_v0 = vor.u32 %v5964_v42, %v5278_v49  ;;  %v5900_v42 = vld [vmem:[#allocation2 + $0xe8] sm:$0xf0] }
 0x419   : > { %1017 = vst [vmem:[#allocation2 + $0x174] sm:$0xf] %v981_v4  ;;  %v5971_v49 = vld [vmem:[#allocation2 + $0xf8] sm:$0xf0] }
 0x41a   : > { %1369 = vst [vmem:[#allocation2 + $0x178] sm:$0xf] %v1333_v5 }
 0x41c   : > { %v1641_v14 = vpop.f32.mrf.mxu2 }
 0x41d   : > { %v1685_v18 = vpack.c.bf16 %v1641_v14, %v1641_v14  ;;  %v940_v19 = vpop.f32.mrf.mxu0  ;;  %v1292_v20 = vpop.f32.mrf.mxu1  ;;  %v6069_v14 = vld [vmem:[%s7465_s5 + $0x1b0] sm:$0xff] }
 0x41e   : > { %v982_v22 = vpack.c.bf16 %v940_v19, %v940_v19  ;;  %v1334_v24 = vpack.c.bf16 %v1292_v20, %v1292_v20  ;;  %v6848_v25 = vpop.f32.mrf.mxu3  ;;  %3959 = vmatpush.bf16.msra.mxu0 %v6069_v14  ;;  %v5968_v19 = vld [vmem:[#allocation2 + $0xe0] sm:$0xf0] }
 0x41f   : > { %7473 = vst [vmem:[#allocation10_spill] sm:$0xff] %v6848_v25 }
 0x420   : > { %1721 = vst [vmem:[#allocation2 + $0x17c] sm:$0xf] %v1685_v18  ;;  %v5917_v33 = vld [vmem:[#allocation2 + $0x170] sm:$0xf0]  ;;  %2454 = vmatmul.bf16.gmra.mxu0 %v4937_v26  ;;  %3120 = vmatmul.bf16.gmra.mxu1 %v5265_v28 }
 0x421   : > { %1018 = vst [vmem:[#allocation2 + $0x180] sm:$0xf] %v982_v22  ;;  %v5037_v34 = vor.u32 %v5917_v33, %v5036_v32  ;;  %3209 = vmatmul.bf16.gmra.mxu2 %v5269_v29  ;;  %v5897_v18 = vld [vmem:[#allocation2 + $0xd0] sm:$0xf0]  ;;  %v5290_v22 = vld [vmem:[#allocation2 + $0xe4] sm:$0xf0] }
 0x422   : > { %1370 = vst [vmem:[#allocation2 + $0x184] sm:$0xf] %v1334_v24  ;;  %v5288_v29 = vld [vmem:[#allocation2 + $0xd8] sm:$0xf]  ;;  %v5874_v32 = vld [vmem:[#allocation2 + $0x1c] sm:$0xf]  ;;  %3960 = vmatpush.bf16.msra.mxu0 %v6068_v15 }
 0x423   : > { %2321 = vmatmul.bf16.gmra.mxu3 %v5037_v34  ;;  %v4870_v33 = vld [vmem:[#allocation2 + $0x24] sm:$0xf0] }
 0x424   : > { %v1644_v35 = vpop.f32.mrf.mxu2 }
 0x425   : > { %v1686_v30 = vpack.c.bf16 %v1644_v35, %v1644_v35  ;;  %v942_v37 = vpop.f32.mrf.mxu0  ;;  %v1294_v38 = vpop.f32.mrf.mxu1  ;;  %v4961_v35 = vor.u32 %v5897_v18, %v4960_v17  ;;  %v6076_v17 = vld [vmem:[%s7465_s5 + $0x1e8] sm:$0xff]  ;;  %v4984_v18 = vld [vmem:[#allocation2 + $0xf8] sm:$0xf] }
 0x426   : > { %v983_v40 = vpack.c.bf16 %v942_v37, %v942_v37  ;;  %v1335_v43 = vpack.c.bf16 %v1294_v38, %v1294_v38  ;;  %v6850_v36 = vpop.f32.mrf.mxu3  ;;  %v5293_v37 = vor.u32 %v5967_v21, %v5290_v22  ;;  %v4873_v38 = vor.u32 %v5874_v32, %v4870_v33  ;;  %4049 = vmatpush.bf16.msra.mxu1 %v6076_v17  ;;  %v5973_v22 = vld [vmem:[#allocation2 + $0x10c] sm:$0xf]  ;;  %v5312_v33 = vld [vmem:[#allocation2 + $0x108] sm:$0xf] }
 0x427   : > { %7474 = vst [vmem:[#allocation11_spill] sm:$0xff] %v6850_v36  ;;  %v6019_v36 = vld [vmem:[#allocation2 + $0x50] sm:$0xf0] }
 0x428   : > { %1722 = vst [vmem:[#allocation2 + $0x188] sm:$0xf] %v1686_v30  ;;  %v5289_v30 = vor.u32 %v5968_v19, %v5288_v29  ;;  %v5903_v19 = vld [vmem:[#allocation2 + $0x100] sm:$0xf0] }
 0x429   : > { %1019 = vst [vmem:[#allocation2 + $0x18c] sm:$0xf] %v983_v40 }
 0x42a   : > { %1371 = vst [vmem:[#allocation2 + $0x190] sm:$0xf] %v1335_v43 }
 0x42c   : > { %v1646_v48 = vpop.f32.mrf.mxu2 }
 0x42d   : > { %v1687_v50 = vpack.c.bf16 %v1646_v48, %v1646_v48  ;;  %v945_v51 = vpop.f32.mrf.mxu0  ;;  %v1297_v52 = vpop.f32.mrf.mxu1  ;;  %v4972_v48 = vld [vmem:[#allocation2 + $0xe0] sm:$0xf] }
 0x42e   : > { %v984_v59 = vpack.c.bf16 %v945_v51, %v945_v51  ;;  %v1336_v60 = vpack.c.bf16 %v1297_v52, %v1297_v52  ;;  %v6852_v61 = vpop.f32.mrf.mxu3  ;;  %v5970_v51 = vld [vmem:[#allocation2 + $0xf4] sm:$0xf]  ;;  %v5302_v52 = vld [vmem:[#allocation2 + $0xfc] sm:$0xf0] }
 0x42f   : > { %7475 = vst [vmem:[#allocation12_spill] sm:$0xff] %v6852_v61  ;;  %v5305_v3 = vor.u32 %v5970_v51, %v5302_v52 }
 0x430   : > { %1723 = vst [vmem:[#allocation2 + $0x194] sm:$0xf] %v1687_v50  ;;  %2459 = vmatmul.bf16.gmra.mxu0 %v4949_v62  ;;  %3125 = vmatmul.bf16.gmra.mxu1 %v5277_v63  ;;  %v4882_v62 = vld [vmem:[#allocation2 + $0x3c] sm:$0xf0] }
 0x431   : > { %1020 = vst [vmem:[#allocation2 + $0x198] sm:$0xf] %v984_v59  ;;  %3214 = vmatmul.bf16.gmra.mxu2 %v5281_v0  ;;  %v5300_v59 = vld [vmem:[#allocation2 + $0xf0] sm:$0xf]  ;;  %v4973_v0 = vor.u32 %v5900_v42, %v4972_v48 }
 0x432   : > { %1372 = vst [vmem:[#allocation2 + $0x19c] sm:$0xf] %v1336_v60  ;;  %v5877_v60 = vld [vmem:[#allocation2 + $0x34] sm:$0xf] }
 0x433   : > { %2335 = vmatmul.bf16.vlgmr.msrb.gmra.mxu3 %v4861_v1  ;;  %v5301_v1 = vor.u32 %v5971_v49, %v5300_v59  ;;  %v5906_v59 = vld [vmem:[#allocation2 + $0x118] sm:$0xf0] }
 0x434   : > { %v1649_v4 = vpop.f32.mrf.mxu2 }
 0x435   : > { %v1688_v5 = vpack.c.bf16 %v1649_v4, %v1649_v4  ;;  %v947_v7 = vpop.f32.mrf.mxu0  ;;  %v1299_v8 = vpop.f32.mrf.mxu1  ;;  %v4885_v4 = vor.u32 %v5877_v60, %v4882_v62  ;;  %v5977_v60 = vld [vmem:[#allocation2 + $0x128] sm:$0xf0] }
 0x436   : > { %v985_v11 = vpack.c.bf16 %v947_v7, %v947_v7  ;;  %v1337_v12 = vpack.c.bf16 %v1299_v8, %v1299_v8  ;;  %v6860_v13 = vpop.f32.mrf.mxu3 }
 0x437   : > { %7476 = vst [vmem:[#allocation13_spill] sm:$0xff] %v6860_v13 }
 0x438   : > { %1724 = vst [vmem:[#allocation2 + $0x1a0] sm:$0xf] %v1688_v5  ;;  %v6012_v5 = vld [vmem:[%s7465_s5 + $0x168] sm:$0xff]  ;;  %v5708_v58 = vld [vmem:[#allocation2 + $0x198] sm:$0xf] }
 0x439   : > { %1021 = vst [vmem:[#allocation2 + $0x1a4] sm:$0xf] %v985_v11  ;;  %3262 = vmatpush.bf16.msra.mxu3 %v6012_v5 }
 0x43a   : > { %1373 = vst [vmem:[#allocation2 + $0x1a8] sm:$0xf] %v1337_v12  ;;  %v6084_v12 = vld [vmem:[%s7465_s5 + $0x228] sm:$0xff] }
 0x43b   : > { %4138 = vmatpush.bf16.msra.mxu2 %v6084_v12  ;;  %v4906_v12 = vld [vmem:[#allocation2 + $0x6c] sm:$0xf0] }
 0x43c   : > { %v1651_v20 = vpop.f32.mrf.mxu2 }
 0x43d   : > { %v1689_v24 = vpack.c.bf16 %v1651_v20, %v1651_v20  ;;  %v6868_v26 = vpop.f32.mrf.mxu0  ;;  %v3091_v28 = vpop.f32.mrf.mxu1  ;;  %v5974_v20 = vld [vmem:[#allocation2 + $0x110] sm:$0xf0] }
 0x43e   : > { %v6870_v34 = vpop.f32.mrf.mxu3 }
 0x43f   : > { %7477 = vst [vmem:[#allocation14_spill] sm:$0xff] %v6870_v34 }
 0x440   : > { %1725 = vst [vmem:[#allocation2 + $0x1ac] sm:$0xf] %v1689_v24  ;;  %2464 = vmatmul.bf16.gmra.mxu0 %v4961_v35  ;;  %3130 = vmatmul.bf16.gmra.mxu1 %v5289_v30  ;;  %v5314_v24 = vld [vmem:[#allocation2 + $0x114] sm:$0xf0]  ;;  %v5880_v35 = vld [vmem:[#allocation2 + $0x4c] sm:$0xf] }
 0x441   : > { %3219 = vmatmul.bf16.gmra.mxu2 %v5293_v37  ;;  %v4894_v30 = vld [vmem:[#allocation2 + $0x54] sm:$0xf0] }
 0x442   : > { %v4897_v48 = vor.u32 %v5880_v35, %v4894_v30  ;;  %v6083_v35 = vld [vmem:[%s7465_s5 + $0x220] sm:$0xff] }
 0x443   : > { %2340 = vmatmul.bf16.gmra.mxu3 %v4873_v38  ;;  %v4985_v38 = vor.u32 %v5903_v19, %v4984_v18  ;;  %4139 = vmatpush.bf16.msra.mxu2 %v6083_v35 }
 0x444   : > { %v3180_v40 = vpop.f32.mrf.mxu2 }
 0x445   : > { %v6872_v43 = vadd.f32 %v3180_v40, %v3091_v28  ;;  %v6874_v44 = vpop.f32.mrf.mxu0  ;;  %v3093_v46 = vpop.f32.mrf.mxu1  ;;  %v5313_v40 = vor.u32 %v5974_v20, %v5312_v33 }
 0x446   : > { %v6876_v47 = vpop.f32.mrf.mxu3 }
 0x447   : > { %7478 = vst [vmem:[#allocation15_spill] sm:$0xff] %v6876_v47 }
 0x44c   : > { %v3182_v50 = vpop.f32.mrf.mxu2 }
 0x44d   : > { %v6878_v55 = vadd.f32 %v3182_v50, %v3093_v46  ;;  %v6880_v56 = vpop.f32.mrf.mxu0  ;;  %v3096_v57 = vpop.f32.mrf.mxu1  ;;  %v5317_v46 = vor.u32 %v5973_v22, %v5314_v24 }
 0x44e   : > { %v6882_v63 = vpop.f32.mrf.mxu3 }
 0x44f   : > { %7479 = vst [vmem:[#allocation16_spill] sm:$0xff] %v6882_v63  ;;  %v6009_v63 = vld [vmem:[%s7465_s5 + $0x150] sm:$0xff] }
 0x450   : > { %2469 = vmatmul.bf16.gmra.mxu0 %v4973_v0  ;;  %3135 = vmatmul.bf16.gmra.mxu1 %v5301_v1  ;;  %v5976_v0 = vld [vmem:[#allocation2 + $0x124] sm:$0xf]  ;;  %v5326_v1 = vld [vmem:[#allocation2 + $0x12c] sm:$0xf0] }
 0x451   : > { %3224 = vmatmul.bf16.gmra.mxu2 %v5305_v3  ;;  %v5329_v19 = vor.u32 %v5976_v0, %v5326_v1  ;;  %v5336_v1 = vld [vmem:[#allocation2 + $0x138] sm:$0xf] }
 0x453   : > { %2345 = vmatmul.bf16.gmra.mxu3 %v4885_v4 }
 0x454   : > { %v3185_v7 = vpop.f32.mrf.mxu2 }
 0x455   : > { %v6887_v8 = vadd.f32 %v3185_v7, %v3096_v57  ;;  %v6889_v10 = vpop.f32.mrf.mxu0  ;;  %v3098_v11 = vpop.f32.mrf.mxu1  ;;  %v4996_v57 = vld [vmem:[#allocation2 + $0x110] sm:$0xf]  ;;  %v5324_v7 = vld [vmem:[#allocation2 + $0x120] sm:$0xf] }
 0x456   : > { %v6894_v14 = vpop.f32.mrf.mxu3  ;;  %v4997_v17 = vor.u32 %v5906_v59, %v4996_v57  ;;  %v5325_v18 = vor.u32 %v5977_v60, %v5324_v7  ;;  %v5979_v57 = vld [vmem:[#allocation2 + $0x13c] sm:$0xf]  ;;  %v5338_v59 = vld [vmem:[#allocation2 + $0x144] sm:$0xf0] }
 0x457   : > { %7480 = vst [vmem:[#allocation17_spill] sm:$0xff] %v6894_v14  ;;  %v4918_v7 = vld [vmem:[#allocation2 + $0x84] sm:$0xf0] }
 0x45c   : > { %v3187_v21 = vpop.f32.mrf.mxu2 }
 0x45d   : > { %v6902_v28 = vadd.f32 %v3187_v21, %v3098_v11  ;;  %v6904_v29 = vpop.f32.mrf.mxu0  ;;  %v3101_v32 = vpop.f32.mrf.mxu1  ;;  %v5883_v11 = vld [vmem:[#allocation2 + $0x64] sm:$0xf] }
 0x45e   : > { %v6906_v37 = vpop.f32.mrf.mxu3  ;;  %v4909_v20 = vor.u32 %v5883_v11, %v4906_v12  ;;  %v6011_v21 = vld [vmem:[%s7465_s5 + $0x160] sm:$0xff] }
 0x45f   : > { %7481 = vst [vmem:[#allocation18_spill] sm:$0xff] %v6906_v37  ;;  %3263 = vmatpush.bf16.msra.mxu3 %v6011_v21 }
 0x460   : > { %2474 = vmatmul.bf16.gmra.mxu0 %v4985_v38  ;;  %3140 = vmatmul.bf16.gmra.mxu1 %v5313_v40  ;;  %v6067_v38 = vld [vmem:[%s7465_s5 + $0x1a0] sm:$0xff] }
 0x461   : > { %3229 = vmatmul.bf16.gmra.mxu2 %v5317_v46  ;;  %v6075_v40 = vld [vmem:[%s7465_s5 + $0x1e0] sm:$0xff]  ;;  %3961 = vmatpush.bf16.msra.mxu0 %v6067_v38  ;;  %v5008_v46 = vld [vmem:[#allocation2 + $0x128] sm:$0xf] }
 0x462   : > { %4050 = vmatpush.bf16.msra.mxu1 %v6075_v40  ;;  %v5020_v38 = vld [vmem:[#allocation2 + $0x140] sm:$0xf]  ;;  %v5912_v40 = vld [vmem:[#allocation2 + $0x148] sm:$0xf0] }
 0x463   : > { %2350 = vmatmul.bf16.gmra.mxu3 %v4897_v48  ;;  %v5909_v48 = vld [vmem:[#allocation2 + $0x130] sm:$0xf0] }
 0x464   : > { %v3190_v42 = vpop.f32.mrf.mxu2  ;;  %v5009_v12 = vor.u32 %v5909_v48, %v5008_v46  ;;  %v5982_v46 = vld [vmem:[#allocation2 + $0x154] sm:$0xf]  ;;  %v5350_v48 = vld [vmem:[#allocation2 + $0x15c] sm:$0xf0] }
 0x465   : > { %v6908_v49 = vadd.f32 %v3190_v42, %v3101_v32  ;;  %v6910_v50 = vpop.f32.mrf.mxu0  ;;  %v3103_v51 = vpop.f32.mrf.mxu1  ;;  %v5980_v42 = vld [vmem:[#allocation2 + $0x140] sm:$0xf0] }
 0x466   : > { %v6912_v52 = vpop.f32.mrf.mxu3 }
 0x467   : > { %7482 = vst [vmem:[#allocation19_spill] sm:$0xff] %v6912_v52  ;;  %v6080_v52 = vld [vmem:[%s7465_s5 + $0x208] sm:$0xff] }
 0x46c   : > { %v3192_v62 = vpop.f32.mrf.mxu2 }
 0x46d   : > { %v6914_v3 = vadd.f32 %v3192_v62, %v3103_v51  ;;  %v6916_v4 = vpop.f32.mrf.mxu0  ;;  %v3106_v5 = vpop.f32.mrf.mxu1 }
 0x46e   : > { %7483 = vst [vmem:[#allocation20_spill] sm:$0xff] %v6916_v4  ;;  %v6918_v15 = vpop.f32.mrf.mxu3  ;;  %v6060_v4 = vld [vmem:[#allocation2 + $0x19c] sm:$0xf] }
 0x46f   : > { %7484 = vst [vmem:[#allocation21_spill] sm:$0xff] %v6918_v15 }
 0x470   : > { %2479 = vmatmul.bf16.gmra.mxu0 %v4997_v17  ;;  %3145 = vmatmul.bf16.gmra.mxu1 %v5325_v18  ;;  %v5337_v17 = vor.u32 %v5980_v42, %v5336_v1  ;;  %v5341_v18 = vor.u32 %v5979_v57, %v5338_v59  ;;  %v5348_v1 = vld [vmem:[#allocation2 + $0x150] sm:$0xf] }
 0x471   : > { %3234 = vmatmul.bf16.gmra.mxu2 %v5329_v19 }
 0x473   : > { %2355 = vmatmul.bf16.gmra.mxu3 %v4909_v20 }
 0x474   : > { %v3195_v22 = vpop.f32.mrf.mxu2 }
 0x475   : > { %v6923_v24 = vadd.f32 %v3195_v22, %v3106_v5  ;;  %v6925_v32 = vpop.f32.mrf.mxu0  ;;  %v3108_v33 = vpop.f32.mrf.mxu1  ;;  %v5886_v5 = vld [vmem:[#allocation2 + $0x7c] sm:$0xf] }
 0x476   : > { %7486 = vst [vmem:[#allocation23_spill] sm:$0xff] %v6925_v32  ;;  %v6930_v30 = vpop.f32.mrf.mxu3  ;;  %v4921_v19 = vor.u32 %v5886_v5, %v4918_v7  ;;  %v5889_v5 = vld [vmem:[#allocation2 + $0x94] sm:$0xf] }
 0x477   : > { %7485 = vst [vmem:[#allocation22_spill] sm:$0xff] %v6923_v24  ;;  %v6061_v24 = vld [vmem:[#allocation2 + $0x1a0] sm:$0xf0] }
 0x478   : > { %7487 = vst [vmem:[#allocation24_spill] sm:$0xff] %v6930_v30  ;;  %v4942_v30 = vld [vmem:[#allocation2 + $0xb4] sm:$0xf0] }
 0x47c   : > { %v3197_v51 = vpop.f32.mrf.mxu2 }
 0x47d   : > { %v6938_v60 = vadd.f32 %v3197_v51, %v3108_v33  ;;  %v6940_v62 = vpop.f32.mrf.mxu0  ;;  %v3111_v0 = vpop.f32.mrf.mxu1  ;;  %v5983_v51 = vld [vmem:[#allocation2 + $0x158] sm:$0xf0] }
 0x47e   : > { %7489 = vst [vmem:[#allocation26_spill] sm:$0xff] %v6940_v62  ;;  %v6942_v11 = vpop.f32.mrf.mxu3  ;;  %v5696_v62 = vld [vmem:[#allocation2 + $0x180] sm:$0xf] }
 0x47f   : > { %7488 = vst [vmem:[#allocation25_spill] sm:$0xff] %v6938_v60 }
 0x480   : > { %7490 = vst [vmem:[#allocation27_spill] sm:$0xff] %v6942_v11  ;;  %2484 = vmatmul.bf16.gmra.mxu0 %v5009_v12  ;;  %3150 = vmatmul.bf16.gmra.mxu1 %v5337_v17  ;;  %v5021_v12 = vor.u32 %v5912_v40, %v5020_v38  ;;  %v5349_v17 = vor.u32 %v5983_v51, %v5348_v1  ;;  %v6010_v38 = vld [vmem:[%s7465_s5 + $0x158] sm:$0xff] }
 0x481   : > { %3239 = vmatmul.bf16.gmra.mxu2 %v5341_v18  ;;  %v5353_v18 = vor.u32 %v5982_v46, %v5350_v48  ;;  %3264 = vmatpush.bf16.msra.mxu3 %v6010_v38  ;;  %v5362_v38 = vld [vmem:[#allocation2 + $0x174] sm:$0xf0] }
 0x483   : > { %2360 = vmatmul.bf16.gmra.mxu3 %v4921_v19 }
 0x484   : > { %v3200_v20 = vpop.f32.mrf.mxu2 }
 0x485   : > { %v6944_v21 = vadd.f32 %v3200_v20, %v3111_v0  ;;  %v6946_v22 = vpop.f32.mrf.mxu0  ;;  %v3113_v33 = vpop.f32.mrf.mxu1  ;;  %v4930_v0 = vld [vmem:[#allocation2 + $0x9c] sm:$0xf0]  ;;  %v6074_v20 = vld [vmem:[%s7465_s5 + $0x1d8] sm:$0xff]  ;;  %3265 = vmatpush.bf16.msra.mxu3 %v6009_v63 }
 0x486   : > { %7492 = vst [vmem:[#allocation29_spill] sm:$0xff] %v6946_v22  ;;  %v6948_v35 = vpop.f32.mrf.mxu3  ;;  %v4933_v19 = vor.u32 %v5889_v5, %v4930_v0  ;;  %4051 = vmatpush.bf16.msra.mxu1 %v6074_v20  ;;  %v6065_v5 = vld [vmem:[%s7465_s5 + $0x190] sm:$0xff] }
 0x487   : > { %7491 = vst [vmem:[#allocation28_spill] sm:$0xff] %v6944_v21  ;;  %v6073_v0 = vld [vmem:[%s7465_s5 + $0x1d0] sm:$0xff] }
 0x488   : > { %7493 = vst [vmem:[#allocation30_spill] sm:$0xff] %v6948_v35  ;;  %v5892_v35 = vld [vmem:[#allocation2 + $0xac] sm:$0xf] }
 0x48a   : > { %4052 = vmatpush.bf16.msra.mxu1 %v6073_v0 }
 0x48c   : > { %v3202_v11 = vpop.f32.mrf.mxu2 }
 0x48d   : > { %v6950_v42 = vadd.f32 %v3202_v11, %v3113_v33  ;;  %v6952_v57 = vpop.f32.mrf.mxu0  ;;  %v3116_v59 = vpop.f32.mrf.mxu1  ;;  %v6066_v11 = vld [vmem:[%s7465_s5 + $0x198] sm:$0xff] }
 0x48e   : > { %7495 = vst [vmem:[#allocation32_spill] sm:$0xff] %v6952_v57  ;;  %v6954_v7 = vpop.f32.mrf.mxu3  ;;  %v6082_v33 = vld [vmem:[%s7465_s5 + $0x218] sm:$0xff]  ;;  %3962 = vmatpush.bf16.msra.mxu0 %v6066_v11  ;;  %v6072_v11 = vld [vmem:[%s7465_s5 + $0x1c8] sm:$0xff] }
 0x48f   : > { %7494 = vst [vmem:[#allocation31_spill] sm:$0xff] %v6950_v42  ;;  %4140 = vmatpush.bf16.msra.mxu2 %v6082_v33  ;;  %v5985_v33 = vld [vmem:[#allocation2 + $0x16c] sm:$0xf]  ;;  %4053 = vmatpush.bf16.msra.mxu1 %v6072_v11  ;;  %v5372_v11 = vld [vmem:[#allocation2 + $0x180] sm:$0xf] }
 0x490   : > { %7496 = vst [vmem:[#allocation33_spill] sm:$0xff] %v6954_v7  ;;  %2489 = vmatmul.bf16.gmra.mxu0 %v5021_v12  ;;  %3155 = vmatmul.bf16.gmra.mxu1 %v5349_v17  ;;  %v6081_v12 = vld [vmem:[%s7465_s5 + $0x210] sm:$0xff]  ;;  %v5032_v17 = vld [vmem:[#allocation2 + $0x158] sm:$0xf]  ;;  %v5360_v7 = vld [vmem:[#allocation2 + $0x168] sm:$0xf]  ;;  %v5365_v37 = vor.u32 %v5985_v33, %v5362_v38 }
 0x491   : > { %3244 = vmatmul.bf16.gmra.mxu2 %v5353_v18  ;;  %v5915_v18 = vld [vmem:[#allocation2 + $0x160] sm:$0xf0]  ;;  %v5989_v33 = vld [vmem:[#allocation2 + $0x188] sm:$0xf0] }
 0x492   : > { %3963 = vmatpush.bf16.msra.mxu0 %v6065_v5  ;;  %v5033_v0 = vor.u32 %v5915_v18, %v5032_v17  ;;  %v6079_v17 = vld [vmem:[%s7465_s5 + $0x200] sm:$0xff]  ;;  %v5373_v14 = vor.u32 %v5989_v33, %v5372_v11 }
 0x493   : > { %2365 = vmatmul.bf16.gmra.mxu3 %v4933_v19  ;;  %v6064_v19 = vld [vmem:[%s7465_s5 + $0x188] sm:$0xff]  ;;  %4141 = vmatpush.bf16.msra.mxu2 %v6081_v12  ;;  %v4945_v12 = vor.u32 %v5892_v35, %v4942_v30  ;;  %v5988_v38 = vld [vmem:[#allocation2 + $0x184] sm:$0xf]  ;;  %v5530_v11 = vld [vmem:[#allocation2 + $0x3c] sm:$0xf0] }
 0x494   : > { %v3205_v40 = vpop.f32.mrf.mxu2 }
 0x495   : > { %v6968_v51 = vadd.f32 %v3205_v40, %v3116_v59  ;;  %v3118_v46 = vpop.f32.mrf.mxu1  ;;  %v6972_v1 = vpop.f32.mrf.mxu0  ;;  %v5986_v59 = vld [vmem:[#allocation2 + $0x170] sm:$0xf0] }
 0x496   : > { %v6970_v48 = vpop.f32.mrf.mxu3  ;;  %7499 = vst [vmem:[#allocation36_spill] sm:$0xff] %v6972_v1  ;;  %v5361_v15 = vor.u32 %v5986_v59, %v5360_v7  ;;  %3964 = vmatpush.bf16.msra.mxu0 %v6064_v19  ;;  %v6071_v7 = vld [vmem:[%s7465_s5 + $0x1c0] sm:$0xff]  ;;  %v5044_v59 = vld [vmem:[#allocation2 + $0x170] sm:$0xf]  ;;  %v5918_v19 = vld [vmem:[#allocation2 + $0x178] sm:$0xf0] }
 0x497   : > { %7497 = vst [vmem:[#allocation34_spill] sm:$0xff] %v6968_v51  ;;  %4142 = vmatpush.bf16.msra.mxu2 %v6080_v52  ;;  %4054 = vmatpush.bf16.msra.mxu1 %v6071_v7  ;;  %v5895_v7 = vld [vmem:[#allocation2 + $0xc4] sm:$0xf]  ;;  %v6030_v1 = vld [vmem:[#allocation2 + $0xac] sm:$0xf] }
 0x498   : > { %7498 = vst [vmem:[#allocation35_spill] sm:$0xff] %v6970_v48 }
 0x49b   : > { %4143 = vmatpush.bf16.msra.mxu2 %v6079_v17 }
 0x49c   : > { %v3207_v20 = vpop.f32.mrf.mxu2 }
 0x49d   : > { %v6989_v40 = vadd.f32 %v3207_v20, %v3118_v46  ;;  %v3121_v48 = vpop.f32.mrf.mxu1  ;;  %v6996_v46 = vpop.f32.mrf.mxu0  ;;  %v6063_v20 = vld [vmem:[%s7465_s5 + $0x180] sm:$0xff] }
 0x49e   : > { %v6991_v5 = vpop.f32.mrf.mxu3  ;;  %7502 = vst [vmem:[#allocation39_spill] sm:$0xff] %v6996_v46  ;;  %3965 = vmatpush.bf16.msra.mxu0 %v6063_v20  ;;  %v5566_v46 = vld [vmem:[#allocation2 + $0x84] sm:$0xf0] }
 0x49f   : > { %7500 = vst [vmem:[#allocation37_spill] sm:$0xff] %v6989_v40 }
 0x4a0   : > { %7501 = vst [vmem:[#allocation38_spill] sm:$0xff] %v6991_v5  ;;  %2494 = vmatmul.bf16.gmra.mxu0 %v5033_v0  ;;  %3160 = vmatmul.bf16.gmra.mxu1 %v5361_v15  ;;  %v5374_v0 = vld [vmem:[#allocation2 + $0x18c] sm:$0xf0] }
 0x4a1   : > { %3249 = vmatmul.bf16.gmra.mxu2 %v5365_v37  ;;  %v4954_v5 = vld [vmem:[#allocation2 + $0xcc] sm:$0xf0] }
 0x4a2   : > { %v4957_v17 = vor.u32 %v5895_v7, %v4954_v5  ;;  %v5536_v5 = vld [vmem:[#allocation2 + $0x38] sm:$0xf]  ;;  %v5898_v7 = vld [vmem:[#allocation2 + $0xdc] sm:$0xf] }
 0x4a3   : > { %2370 = vmatmul.bf16.gmra.mxu3 %v4945_v12 }
 0x4a4   : > { %v3210_v15 = vpop.f32.mrf.mxu2 }
 0x4a5   : > { %v7007_v30 = vadd.f32 %v3210_v15, %v3121_v48  ;;  %v3123_v37 = vpop.f32.mrf.mxu1  ;;  %v7011_v18 = vpop.f32.mrf.mxu0  ;;  %v5045_v15 = vor.u32 %v5918_v19, %v5044_v59  ;;  %v6016_v59 = vld [vmem:[#allocation2 + $0x38] sm:$0xf0]  ;;  %v6015_v19 = vld [vmem:[#allocation2 + $0x34] sm:$0xf] }
 0x4a6   : > { %v7009_v35 = vpop.f32.mrf.mxu3  ;;  %7505 = vst [vmem:[#allocation42_spill] sm:$0xff] %v7011_v18 }
 0x4a7   : > { %7503 = vst [vmem:[#allocation40_spill] sm:$0xff] %v7007_v30  ;;  %v6024_v30 = vld [vmem:[#allocation2 + $0x7c] sm:$0xf] }
 0x4a8   : > { %7504 = vst [vmem:[#allocation41_spill] sm:$0xff] %v7009_v35  ;;  %v5377_v35 = vor.u32 %v5988_v38, %v5374_v0  ;;  %v5528_v0 = vld [vmem:[#allocation2 + $0x30] sm:$0xf] }
 0x4ac   : > { %v3212_v52 = vpop.f32.mrf.mxu2 }
 0x4ad   : > { %v7013_v12 = vadd.f32 %v3212_v52, %v3123_v37  ;;  %v3126_v20 = vpop.f32.mrf.mxu1  ;;  %v7020_v37 = vpop.f32.mrf.mxu0 }
 0x4ae   : > { %v7015_v48 = vpop.f32.mrf.mxu3  ;;  %7508 = vst [vmem:[#allocation45_spill] sm:$0xff] %v7020_v37 }
 0x4af   : > { %7506 = vst [vmem:[#allocation43_spill] sm:$0xff] %v7013_v12  ;;  %v6018_v12 = vld [vmem:[#allocation2 + $0x4c] sm:$0xf] }
 0x4b0   : > { %7507 = vst [vmem:[#allocation44_spill] sm:$0xff] %v7015_v48  ;;  %2499 = vmatmul.bf16.gmra.mxu0 %v5045_v15  ;;  %3165 = vmatmul.bf16.gmra.mxu1 %v5373_v14  ;;  %v4966_v15 = vld [vmem:[#allocation2 + $0xe4] sm:$0xf0] }
 0x4b1   : > { %3254 = vmatmul.bf16.gmra.mxu2 %v5377_v35  ;;  %v6017_v35 = vld [vmem:[#allocation2 + $0x40] sm:$0xf0]  ;;  %v4969_v61 = vor.u32 %v5898_v7, %v4966_v15  ;;  %v5540_v7 = vld [vmem:[#allocation2 + $0x48] sm:$0xf] }
 0x4b2   : > { %v5537_v13 = vor.u32 %v6017_v35, %v5536_v5 }
 0x4b3   : > { %2375 = vmatmul.bf16.gmra.mxu3 %v4957_v17  ;;  %v5529_v17 = vor.u32 %v6016_v59, %v5528_v0  ;;  %v5542_v59 = vld [vmem:[#allocation2 + $0x54] sm:$0xf0]  ;;  %v6020_v0 = vld [vmem:[#allocation2 + $0x58] sm:$0xf0] }
 0x4b4   : > { %v3215_v47 = vpop.f32.mrf.mxu2 }
 0x4b5   : > { %v7022_v52 = vadd.f32 %v3215_v47, %v3126_v20  ;;  %v3128_v34 = vpop.f32.mrf.mxu1  ;;  %v5533_v47 = vor.u32 %v6015_v19, %v5530_v11  ;;  %v7030_v20 = vpop.f32.mrf.mxu0  ;;  %v5548_v11 = vld [vmem:[#allocation2 + $0x50] sm:$0xf] }
 0x4b6   : > { %v7024_v48 = vpop.f32.mrf.mxu3  ;;  %7511 = vst [vmem:[#allocation48_spill] sm:$0xff] %v7030_v20 }
 0x4b7   : > { %7509 = vst [vmem:[#allocation46_spill] sm:$0xff] %v7022_v52 }
 0x4bc   : > { %v3217_v14 = vpop.f32.mrf.mxu2 }
 0x4bd   : > { %v7026_v33 = vadd.f32 %v3217_v14, %v3128_v34  ;;  %v3131_v38 = vpop.f32.mrf.mxu1 }
 0x4be   : > { %v7028_v63 = vpop.f32.mrf.mxu3 }
 0x4bf   : > { %7510 = vst [vmem:[#allocation47_spill] sm:$0xff] %v7026_v33  ;;  %v7036_v33 = vpop.f32.mrf.mxu0 }
 0x4c0   : > { %3966 = vmatmul.bf16.vlgmr.msra.gmra.mxu0 %v5529_v17  ;;  %4055 = vmatmul.bf16.vlgmr.msra.gmra.mxu1 %v5533_v47  ;;  %7513 = vst [vmem:[#allocation50_spill] sm:$0xff] %v7036_v33  ;;  %v5549_v17 = vor.u32 %v6020_v0, %v5548_v11  ;;  %v5560_v0 = vld [vmem:[#allocation2 + $0x68] sm:$0xf] }
 0x4c1   : > { %4144 = vmatmul.bf16.vlgmr.msra.gmra.mxu2 %v5537_v13  ;;  %v5901_v13 = vld [vmem:[#allocation2 + $0xf4] sm:$0xf] }
 0x4c3   : > { %2380 = vmatmul.bf16.gmra.mxu3 %v4969_v61  ;;  %v4978_v61 = vld [vmem:[#allocation2 + $0xfc] sm:$0xf0] }
 0x4c4   : > { %v3220_v52 = vpop.f32.mrf.mxu2  ;;  %v4981_v47 = vor.u32 %v5901_v13, %v4978_v61 }
 0x4c5   : > { %v7032_v37 = vadd.f32 %v3220_v52, %v3131_v38  ;;  %v3133_v34 = vpop.f32.mrf.mxu1  ;;  %v5541_v52 = vor.u32 %v6019_v36, %v5540_v7  ;;  %v5545_v38 = vor.u32 %v6018_v12, %v5542_v59  ;;  %v6022_v36 = vld [vmem:[#allocation2 + $0x68] sm:$0xf0]  ;;  %v6021_v12 = vld [vmem:[#allocation2 + $0x64] sm:$0xf]  ;;  %v5554_v59 = vld [vmem:[#allocation2 + $0x6c] sm:$0xf0] }
 0x4c6   : > { %v7034_v14 = vpop.f32.mrf.mxu3  ;;  %v6023_v7 = vld [vmem:[#allocation2 + $0x70] sm:$0xf0] }
 0x4c7   : > { %7512 = vst [vmem:[#allocation49_spill] sm:$0xff] %v7032_v37  ;;  %v6008_v37 = vld [vmem:[%s7465_s5 + $0x148] sm:$0xff] }
 0x4c8   : > { %3266 = vmatpush.bf16.msra.mxu3 %v6008_v37 }
 0x4cc   : > { %v3222_v19 = vpop.f32.mrf.mxu2 }
 0x4cd   : > { %v7038_v5 = vadd.f32 %v3222_v19, %v3133_v34  ;;  %v3136_v35 = vpop.f32.mrf.mxu1  ;;  %v7045_v34 = vpop.f32.mrf.mxu0 }
 0x4ce   : > { %v7040_v15 = vpop.f32.mrf.mxu3  ;;  %7515 = vst [vmem:[#allocation52_spill] sm:$0xff] %v7045_v34 }
 0x4cf   : > { %7514 = vst [vmem:[#allocation51_spill] sm:$0xff] %v7038_v5 }
 0x4d0   : > { %3971 = vmatmul.bf16.gmra.mxu0 %v5541_v52  ;;  %4060 = vmatmul.bf16.gmra.mxu1 %v5545_v38  ;;  %v5552_v38 = vld [vmem:[#allocation2 + $0x60] sm:$0xf] }
 0x4d1   : > { %4149 = vmatmul.bf16.gmra.mxu2 %v5549_v17  ;;  %v5904_v17 = vld [vmem:[#allocation2 + $0x10c] sm:$0xf] }
 0x4d3   : > { %2385 = vmatmul.bf16.gmra.mxu3 %v4981_v47  ;;  %v4990_v47 = vld [vmem:[#allocation2 + $0x114] sm:$0xf0] }
 0x4d4   : > { %v3225_v19 = vpop.f32.mrf.mxu2  ;;  %v4993_v34 = vor.u32 %v5904_v17, %v4990_v47 }
 0x4d5   : > { %v7047_v5 = vadd.f32 %v3225_v19, %v3136_v35  ;;  %v3138_v33 = vpop.f32.mrf.mxu1  ;;  %v7051_v13 = vpop.f32.mrf.mxu0  ;;  %v5553_v35 = vor.u32 %v6022_v36, %v5552_v38  ;;  %v5557_v19 = vor.u32 %v6021_v12, %v5554_v59  ;;  %v5572_v36 = vld [vmem:[#allocation2 + $0x80] sm:$0xf]  ;;  %v6026_v12 = vld [vmem:[#allocation2 + $0x88] sm:$0xf0] }
 0x4d6   : > { %v7049_v20 = vpop.f32.mrf.mxu3  ;;  %7517 = vst [vmem:[#allocation54_spill] sm:$0xff] %v7051_v13  ;;  %v5573_v17 = vor.u32 %v6026_v12, %v5572_v36  ;;  %v5578_v36 = vld [vmem:[#allocation2 + $0x9c] sm:$0xf0] }
 0x4d7   : > { %7516 = vst [vmem:[#allocation53_spill] sm:$0xff] %v7047_v5  ;;  %v5561_v5 = vor.u32 %v6023_v7, %v5560_v0  ;;  %v5564_v7 = vld [vmem:[#allocation2 + $0x78] sm:$0xf] }
 0x4dc   : > { %v3227_v11 = vpop.f32.mrf.mxu2 }
 0x4dd   : > { %v7053_v61 = vadd.f32 %v3227_v11, %v3138_v33  ;;  %v3141_v52 = vpop.f32.mrf.mxu1  ;;  %v7061_v11 = vpop.f32.mrf.mxu0 }
 0x4de   : > { %v7055_v37 = vpop.f32.mrf.mxu3  ;;  %7520 = vst [vmem:[#allocation57_spill] sm:$0xff] %v7061_v11 }
 0x4df   : > { %7518 = vst [vmem:[#allocation55_spill] sm:$0xff] %v7053_v61  ;;  %v6025_v61 = vld [vmem:[#allocation2 + $0x80] sm:$0xf0] }
 0x4e0   : > { %3976 = vmatmul.bf16.gmra.mxu0 %v5553_v35  ;;  %4065 = vmatmul.bf16.gmra.mxu1 %v5557_v19 }
 0x4e1   : > { %4154 = vmatmul.bf16.gmra.mxu2 %v5561_v5  ;;  %v5907_v5 = vld [vmem:[#allocation2 + $0x124] sm:$0xf] }
 0x4e3   : > { %2390 = vmatmul.bf16.gmra.mxu3 %v4993_v34  ;;  %v5002_v34 = vld [vmem:[#allocation2 + $0x12c] sm:$0xf0] }
 0x4e4   : > { %v3230_v18 = vpop.f32.mrf.mxu2  ;;  %v5005_v47 = vor.u32 %v5907_v5, %v5002_v34  ;;  %v6029_v5 = vld [vmem:[#allocation2 + $0xa0] sm:$0xf0] }
 0x4e5   : > { %v7057_v25 = vadd.f32 %v3230_v18, %v3141_v52  ;;  %v3143_v13 = vpop.f32.mrf.mxu1  ;;  %v5565_v18 = vor.u32 %v6025_v61, %v5564_v7  ;;  %v5569_v52 = vor.u32 %v6024_v30, %v5566_v46  ;;  %v7067_v35 = vpop.f32.mrf.mxu0  ;;  %v6028_v30 = vld [vmem:[#allocation2 + $0x98] sm:$0xf0]  ;;  %v6027_v61 = vld [vmem:[#allocation2 + $0x94] sm:$0xf]  ;;  %v5584_v7 = vld [vmem:[#allocation2 + $0x98] sm:$0xf] }
 0x4e6   : > { %v7059_v33 = vpop.f32.mrf.mxu3  ;;  %7523 = vst [vmem:[#allocation60_spill] sm:$0xff] %v7067_v35 }
 0x4e7   : > { %7519 = vst [vmem:[#allocation56_spill] sm:$0xff] %v7057_v25 }
 0x4ec   : > { %v3232_v6 = vpop.f32.mrf.mxu2 }
 0x4ed   : > { %v7063_v59 = vadd.f32 %v3232_v6, %v3143_v13  ;;  %v3146_v0 = vpop.f32.mrf.mxu1  ;;  %v6007_v6 = vld [vmem:[%s7465_s5 + $0x140] sm:$0xff]  ;;  %v7076_v46 = vpop.f32.mrf.mxu0 }
 0x4ee   : > { %v7065_v38 = vpop.f32.mrf.mxu3  ;;  %3267 = vmatpush.bf16.msra.mxu3 %v6007_v6  ;;  %7526 = vst [vmem:[#allocation63_spill] sm:$0xff] %v7076_v46 }
 0x4ef   : > { %7521 = vst [vmem:[#allocation58_spill] sm:$0xff] %v7063_v59 }
 0x4f0   : > { %7522 = vst [vmem:[#allocation59_spill] sm:$0xff] %v7065_v38  ;;  %3981 = vmatmul.bf16.gmra.mxu0 %v5565_v18  ;;  %4070 = vmatmul.bf16.gmra.mxu1 %v5569_v52  ;;  %v5576_v52 = vld [vmem:[#allocation2 + $0x90] sm:$0xf] }
 0x4f1   : > { %4159 = vmatmul.bf16.gmra.mxu2 %v5573_v17  ;;  %v5910_v17 = vld [vmem:[#allocation2 + $0x13c] sm:$0xf] }
 0x4f3   : > { %2395 = vmatmul.bf16.gmra.mxu3 %v5005_v47  ;;  %v5014_v47 = vld [vmem:[#allocation2 + $0x144] sm:$0xf0] }
 0x4f4   : > { %v3235_v13 = vpop.f32.mrf.mxu2  ;;  %v5017_v46 = vor.u32 %v5910_v17, %v5014_v47 }
 0x4f5   : > { %v7072_v19 = vadd.f32 %v3235_v13, %v3146_v0  ;;  %v3148_v59 = vpop.f32.mrf.mxu1  ;;  %v5577_v0 = vor.u32 %v6028_v30, %v5576_v52  ;;  %v5581_v13 = vor.u32 %v6027_v61, %v5578_v36  ;;  %v7082_v11 = vpop.f32.mrf.mxu0  ;;  %v5596_v30 = vld [vmem:[#allocation2 + $0xb0] sm:$0xf]  ;;  %v6032_v61 = vld [vmem:[#allocation2 + $0xb8] sm:$0xf0] }
 0x4f6   : > { %v7074_v25 = vpop.f32.mrf.mxu3  ;;  %7529 = vst [vmem:[#allocation66_spill] sm:$0xff] %v7082_v11  ;;  %v5597_v47 = vor.u32 %v6032_v61, %v5596_v30  ;;  %v6034_v11 = vld [vmem:[#allocation2 + $0xc8] sm:$0xf0]  ;;  %v5600_v61 = vld [vmem:[#allocation2 + $0xc0] sm:$0xf] }
 0x4f7   : > { %7524 = vst [vmem:[#allocation61_spill] sm:$0xff] %v7072_v19  ;;  %v5585_v19 = vor.u32 %v6029_v5, %v5584_v7  ;;  %v5588_v5 = vld [vmem:[#allocation2 + $0xa8] sm:$0xf] }
 0x4f8   : > { %7525 = vst [vmem:[#allocation62_spill] sm:$0xff] %v7074_v25 }
 0x4fc   : > { %v3237_v12 = vpop.f32.mrf.mxu2 }
 0x4fd   : > { %v7078_v34 = vadd.f32 %v3237_v12, %v3148_v59  ;;  %v3151_v18 = vpop.f32.mrf.mxu1 }
 0x4fe   : > { %v7080_v6 = vpop.f32.mrf.mxu3 }
 0x4ff   : > { %7527 = vst [vmem:[#allocation64_spill] sm:$0xff] %v7078_v34  ;;  %v6031_v34 = vld [vmem:[#allocation2 + $0xb0] sm:$0xf0] }
 0x500   : > { %7528 = vst [vmem:[#allocation65_spill] sm:$0xff] %v7080_v6  ;;  %3986 = vmatmul.bf16.gmra.mxu0 %v5577_v0  ;;  %4075 = vmatmul.bf16.gmra.mxu1 %v5581_v13  ;;  %v5589_v17 = vor.u32 %v6031_v34, %v5588_v5  ;;  %v5602_v34 = vld [vmem:[#allocation2 + $0xcc] sm:$0xf0]  ;;  %v6035_v5 = vld [vmem:[#allocation2 + $0xd0] sm:$0xf0] }
 0x501   : > { %4164 = vmatmul.bf16.gmra.mxu2 %v5585_v19  ;;  %v5913_v19 = vld [vmem:[#allocation2 + $0x154] sm:$0xf] }
 0x502   : > { %v6055_v6 = vld [vmem:[#allocation2 + $0x170] sm:$0xf0] }
 0x503   : > { %2400 = vmatmul.bf16.gmra.mxu3 %v5017_v46  ;;  %v5026_v46 = vld [vmem:[#allocation2 + $0x15c] sm:$0xf0] }
 0x504   : > { %v3240_v35 = vpop.f32.mrf.mxu2  ;;  %v5029_v0 = vor.u32 %v5913_v19, %v5026_v46  ;;  %v5916_v19 = vld [vmem:[#allocation2 + $0x16c] sm:$0xf]  ;;  %v5038_v46 = vld [vmem:[#allocation2 + $0x174] sm:$0xf0] }
 0x505   : > { %v7084_v40 = vadd.f32 %v3240_v35, %v3151_v18  ;;  %v3153_v59 = vpop.f32.mrf.mxu1  ;;  %v5593_v35 = vor.u32 %v6030_v1, %v5590_v54  ;;  %v7092_v18 = vpop.f32.mrf.mxu0  ;;  %v5608_v1 = vld [vmem:[#allocation2 + $0xc8] sm:$0xf] }
 0x506   : > { %v7086_v12 = vpop.f32.mrf.mxu3  ;;  %7534 = vst [vmem:[#allocation71_spill] sm:$0xff] %v7092_v18 }
 0x507   : > { %7530 = vst [vmem:[#allocation67_spill] sm:$0xff] %v7084_v40 }
 0x508   : > { %7531 = vst [vmem:[#allocation68_spill] sm:$0xff] %v7086_v12  ;;  %v5674_v12 = vld [vmem:[#allocation2 + $0x15c] sm:$0xf0] }
 0x50c   : > { %v3242_v51 = vpop.f32.mrf.mxu2 }
 0x50d   : > { %v7088_v36 = vadd.f32 %v3242_v51, %v3153_v59  ;;  %v3156_v7 = vpop.f32.mrf.mxu1 }
 0x50e   : > { %v7090_v52 = vpop.f32.mrf.mxu3 }
 0x50f   : > { %7532 = vst [vmem:[#allocation69_spill] sm:$0xff] %v7088_v36  ;;  %v7098_v36 = vpop.f32.mrf.mxu0 }
 0x510   : > { %7533 = vst [vmem:[#allocation70_spill] sm:$0xff] %v7090_v52  ;;  %3991 = vmatmul.bf16.gmra.mxu0 %v5589_v17  ;;  %4080 = vmatmul.bf16.gmra.mxu1 %v5593_v35  ;;  %v6033_v52 = vld [vmem:[#allocation2 + $0xc4] sm:$0xf]  ;;  %v5601_v35 = vor.u32 %v6034_v11, %v5600_v61  ;;  %v5620_v11 = vld [vmem:[#allocation2 + $0xe0] sm:$0xf] }
 0x511   : > { %4169 = vmatmul.bf16.gmra.mxu2 %v5597_v47  ;;  %7537 = vst [vmem:[#allocation74_spill] sm:$0xff] %v7098_v36  ;;  %v5605_v47 = vor.u32 %v6033_v52, %v5602_v34  ;;  %v6038_v52 = vld [vmem:[#allocation2 + $0xe8] sm:$0xf0]  ;;  %v5200_v61 = vld [vmem:[#allocation2 + $0x20] sm:$0xf] }
 0x513   : > { %2405 = vmatmul.bf16.gmra.mxu3 %v5029_v0  ;;  %v5609_v0 = vor.u32 %v6035_v5, %v5608_v1  ;;  %v5612_v5 = vld [vmem:[#allocation2 + $0xd8] sm:$0xf] }
 0x514   : > { %v3245_v13 = vpop.f32.mrf.mxu2 }
 0x515   : > { %v7094_v40 = vadd.f32 %v3245_v13, %v3156_v7  ;;  %v3158_v51 = vpop.f32.mrf.mxu1  ;;  %v5041_v13 = vor.u32 %v5916_v19, %v5038_v46  ;;  %v5945_v19 = vld [vmem:[#allocation2 + $0x28] sm:$0xf0] }
 0x516   : > { %v7096_v59 = vpop.f32.mrf.mxu3 }
 0x517   : > { %7535 = vst [vmem:[#allocation72_spill] sm:$0xff] %v7094_v40  ;;  %v7104_v40 = vpop.f32.mrf.mxu0 }
 0x518   : > { %7536 = vst [vmem:[#allocation73_spill] sm:$0xff] %v7096_v59  ;;  %v6036_v59 = vld [vmem:[#allocation2 + $0xdc] sm:$0xf] }
 0x519   : > { %7540 = vst [vmem:[#allocation77_spill] sm:$0xff] %v7104_v40  ;;  %v5626_v40 = vld [vmem:[#allocation2 + $0xfc] sm:$0xf0] }
 0x51c   : > { %v3247_v54 = vpop.f32.mrf.mxu2 }
 0x51d   : > { %v7100_v30 = vadd.f32 %v3247_v54, %v3158_v51  ;;  %v3161_v7 = vpop.f32.mrf.mxu1 }
 0x51e   : > { %v7102_v17 = vpop.f32.mrf.mxu3 }
 0x51f   : > { %7538 = vst [vmem:[#allocation75_spill] sm:$0xff] %v7100_v30  ;;  %v6037_v30 = vld [vmem:[#allocation2 + $0xe0] sm:$0xf0]  ;;  %v7110_v34 = vpop.f32.mrf.mxu0 }
 0x520   : > { %7539 = vst [vmem:[#allocation76_spill] sm:$0xff] %v7102_v17  ;;  %3996 = vmatmul.bf16.gmra.mxu0 %v5601_v35  ;;  %4085 = vmatmul.bf16.gmra.mxu1 %v5605_v47  ;;  %v5614_v17 = vld [vmem:[#allocation2 + $0xe4] sm:$0xf0]  ;;  %v5621_v35 = vor.u32 %v6038_v52, %v5620_v11  ;;  %v5201_v47 = vor.u32 %v5945_v19, %v5200_v61  ;;  %v5624_v52 = vld [vmem:[#allocation2 + $0xf0] sm:$0xf] }
 0x521   : > { %4174 = vmatmul.bf16.gmra.mxu2 %v5609_v0  ;;  %7543 = vst [vmem:[#allocation80_spill] sm:$0xff] %v7110_v34  ;;  %v5948_v61 = vld [vmem:[#allocation2 + $0x40] sm:$0xf0] }
 0x523   : > { %2410 = vmatmul.bf16.gmra.mxu3 %v5041_v13 }
 0x524   : > { %v3250_v36 = vpop.f32.mrf.mxu2 }
 0x525   : > { %v7106_v18 = vadd.f32 %v3250_v36, %v3161_v7  ;;  %v3163_v54 = vpop.f32.mrf.mxu1  ;;  %v5613_v36 = vor.u32 %v6037_v30, %v5612_v5  ;;  %v5617_v7 = vor.u32 %v6036_v59, %v5614_v17  ;;  %v5632_v59 = vld [vmem:[#allocation2 + $0xf8] sm:$0xf]  ;;  %v6041_v17 = vld [vmem:[#allocation2 + $0x100] sm:$0xf0] }
 0x526   : > { %v7108_v51 = vpop.f32.mrf.mxu3  ;;  %v5212_v5 = vld [vmem:[#allocation2 + $0x38] sm:$0xf] }
 0x527   : > { %7541 = vst [vmem:[#allocation78_spill] sm:$0xff] %v7106_v18 }
 0x528   : > { %7542 = vst [vmem:[#allocation79_spill] sm:$0xff] %v7108_v51  ;;  %v5236_v51 = vld [vmem:[#allocation2 + $0x68] sm:$0xf] }
 0x52c   : > { %v3252_v57 = vpop.f32.mrf.mxu2 }
 0x52d   : > { %v7112_v1 = vadd.f32 %v3252_v57, %v3163_v54  ;;  %v3166_v0 = vpop.f32.mrf.mxu1  ;;  %v7120_v57 = vpop.f32.mrf.mxu0  ;;  %v6040_v54 = vld [vmem:[#allocation2 + $0xf8] sm:$0xf0] }
 0x52e   : > { %v7114_v46 = vpop.f32.mrf.mxu3  ;;  %7548 = vst [vmem:[#allocation85_spill] sm:$0xff] %v7120_v57  ;;  %v5644_v57 = vld [vmem:[#allocation2 + $0x110] sm:$0xf] }
 0x52f   : > { %7544 = vst [vmem:[#allocation81_spill] sm:$0xff] %v7112_v1  ;;  %v6039_v1 = vld [vmem:[#allocation2 + $0xf4] sm:$0xf] }
 0x530   : > { %7545 = vst [vmem:[#allocation82_spill] sm:$0xff] %v7114_v46  ;;  %4001 = vmatmul.bf16.gmra.mxu0 %v5613_v36  ;;  %4090 = vmatmul.bf16.gmra.mxu1 %v5617_v7  ;;  %v5625_v36 = vor.u32 %v6040_v54, %v5624_v52  ;;  %v5629_v7 = vor.u32 %v6039_v1, %v5626_v40  ;;  %v5224_v54 = vld [vmem:[#allocation2 + $0x50] sm:$0xf]  ;;  %v5951_v40 = vld [vmem:[#allocation2 + $0x58] sm:$0xf0] }
 0x531   : > { %4179 = vmatmul.bf16.gmra.mxu2 %v5621_v35  ;;  %v5633_v35 = vor.u32 %v6041_v17, %v5632_v59 }
 0x533   : > { %3268 = vmatmul.bf16.vlgmr.msra.gmra.mxu3 %v5201_v47  ;;  %v5213_v47 = vor.u32 %v5948_v61, %v5212_v5  ;;  %v5225_v5 = vor.u32 %v5951_v40, %v5224_v54 }
 0x534   : > { %v3255_v13 = vpop.f32.mrf.mxu2 }
 0x535   : > { %v7116_v18 = vadd.f32 %v3255_v13, %v3166_v0  ;;  %v3168_v46 = vpop.f32.mrf.mxu1  ;;  %v7126_v0 = vpop.f32.mrf.mxu0 }
 0x536   : > { %v7118_v34 = vpop.f32.mrf.mxu3  ;;  %7551 = vst [vmem:[#allocation88_spill] sm:$0xff] %v7126_v0  ;;  %v6047_v0 = vld [vmem:[#allocation2 + $0x130] sm:$0xf0] }
 0x537   : > { %7546 = vst [vmem:[#allocation83_spill] sm:$0xff] %v7116_v18 }
 0x538   : > { %7547 = vst [vmem:[#allocation84_spill] sm:$0xff] %v7118_v34  ;;  %v6044_v34 = vld [vmem:[#allocation2 + $0x118] sm:$0xf0] }
 0x539   : > { %v5645_v52 = vor.u32 %v6044_v34, %v5644_v57 }
 0x53c   : > { %v3257_v30 = vpop.f32.mrf.mxu2 }
 0x53d   : > { %v7122_v11 = vadd.f32 %v3257_v30, %v3168_v46  ;;  %v7130_v18 = vpop.f32.mrf.mxu0  ;;  %v6043_v46 = vld [vmem:[#allocation2 + $0x110] sm:$0xf0]  ;;  %v6042_v30 = vld [vmem:[#allocation2 + $0x10c] sm:$0xf] }
 0x53e   : > { %v7124_v19 = vpop.f32.mrf.mxu3  ;;  %7553 = vst [vmem:[#allocation90_spill] sm:$0xff] %v7130_v18  ;;  %v5656_v18 = vld [vmem:[#allocation2 + $0x128] sm:$0xf] }
 0x53f   : > { %7549 = vst [vmem:[#allocation86_spill] sm:$0xff] %v7122_v11  ;;  %v5638_v11 = vld [vmem:[#allocation2 + $0x114] sm:$0xf0] }
 0x540   : > { %7550 = vst [vmem:[#allocation87_spill] sm:$0xff] %v7124_v19  ;;  %4006 = vmatmul.bf16.gmra.mxu0 %v5625_v36  ;;  %4095 = vmatmul.bf16.gmra.mxu1 %v5629_v7  ;;  %v5636_v19 = vld [vmem:[#allocation2 + $0x108] sm:$0xf]  ;;  %v5641_v17 = vor.u32 %v6042_v30, %v5638_v11  ;;  %v6046_v7 = vld [vmem:[#allocation2 + $0x128] sm:$0xf0] }
 0x541   : > { %4184 = vmatmul.bf16.gmra.mxu2 %v5633_v35  ;;  %v5637_v59 = vor.u32 %v6043_v46, %v5636_v19  ;;  %v6045_v35 = vld [vmem:[#allocation2 + $0x124] sm:$0xf]  ;;  %v5657_v46 = vor.u32 %v6047_v0, %v5656_v18  ;;  %v5248_v18 = vld [vmem:[#allocation2 + $0x80] sm:$0xf]  ;;  %v5957_v0 = vld [vmem:[#allocation2 + $0x88] sm:$0xf0] }
 0x543   : > { %3273 = vmatmul.bf16.gmra.mxu3 %v5213_v47  ;;  %v5650_v47 = vld [vmem:[#allocation2 + $0x12c] sm:$0xf0] }
 0x544   : > { %v5653_v57 = vor.u32 %v6045_v35, %v5650_v47  ;;  %v6050_v35 = vld [vmem:[#allocation2 + $0x148] sm:$0xf0]  ;;  %v5660_v47 = vld [vmem:[#allocation2 + $0x138] sm:$0xf] }
 0x545   : > { %v7134_v61 = vpop.f32.mrf.mxu0 }
 0x546   : > { %v7128_v13 = vpop.f32.mrf.mxu3  ;;  %7555 = vst [vmem:[#allocation92_spill] sm:$0xff] %v7134_v61 }
 0x547   : > { %7552 = vst [vmem:[#allocation89_spill] sm:$0xff] %v7128_v13  ;;  %v5648_v13 = vld [vmem:[#allocation2 + $0x120] sm:$0xf] }
 0x548   : > { %v5649_v34 = vor.u32 %v6046_v7, %v5648_v13  ;;  %v5662_v13 = vld [vmem:[#allocation2 + $0x144] sm:$0xf0]  ;;  %v5668_v7 = vld [vmem:[#allocation2 + $0x140] sm:$0xf] }
 0x54d   : > { %v7140_v11 = vpop.f32.mrf.mxu0 }
 0x54e   : > { %v7132_v1 = vpop.f32.mrf.mxu3  ;;  %7558 = vst [vmem:[#allocation95_spill] sm:$0xff] %v7140_v11 }
 0x54f   : > { %7554 = vst [vmem:[#allocation91_spill] sm:$0xff] %v7132_v1  ;;  %v5954_v1 = vld [vmem:[#allocation2 + $0x70] sm:$0xf0] }
 0x550   : > { %4011 = vmatmul.bf16.gmra.mxu0 %v5637_v59  ;;  %4100 = vmatmul.bf16.gmra.mxu1 %v5641_v17  ;;  %v5237_v30 = vor.u32 %v5954_v1, %v5236_v51  ;;  %v7146_v59 = vpop.f32.mrf.mxu1  ;;  %v7148_v17 = vpop.f32.mrf.mxu2 }
 0x551   : > { %4189 = vmatmul.bf16.gmra.mxu2 %v5645_v52  ;;  %v6049_v52 = vld [vmem:[#allocation2 + $0x140] sm:$0xf0] }
 0x552   : > { %v5661_v51 = vor.u32 %v6049_v52, %v5660_v47  ;;  %v6053_v52 = vld [vmem:[#allocation2 + $0x160] sm:$0xf0] }
 0x553   : > { %3278 = vmatmul.bf16.gmra.mxu3 %v5225_v5  ;;  %v6048_v5 = vld [vmem:[#allocation2 + $0x13c] sm:$0xf] }
 0x554   : > { %v5665_v1 = vor.u32 %v6048_v5, %v5662_v13  ;;  %v5672_v13 = vld [vmem:[#allocation2 + $0x150] sm:$0xf] }
 0x555   : > { %v7144_v40 = vpop.f32.mrf.mxu0 }
 0x556   : > { %v7136_v36 = vpop.f32.mrf.mxu3 }
 0x557   : > { %7556 = vst [vmem:[#allocation93_spill] sm:$0xff] %v7136_v36  ;;  %v6051_v36 = vld [vmem:[#allocation2 + $0x154] sm:$0xf] }
 0x558   : > { %v7154_v11 = vpop.f32.mrf.mxu1  ;;  %v7156_v61 = vpop.f32.mrf.mxu2 }
 0x55e   : > { %v7138_v19 = vpop.f32.mrf.mxu3 }
 0x55f   : > { %7557 = vst [vmem:[#allocation94_spill] sm:$0xff] %v7138_v19  ;;  %v6052_v19 = vld [vmem:[#allocation2 + $0x158] sm:$0xf0] }
 0x560   : > { %4016 = vmatmul.bf16.gmra.mxu0 %v5649_v34  ;;  %4105 = vmatmul.bf16.gmra.mxu1 %v5653_v57  ;;  %v5669_v57 = vor.u32 %v6050_v35, %v5668_v7  ;;  %v5260_v7 = vld [vmem:[#allocation2 + $0x98] sm:$0xf]  ;;  %v5960_v35 = vld [vmem:[#allocation2 + $0xa0] sm:$0xf0]  ;;  %v7162_v47 = vpop.f32.mrf.mxu1 }
 0x561   : > { %4194 = vmatmul.bf16.gmra.mxu2 %v5657_v46  ;;  %v5249_v46 = vor.u32 %v5957_v0, %v5248_v18  ;;  %v5673_v0 = vor.u32 %v6052_v19, %v5672_v13  ;;  %v5686_v19 = vld [vmem:[#allocation2 + $0x174] sm:$0xf0]  ;;  %v5684_v13 = vld [vmem:[#allocation2 + $0x168] sm:$0xf] }
 0x563   : > { %3283 = vmatmul.bf16.gmra.mxu3 %v5237_v30  ;;  %v7152_v30 = vpop.f32.mrf.mxu0 }
 0x566   : > { %v7142_v54 = vpop.f32.mrf.mxu3 }
 0x567   : > { %7559 = vst [vmem:[#allocation96_spill] sm:$0xff] %v7142_v54 }
 0x568   : > { %v7172_v42 = vpop.f32.mrf.mxu1 }
 0x56b   : > { %v7160_v5 = vpop.f32.mrf.mxu0 }
 0x56e   : > { %v7150_v34 = vpop.f32.mrf.mxu3 }
 0x56f   : > { %7560 = vst [vmem:[#allocation97_spill] sm:$0xff] %v7150_v34  ;;  %v5680_v34 = vld [vmem:[#allocation2 + $0x158] sm:$0xf] }
 0x570   : > { %4021 = vmatmul.bf16.gmra.mxu0 %v5661_v51  ;;  %4110 = vmatmul.bf16.gmra.mxu1 %v5665_v1  ;;  %v5677_v51 = vor.u32 %v6051_v36, %v5674_v12  ;;  %v7166_v1 = vpop.f32.mrf.mxu2  ;;  %v5692_v12 = vld [vmem:[#allocation2 + $0x170] sm:$0xf]  ;;  %v6056_v36 = vld [vmem:[#allocation2 + $0x178] sm:$0xf0] }
 0x571   : > { %4199 = vmatmul.bf16.gmra.mxu2 %v5669_v57  ;;  %v5681_v57 = vor.u32 %v6053_v52, %v5680_v34  ;;  %v5272_v34 = vld [vmem:[#allocation2 + $0xb0] sm:$0xf]  ;;  %v5963_v52 = vld [vmem:[#allocation2 + $0xb8] sm:$0xf0] }
 0x573   : > { %3288 = vmatmul.bf16.gmra.mxu3 %v5249_v46  ;;  %v5261_v46 = vor.u32 %v5960_v35, %v5260_v7  ;;  %v7170_v39 = vpop.f32.mrf.mxu0  ;;  %v5685_v7 = vor.u32 %v6055_v6, %v5684_v13  ;;  %v6057_v6 = vld [vmem:[#allocation2 + $0x184] sm:$0xf] }
 0x576   : > { %v7158_v54 = vpop.f32.mrf.mxu3 }
 0x577   : > { %7561 = vst [vmem:[#allocation98_spill] sm:$0xff] %v7158_v54 }
 0x578   : > { %v7174_v22 = vpop.f32.mrf.mxu2 }
 0x57e   : > { %v7164_v18 = vpop.f32.mrf.mxu3 }
 0x57f   : > { %7562 = vst [vmem:[#allocation99_spill] sm:$0xff] %v7164_v18  ;;  %v6054_v18 = vld [vmem:[#allocation2 + $0x16c] sm:$0xf] }
 0x580   : > { %4026 = vmatmul.bf16.gmra.mxu0 %v5673_v0  ;;  %4115 = vmatmul.bf16.gmra.mxu1 %v5677_v51  ;;  %v5689_v35 = vor.u32 %v6054_v18, %v5686_v19  ;;  %v5693_v51 = vor.u32 %v6056_v36, %v5692_v12  ;;  %v7182_v23 = vpop.f32.mrf.mxu2  ;;  %v5698_v18 = vld [vmem:[#allocation2 + $0x18c] sm:$0xf0]  ;;  %v5704_v12 = vld [vmem:[#allocation2 + $0x188] sm:$0xf]  ;;  %v6059_v36 = vld [vmem:[#allocation2 + $0x190] sm:$0xf0] }
 0x581   : > { %4204 = vmatmul.bf16.gmra.mxu2 %v5681_v57  ;;  %v5273_v57 = vor.u32 %v5963_v52, %v5272_v34  ;;  %v5284_v34 = vld [vmem:[#allocation2 + $0xc8] sm:$0xf]  ;;  %v5966_v52 = vld [vmem:[#allocation2 + $0xd0] sm:$0xf0] }
 0x583   : > { %3293 = vmatmul.bf16.gmra.mxu3 %v5261_v46  ;;  %v7178_v46 = vpop.f32.mrf.mxu0 }
 0x586   : > { %v7168_v54 = vpop.f32.mrf.mxu3 }
 0x587   : > { %7563 = vst [vmem:[#allocation100_spill] sm:$0xff] %v7168_v54  ;;  %v7180_v54 = vpop.f32.mrf.mxu1 }
 0x588   : > { %v7190_v13 = vpop.f32.mrf.mxu2 }
 0x58b   : > { %v7186_v25 = vpop.f32.mrf.mxu0 }
 0x58e   : > { %v7176_v0 = vpop.f32.mrf.mxu3 }
 0x58f   : > { %7564 = vst [vmem:[#allocation101_spill] sm:$0xff] %v7176_v0  ;;  %v6058_v0 = vld [vmem:[#allocation2 + $0x188] sm:$0xf0]  ;;  %v7188_v19 = vpop.f32.mrf.mxu1 }
 0x590   : > { %4031 = vmatmul.bf16.gmra.mxu0 %v5685_v7  ;;  %4120 = vmatmul.bf16.gmra.mxu1 %v5689_v35  ;;  %v5697_v35 = vor.u32 %v6058_v0, %v5696_v62  ;;  %v7200_v38 = vpop.f32.mrf.mxu2  ;;  %v5716_v62 = vld [vmem:[#allocation2 + $0x1a0] sm:$0xf]  ;;  %v6062_v0 = vld [vmem:[#allocation2 + $0x1a8] sm:$0xf0] }
 0x591   : > { %4209 = vmatmul.bf16.gmra.mxu2 %v5693_v51  ;;  %v5701_v51 = vor.u32 %v6057_v6, %v5698_v18  ;;  %7568 = vst [vmem:[#allocation105_spill] sm:$0xff] %v7200_v38  ;;  %v5296_v6 = vld [vmem:[#allocation2 + $0xe0] sm:$0xf]  ;;  %v5969_v18 = vld [vmem:[#allocation2 + $0xe8] sm:$0xf0] }
 0x593   : > { %3298 = vmatmul.bf16.gmra.mxu3 %v5273_v57  ;;  %v5705_v57 = vor.u32 %v6059_v36, %v5704_v12  ;;  %v7194_v9 = vpop.f32.mrf.mxu0  ;;  %v5709_v36 = vor.u32 %v6061_v24, %v5708_v58  ;;  %v4057_v58 = vadd.f32 %v7146_v59, %v7144_v40 }
 0x595   : > { %v4146_v24 = vadd.f32 %v7148_v17, %v4057_v58 }
 0x596   : > { %v7184_v21 = vpop.f32.mrf.mxu3 }
 0x597   : > { %7565 = vst [vmem:[#allocation102_spill] sm:$0xff] %v7184_v21  ;;  %v5285_v21 = vor.u32 %v5966_v52, %v5284_v34  ;;  %v7196_v60 = vpop.f32.mrf.mxu1  ;;  %v5717_v34 = vor.u32 %v6062_v0, %v5716_v62  ;;  %v2339_v62 = vadd.f32 %v7028_v63, %v6806_v41  ;;  %v2342_v41 = vadd.f32 %v7034_v14, %v6808_v53 }
 0x598   : > { %v2344_v53 = vadd.f32 %v7040_v15, %v6810_v2 }
 0x599   : > { %v2431_v17 = vadd.f32 %v6880_v56, %v2342_v41 }
 0x59a   : > { %v2433_v56 = vadd.f32 %v6889_v10, %v2344_v53  ;;  %v5981_v53 = vld [vmem:[#allocation2 + $0x148] sm:$0xf0] }
 0x59b   : > { %v7204_v52 = vpop.f32.mrf.mxu0 }
 0x59e   : > { %v7192_v7 = vpop.f32.mrf.mxu3 }
 0x59f   : > { %7566 = vst [vmem:[#allocation103_spill] sm:$0xff] %v7192_v7  ;;  %v5710_v7 = vld [vmem:[#allocation2 + $0x1a4] sm:$0xf0] }
 0x5a0   : > { %4036 = vmatmul.bf16.gmra.mxu0 %v5697_v35  ;;  %4125 = vmatmul.bf16.gmra.mxu1 %v5701_v51  ;;  %v7206_v35 = vpop.f32.mrf.mxu1  ;;  %v5297_v51 = vor.u32 %v5969_v18, %v5296_v6  ;;  %v5308_v6 = vld [vmem:[#allocation2 + $0xf8] sm:$0xf]  ;;  %v5972_v18 = vld [vmem:[#allocation2 + $0x100] sm:$0xf0] }
 0x5a1   : > { %4214 = vmatmul.bf16.gmra.mxu2 %v5705_v57  ;;  %v7208_v57 = vpop.f32.mrf.mxu2 }
 0x5a3   : > { %3303 = vmatmul.bf16.gmra.mxu3 %v5285_v21  ;;  %v5713_v21 = vor.u32 %v6060_v4, %v5710_v7  ;;  %v7226_v40 = vpop.f32.mrf.mxu0 }
 0x5a6   : > { %v7198_v32 = vpop.f32.mrf.mxu3 }
 0x5a7   : > { %7567 = vst [vmem:[#allocation104_spill] sm:$0xff] %v7198_v32  ;;  %v2337_v32 = vadd.f32 %v7024_v48, %v6804_v27  ;;  %v2428_v27 = vadd.f32 %v6874_v44, %v2339_v62  ;;  %v5309_v48 = vor.u32 %v5972_v18, %v5308_v6 }
 0x5a8   : > { %v7228_v59 = vpop.f32.mrf.mxu1 }
 0x5ae   : > { %v7202_v12 = vpop.f32.mrf.mxu3 }
 0x5af   : > { %7569 = vst [vmem:[#allocation106_spill] sm:$0xff] %v7202_v12  ;;  %v2426_v12 = vadd.f32 %v6868_v26, %v2337_v32  ;;  %v4059_v26 = vadd.f32 %v7154_v11, %v7152_v30 }
 0x5b0   : > { %4041 = vmatmul.bf16.gmra.mxu0 %v5709_v36  ;;  %4130 = vmatmul.bf16.gmra.mxu1 %v5713_v21  ;;  %v5320_v21 = vld [vmem:[#allocation2 + $0x110] sm:$0xf]  ;;  %v7245_v58 = vpop.f32.mrf.mxu1 }
 0x5b1   : > { %4219 = vmatmul.bf16.gmra.mxu2 %v5717_v34  ;;  %v5975_v34 = vld [vmem:[#allocation2 + $0x118] sm:$0xf0] }
 0x5b3   : > { %3308 = vmatmul.bf16.gmra.mxu3 %v5297_v51 }
 0x5b6   : > { %v3269_v38 = vpop.f32.mrf.mxu3 }
 0x5b7   : > { %v3270_v4 = vadd.f32 %v3269_v38, %v6872_v43  ;;  %v4148_v43 = vadd.f32 %v7156_v61, %v4059_v26  ;;  %v7234_v61 = vpop.f32.mrf.mxu2 }
 0x5b8   : > { %v7259_v6 = vpop.f32.mrf.mxu1 }
 0x5b9   : > { %v3349_v7 = vadd.f32 %v3270_v4, %v2426_v12 }
 0x5bb   : > { %v4225_v0 = vadd.f32 %v4146_v24, %v3349_v7  ;;  %v2347_v24 = vadd.f32 %v7049_v20, %v6815_v16  ;;  %v2349_v16 = vadd.f32 %v7055_v37, %v6817_v31  ;;  %v2352_v31 = vadd.f32 %v7059_v33, %v6819_v45  ;;  %v7573_v45 = vld [vmem:[#allocation4_spill] sm:$0xff]  ;;  %v7574_v33 = vld [vmem:[#allocation59_spill] sm:$0xff] }
 0x5bd   : > { %4321 = vxpose.xlu0.b32.start [1/16] %v4225_v0, 128 }
 0x5be   : > { %v3271_v36 = vpop.f32.mrf.mxu3 }
 0x5bf   : > { %v3272_v32 = vadd.f32 %v3271_v36, %v6878_v55  ;;  %v4062_v55 = vadd.f32 %v7162_v47, %v7160_v5  ;;  %v4064_v5 = vadd.f32 %v7172_v42, %v7170_v39  ;;  %v7242_v47 = vpop.f32.mrf.mxu0  ;;  %v7248_v15 = vpop.f32.mrf.mxu2  ;;  %v2436_v39 = vadd.f32 %v6904_v29, %v2347_v24  ;;  %v5332_v29 = vld [vmem:[#allocation2 + $0x128] sm:$0xf]  ;;  %v5978_v36 = vld [vmem:[#allocation2 + $0x130] sm:$0xf0]  ;;  %v7578_v24 = vld [vmem:[#allocation62_spill] sm:$0xff] }
 0x5c1   : > { %v3350_v38 = vadd.f32 %v3272_v32, %v2428_v27  ;;  %v4151_v30 = vadd.f32 %v7166_v1, %v4062_v55  ;;  %v5321_v1 = vor.u32 %v5975_v34, %v5320_v21  ;;  %v4153_v4 = vadd.f32 %v7174_v22, %v4064_v5  ;;  %v7575_v34 = vld [vmem:[#allocation23_spill] sm:$0xff] }
 0x5c2   : > { %v2354_v55 = vadd.f32 %v7574_v33, %v7573_v45  ;;  %v7587_v33 = vld [vmem:[#allocation32_spill] sm:$0xff] }
 0x5c3   : > { %3313 = vmatmul.bf16.gmra.mxu3 %v5309_v48  ;;  %v4226_v63 = vadd.f32 %v4148_v43, %v3350_v38  ;;  %v7274_v43 = vpop.f32.mrf.mxu1 }
 0x5c5   : > { %4322 = vxpose.xlu0.b32.cont [2/16] %v4226_v63, 128  ;;  %v7572_v63 = vld [vmem:[#allocation105_spill] sm:$0xff] }
 0x5c6   : > { %v3274_v44 = vpop.f32.mrf.mxu3 }
 0x5c7   : > { %v3275_v11 = vadd.f32 %v3274_v44, %v6887_v8  ;;  %v7257_v22 = vpop.f32.mrf.mxu0  ;;  %v7263_v18 = vpop.f32.mrf.mxu2 }
 0x5c9   : > { %v3351_v12 = vadd.f32 %v3275_v11, %v2431_v17 }
 0x5cb   : > { %v4227_v14 = vadd.f32 %v4151_v30, %v3351_v12  ;;  %v5344_v12 = vld [vmem:[#allocation2 + $0x140] sm:$0xf] }
 0x5cd   : > { %4323 = vxpose.xlu0.b32.cont [3/16] %v4227_v14, 128  ;;  %v7287_v14 = vpop.f32.mrf.mxu1 }
 0x5ce   : > { %v3276_v51 = vpop.f32.mrf.mxu3 }
 0x5cf   : > { %v3277_v8 = vadd.f32 %v3276_v51, %v6902_v28  ;;  %v4067_v28 = vadd.f32 %v7180_v54, %v7178_v46  ;;  %v2438_v54 = vadd.f32 %v6910_v50, %v2349_v16  ;;  %v5333_v46 = vor.u32 %v5978_v36, %v5332_v29  ;;  %v7272_v37 = vpop.f32.mrf.mxu0  ;;  %v7276_v50 = vpop.f32.mrf.mxu2  ;;  %v7581_v36 = vld [vmem:[#allocation6_spill] sm:$0xff] }
 0x5d0   : > { %v2443_v51 = vadd.f32 %v7575_v34, %v2354_v55 }
 0x5d1   : > { %v3352_v2 = vadd.f32 %v3277_v8, %v2433_v56  ;;  %v4156_v62 = vadd.f32 %v7182_v23, %v4067_v28  ;;  %v4069_v23 = vadd.f32 %v7188_v19, %v7186_v25  ;;  %v7570_v25 = vld [vmem:[#allocation20_spill] sm:$0xff]  ;;  %v5345_v8 = vor.u32 %v5981_v53, %v5344_v12  ;;  %v7579_v28 = vld [vmem:[#allocation26_spill] sm:$0xff] }
 0x5d2   : > { %v2441_v19 = vadd.f32 %v7570_v25, %v2352_v31  ;;  %v7584_v31 = vld [vmem:[#allocation31_spill] sm:$0xff]  ;;  %v7589_v53 = vld [vmem:[#allocation8_spill] sm:$0xff] }
 0x5d3   : > { %3318 = vmatmul.bf16.gmra.mxu3 %v5321_v1  ;;  %v4228_v10 = vadd.f32 %v4153_v4, %v3352_v2  ;;  %v4158_v26 = vadd.f32 %v7190_v13, %v4069_v23  ;;  %v7571_v13 = vld [vmem:[#allocation22_spill] sm:$0xff]  ;;  %v7577_v2 = vld [vmem:[#allocation5_spill] sm:$0xff] }
 0x5d5   : > { %4324 = vxpose.xlu0.b32.cont [4/16] %v4228_v10, 128  ;;  %v2357_v10 = vadd.f32 %v7578_v24, %v7577_v2  ;;  %v7304_v16 = vpop.f32.mrf.mxu1  ;;  %v7591_v2 = vld [vmem:[#allocation36_spill] sm:$0xff] }
 0x5d6   : > { %v3279_v7 = vpop.f32.mrf.mxu3 }
 0x5d7   : > { %v3280_v42 = vadd.f32 %v3279_v7, %v6908_v49  ;;  %v7285_v30 = vpop.f32.mrf.mxu0  ;;  %v7293_v5 = vpop.f32.mrf.mxu2 }
 0x5d9   : > { %v3353_v0 = vadd.f32 %v3280_v42, %v2436_v39  ;;  %v2446_v42 = vadd.f32 %v7579_v28, %v2357_v10  ;;  %v7593_v28 = vld [vmem:[#allocation9_spill] sm:$0xff] }
 0x5db   : > { %v4229_v20 = vadd.f32 %v4156_v62, %v3353_v0  ;;  %v7580_v62 = vld [vmem:[#allocation28_spill] sm:$0xff] }
 0x5dd   : > { %4325 = vxpose.xlu0.b32.cont [5/16] %v4229_v20, 128 }
 0x5de   : > { %v3281_v27 = vpop.f32.mrf.mxu3 }
 0x5df   : > { %v3282_v49 = vadd.f32 %v3281_v27, %v6914_v3  ;;  %v4072_v3 = vadd.f32 %v7196_v60, %v7194_v9  ;;  %v4074_v9 = vadd.f32 %v7206_v35, %v7204_v52  ;;  %v7576_v60 = vld [vmem:[#allocation25_spill] sm:$0xff]  ;;  %v4077_v52 = vadd.f32 %v7228_v59, %v7226_v40  ;;  %v7301_v35 = vpop.f32.mrf.mxu0  ;;  %v7307_v29 = vpop.f32.mrf.mxu2 }
 0x5e0   : > { %v7582_v27 = vld [vmem:[#allocation65_spill] sm:$0xff] }
 0x5e1   : > { %v3354_v32 = vadd.f32 %v3282_v49, %v2438_v54  ;;  %v4161_v44 = vadd.f32 %v7572_v63, %v4072_v3  ;;  %v4163_v1 = vadd.f32 %v7208_v57, %v4074_v9  ;;  %v4166_v57 = vadd.f32 %v7234_v61, %v4077_v52  ;;  %v5356_v49 = vld [vmem:[#allocation2 + $0x158] sm:$0xf]  ;;  %v4091_v3 = vpop.f32.mrf.mxu1 }
 0x5e2   : > { %v2359_v54 = vadd.f32 %v7582_v27, %v7581_v36  ;;  %v7583_v40 = vld [vmem:[#allocation29_spill] sm:$0xff]  ;;  %v7595_v36 = vld [vmem:[#allocation39_spill] sm:$0xff] }
 0x5e3   : > { %3323 = vmatmul.bf16.gmra.mxu3 %v5333_v46  ;;  %v4230_v48 = vadd.f32 %v4158_v26, %v3354_v32  ;;  %v5984_v46 = vld [vmem:[#allocation2 + $0x160] sm:$0xf0]  ;;  %v4079_v32 = vadd.f32 %v7245_v58, %v7242_v47  ;;  %v4082_v47 = vadd.f32 %v7259_v6, %v7257_v22  ;;  %v4084_v22 = vadd.f32 %v7274_v43, %v7272_v37  ;;  %v7592_v6 = vld [vmem:[#allocation37_spill] sm:$0xff]  ;;  %v7596_v43 = vld [vmem:[#allocation40_spill] sm:$0xff] }
 0x5e4   : > { %v2448_v59 = vadd.f32 %v7583_v40, %v2359_v54  ;;  %v7588_v58 = vld [vmem:[#allocation34_spill] sm:$0xff]  ;;  %v4087_v37 = vadd.f32 %v7287_v14, %v7285_v30  ;;  %v7600_v14 = vld [vmem:[#allocation43_spill] sm:$0xff] }
 0x5e5   : > { %4326 = vxpose.xlu0.b32.cont [6/16] %v4230_v48, 128  ;;  %v4168_v61 = vadd.f32 %v7248_v15, %v4079_v32  ;;  %v4171_v15 = vadd.f32 %v7263_v18, %v4082_v47  ;;  %v5380_v32 = vld [vmem:[#allocation2 + $0x188] sm:$0xf] }
 0x5e6   : > { %v3284_v38 = vpop.f32.mrf.mxu3 }
 0x5e7   : > { %v3285_v41 = vadd.f32 %v3284_v38, %v7571_v13  ;;  %v5357_v38 = vor.u32 %v5984_v46, %v5356_v49  ;;  %v7316_v25 = vpop.f32.mrf.mxu0  ;;  %v7585_v13 = vld [vmem:[#allocation7_spill] sm:$0xff]  ;;  %v7597_v46 = vld [vmem:[#allocation10_spill] sm:$0xff] }
 0x5e9   : > { %v3355_v17 = vadd.f32 %v3285_v41, %v2441_v19  ;;  %v7586_v41 = vld [vmem:[#allocation68_spill] sm:$0xff] }
 0x5ea   : > { %v2362_v63 = vadd.f32 %v7586_v41, %v7585_v13 }
 0x5eb   : > { %v4231_v11 = vadd.f32 %v4161_v44, %v3355_v17  ;;  %v4180_v17 = vpop.f32.mrf.mxu2 }
 0x5ec   : > { %v2451_v55 = vadd.f32 %v7587_v33, %v2362_v63  ;;  %v7601_v33 = vld [vmem:[#allocation11_spill] sm:$0xff] }
 0x5ed   : > { %4327 = vxpose.xlu0.b32.cont [7/16] %v4231_v11, 128 }
 0x5ee   : > { %v3286_v21 = vpop.f32.mrf.mxu3 }
 0x5ef   : > { %v3287_v56 = vadd.f32 %v3286_v21, %v7576_v60  ;;  %v7590_v21 = vld [vmem:[#allocation70_spill] sm:$0xff]  ;;  %v4093_v60 = vpop.f32.mrf.mxu1 }
 0x5f0   : > { %v2364_v34 = vadd.f32 %v7590_v21, %v7589_v53 }
 0x5f1   : > { %v3356_v4 = vadd.f32 %v3287_v56, %v2443_v51  ;;  %v4004_v51 = vpop.f32.mrf.mxu0  ;;  %v5368_v56 = vld [vmem:[#allocation2 + $0x170] sm:$0xf] }
 0x5f2   : > { %v2453_v24 = vadd.f32 %v7591_v2, %v2364_v34 }
 0x5f3   : > { %3328 = vmatmul.bf16.gmra.mxu3 %v5345_v8  ;;  %v4232_v7 = vadd.f32 %v4163_v1, %v3356_v4  ;;  %v5987_v8 = vld [vmem:[#allocation2 + $0x178] sm:$0xf0]  ;;  %v4182_v1 = vpop.f32.mrf.mxu2 }
 0x5f4   : > { %v5369_v18 = vor.u32 %v5987_v8, %v5368_v56  ;;  %v7606_v8 = vld [vmem:[#allocation82_spill] sm:$0xff] }
 0x5f5   : > { %4328 = vxpose.xlu0.b32.cont [8/16] %v4232_v7, 128  ;;  %v4173_v7 = vadd.f32 %v7276_v50, %v4084_v22  ;;  %v4176_v50 = vadd.f32 %v7293_v5, %v4087_v37  ;;  %v7611_v37 = vld [vmem:[#allocation50_spill] sm:$0xff] }
 0x5f6   : > { %v3289_v39 = vpop.f32.mrf.mxu3 }
 0x5f7   : > { %v3290_v0 = vadd.f32 %v3289_v39, %v7580_v62 }
 0x5f9   : > { %v3357_v20 = vadd.f32 %v3290_v0, %v2446_v42  ;;  %v7594_v42 = vld [vmem:[#allocation73_spill] sm:$0xff]  ;;  %v4007_v0 = vpop.f32.mrf.mxu0 }
 0x5fa   : > { %v2367_v52 = vadd.f32 %v7594_v42, %v7593_v28  ;;  %v7610_v42 = vld [vmem:[#allocation84_spill] sm:$0xff] }
 0x5fb   : > { %v4233_v23 = vadd.f32 %v4166_v57, %v3357_v20  ;;  %v4096_v57 = vpop.f32.mrf.mxu1 }
 0x5fc   : > { %v2456_v27 = vadd.f32 %v7595_v36, %v2367_v52 }
 0x5fd   : > { %4329 = vxpose.xlu0.b32.cont [9/16] %v4233_v23, 128  ;;  %v4185_v23 = vpop.f32.mrf.mxu2 }
 0x5fe   : > { %v3291_v26 = vpop.f32.mrf.mxu3 }
 0x5ff   : > { %v3292_v48 = vadd.f32 %v3291_v26, %v7584_v31  ;;  %v7598_v26 = vld [vmem:[#allocation76_spill] sm:$0xff] }
 0x600   : > { %v2369_v40 = vadd.f32 %v7598_v26, %v7597_v46  ;;  %v5990_v31 = vld [vmem:[#allocation2 + $0x190] sm:$0xf0]  ;;  %v7614_v26 = vld [vmem:[#allocation87_spill] sm:$0xff] }
 0x601   : > { %v3358_v19 = vadd.f32 %v3292_v48, %v2448_v59  ;;  %v4009_v30 = vpop.f32.mrf.mxu0  ;;  %v5381_v63 = vor.u32 %v5990_v31, %v5380_v32 }
 0x603   : > { %3333 = vmatmul.bf16.gmra.mxu3 %v5357_v38  ;;  %v4234_v44 = vadd.f32 %v4168_v61, %v3358_v19  ;;  %v7599_v38 = vld [vmem:[#allocation42_spill] sm:$0xff]  ;;  %v4089_v19 = vadd.f32 %v7304_v16, %v7301_v35  ;;  %v4098_v41 = vpop.f32.mrf.mxu1  ;;  %v4092_v35 = vadd.f32 %v4091_v3, %v7316_v25  ;;  %v7609_v3 = vld [vmem:[#allocation13_spill] sm:$0xff] }
 0x604   : > { %v2458_v61 = vadd.f32 %v7599_v38, %v2369_v40  ;;  %v7604_v16 = vld [vmem:[#allocation46_spill] sm:$0xff] }
 0x605   : > { %4330 = vxpose.xlu0.b32.cont [10/16] %v4234_v44, 128  ;;  %v4178_v5 = vadd.f32 %v7307_v29, %v4089_v19  ;;  %v4181_v21 = vadd.f32 %v4180_v17, %v4092_v35  ;;  %v7605_v29 = vld [vmem:[#allocation12_spill] sm:$0xff]  ;;  %v2377_v17 = vadd.f32 %v7610_v42, %v7609_v3  ;;  %v7616_v19 = vld [vmem:[#allocation51_spill] sm:$0xff] }
 0x606   : > { %v3294_v45 = vpop.f32.mrf.mxu3  ;;  %v7627_v42 = vld [vmem:[#allocation60_spill] sm:$0xff] }
 0x607   : > { %v3295_v11 = vadd.f32 %v3294_v45, %v7588_v58  ;;  %v4187_v45 = vpop.f32.mrf.mxu2 }
 0x609   : > { %v3359_v12 = vadd.f32 %v3295_v11, %v2451_v55  ;;  %v7602_v55 = vld [vmem:[#allocation79_spill] sm:$0xff]  ;;  %v4012_v34 = vpop.f32.mrf.mxu0 }
 0x60a   : > { %v2372_v47 = vadd.f32 %v7602_v55, %v7601_v33  ;;  %v7619_v55 = vld [vmem:[#allocation54_spill] sm:$0xff] }
 0x60b   : > { %v4235_v9 = vadd.f32 %v4171_v15, %v3359_v12  ;;  %v7603_v15 = vld [vmem:[#allocation45_spill] sm:$0xff]  ;;  %v4101_v56 = vpop.f32.mrf.mxu1 }
 0x60c   : > { %v2461_v12 = vadd.f32 %v7603_v15, %v2372_v47  ;;  %v7620_v15 = vld [vmem:[#allocation53_spill] sm:$0xff] }
 0x60d   : > { %4331 = vxpose.xlu0.b32.cont [11/16] %v4235_v9, 128 }
 0x60e   : > { %v3296_v4 = vpop.f32.mrf.mxu3 }
 0x60f   : > { %v3297_v10 = vadd.f32 %v3296_v4, %v7592_v6  ;;  %v2374_v4 = vadd.f32 %v7606_v8, %v7605_v29  ;;  %v7607_v6 = vld [vmem:[#allocation48_spill] sm:$0xff]  ;;  %v7623_v8 = vld [vmem:[#allocation57_spill] sm:$0xff] }
 0x611   : > { %v3360_v39 = vadd.f32 %v3297_v10, %v2453_v24  ;;  %v4190_v24 = vpop.f32.mrf.mxu2  ;;  %v2463_v10 = vadd.f32 %v7607_v6, %v2374_v4  ;;  %v4014_v52 = vpop.f32.mrf.mxu0 }
 0x613   : > { %3338 = vmatmul.bf16.gmra.mxu3 %v5369_v18  ;;  %v4236_v62 = vadd.f32 %v4173_v7, %v3360_v39  ;;  %v4094_v18 = vadd.f32 %v4093_v60, %v4004_v51  ;;  %v7608_v7 = vld [vmem:[#allocation47_spill] sm:$0xff]  ;;  %v7613_v60 = vld [vmem:[#allocation14_spill] sm:$0xff] }
 0x615   : > { %4332 = vxpose.xlu0.b32.cont [12/16] %v4236_v62, 128  ;;  %v4183_v28 = vadd.f32 %v4182_v1, %v4094_v18  ;;  %v2379_v1 = vadd.f32 %v7614_v26, %v7613_v60  ;;  %v7631_v26 = vld [vmem:[#allocation63_spill] sm:$0xff] }
 0x616   : > { %v3299_v20 = vpop.f32.mrf.mxu3 }
 0x617   : > { %v3300_v54 = vadd.f32 %v3299_v20, %v7596_v43  ;;  %v4103_v20 = vpop.f32.mrf.mxu1  ;;  %v2466_v43 = vadd.f32 %v7611_v37, %v2377_v17 }
 0x619   : > { %v3361_v49 = vadd.f32 %v3300_v54, %v2456_v27  ;;  %v4192_v36 = vpop.f32.mrf.mxu2  ;;  %v4097_v54 = vadd.f32 %v4096_v57, %v4007_v0  ;;  %v7617_v57 = vld [vmem:[#allocation15_spill] sm:$0xff] }
 0x61b   : > { %v4237_v59 = vadd.f32 %v4176_v50, %v3361_v49  ;;  %v7612_v50 = vld [vmem:[#allocation49_spill] sm:$0xff]  ;;  %v4186_v46 = vadd.f32 %v4185_v23, %v4097_v54  ;;  %v7630_v54 = vld [vmem:[#allocation94_spill] sm:$0xff] }
 0x61d   : > { %4333 = vxpose.xlu0.b32.cont [13/16] %v4237_v59, 128  ;;  %v4017_v59 = vpop.f32.mrf.mxu0 }
 0x61e   : > { %v3301_v48 = vpop.f32.mrf.mxu3 }
 0x61f   : > { %v3302_v13 = vadd.f32 %v3301_v48, %v7600_v14  ;;  %v4106_v32 = vpop.f32.mrf.mxu1  ;;  %v7615_v48 = vld [vmem:[#allocation52_spill] sm:$0xff] }
 0x620   : > { %v2468_v38 = vadd.f32 %v7615_v48, %v2379_v1 }
 0x621   : > { %v3362_v44 = vadd.f32 %v3302_v13, %v2458_v61  ;;  %v4099_v61 = vadd.f32 %v4098_v41, %v4009_v30  ;;  %v4195_v13 = vpop.f32.mrf.mxu2 }
 0x623   : > { %3343 = vmatmul.bf16.gmra.mxu3 %v5381_v63  ;;  %v4238_v58 = vadd.f32 %v4178_v5, %v3362_v44  ;;  %v4188_v63 = vadd.f32 %v4187_v45, %v4099_v61  ;;  %v7618_v5 = vld [vmem:[#allocation89_spill] sm:$0xff]  ;;  %v7634_v61 = vld [vmem:[#allocation96_spill] sm:$0xff] }
 0x624   : > { %v2382_v23 = vadd.f32 %v7618_v5, %v7617_v57  ;;  %v7635_v57 = vld [vmem:[#allocation66_spill] sm:$0xff] }
 0x625   : > { %4334 = vxpose.xlu0.b32.cont [14/16] %v4238_v58, 128  ;;  %v4102_v58 = vadd.f32 %v4101_v56, %v4012_v34 }
 0x626   : > { %v3304_v11 = vpop.f32.mrf.mxu3  ;;  %v2471_v47 = vadd.f32 %v7619_v55, %v2382_v23 }
 0x627   : > { %v3305_v53 = vadd.f32 %v3304_v11, %v7604_v16  ;;  %v4019_v11 = vpop.f32.mrf.mxu0  ;;  %v4108_v35 = vpop.f32.mrf.mxu1  ;;  %v4191_v16 = vadd.f32 %v4190_v24, %v4102_v58 }
 0x629   : > { %v3363_v9 = vadd.f32 %v3305_v53, %v2461_v12  ;;  %v4197_v41 = vpop.f32.mrf.mxu2  ;;  %v7621_v53 = vld [vmem:[#allocation16_spill] sm:$0xff] }
 0x62b   : > { %v4239_v2 = vadd.f32 %v4181_v21, %v3363_v9  ;;  %v7622_v21 = vld [vmem:[#allocation91_spill] sm:$0xff] }
 0x62c   : > { %v2384_v45 = vadd.f32 %v7622_v21, %v7621_v53 }
 0x62d   : > { %4335 = vxpose.xlu0.b32.cont [15/16] %v4239_v2, 128  ;;  %v4104_v2 = vadd.f32 %v4103_v20, %v4014_v52  ;;  %v7629_v20 = vld [vmem:[#allocation18_spill] sm:$0xff] }
 0x62e   : > { %v3306_v22 = vpop.f32.mrf.mxu3  ;;  %v2473_v4 = vadd.f32 %v7623_v8, %v2384_v45  ;;  %v7640_v45 = vld [vmem:[#allocation64_spill] sm:$0xff] }
 0x62f   : > { %v3307_v39 = vadd.f32 %v3306_v22, %v7608_v7  ;;  %v7624_v22 = vld [vmem:[#allocation55_spill] sm:$0xff]  ;;  %v4022_v34 = vpop.f32.mrf.mxu0  ;;  %v4111_v18 = vpop.f32.mrf.mxu1  ;;  %v7625_v7 = vld [vmem:[#allocation17_spill] sm:$0xff] }
 0x630   : > { %v4112_v23 = vadd.f32 %v4111_v18, %v4022_v34  ;;  %v7643_v18 = vld [vmem:[#allocation74_spill] sm:$0xff] }
 0x631   : > { %v3364_v25 = vadd.f32 %v3307_v39, %v2463_v10  ;;  %v4193_v10 = vadd.f32 %v4192_v36, %v4104_v2  ;;  %v7626_v39 = vld [vmem:[#allocation93_spill] sm:$0xff]  ;;  %v2389_v36 = vadd.f32 %v7630_v54, %v7629_v20 }
 0x632   : > { %v2387_v24 = vadd.f32 %v7626_v39, %v7625_v7  ;;  %v7647_v54 = vld [vmem:[#allocation77_spill] sm:$0xff] }
 0x633   : > { %v4240_v62 = vadd.f32 %v4183_v28, %v3364_v25  ;;  %v4200_v25 = vpop.f32.mrf.mxu2  ;;  %v2478_v1 = vadd.f32 %v7631_v26, %v2389_v36  ;;  %v7649_v26 = vld [vmem:[#allocation30_spill] sm:$0xff] }
 0x634   : > { %v2476_v17 = vadd.f32 %v7627_v42, %v2387_v24  ;;  %v7644_v24 = vld [vmem:[#allocation67_spill] sm:$0xff] }
 0x635   : > { %4336 = vxpose.xlu0.b32.end [16/16] %v4240_v62, 128  ;;  %v4107_v62 = vadd.f32 %v4106_v32, %v4017_v59  ;;  %v7633_v32 = vld [vmem:[#allocation19_spill] sm:$0xff] }
 0x636   : > { %v3309_v27 = vpop.f32.mrf.mxu3 }
 0x637   : > { %v3310_v49 = vadd.f32 %v3309_v27, %v7612_v50  ;;  %v7628_v27 = vld [vmem:[#allocation56_spill] sm:$0xff]  ;;  %v4024_v50 = vpop.f32.mrf.mxu0 }
 0x639   : > { %v3365_v51 = vadd.f32 %v3310_v49, %v2466_v43  ;;  %v4196_v43 = vadd.f32 %v4195_v13, %v4107_v62  ;;  %v7645_v62 = vld [vmem:[#allocation27_spill] sm:$0xff] }
 0x63b   : > { %v4241_v40 = vadd.f32 %v4186_v46, %v3365_v51  ;;  %v4113_v46 = vpop.f32.mrf.mxu1  ;;  %v4202_v51 = vpop.f32.mrf.mxu2 }
 0x63c   : > { %v4114_v53 = vadd.f32 %v4113_v46, %v4024_v50 }
 0x63d   : > { %4353 = vxpose.xlu2.b32.start [1/16] %v4241_v40, 128  ;;  %v4109_v40 = vadd.f32 %v4108_v35, %v4019_v11  ;;  %v7637_v11 = vld [vmem:[#allocation21_spill] sm:$0xff] }
 0x63e   : > { %v3311_v31 = vpop.f32.mrf.mxu3  ;;  %v4203_v8 = vadd.f32 %v4202_v51, %v4114_v53 }
 0x63f   : > { %v3312_v14 = vadd.f32 %v3311_v31, %v7616_v19  ;;  %v7632_v31 = vld [vmem:[#allocation58_spill] sm:$0xff]  ;;  %v2392_v19 = vadd.f32 %v7634_v61, %v7633_v32  ;;  %v4027_v13 = vpop.f32.mrf.mxu0  ;;  %v7651_v61 = vld [vmem:[#allocation80_spill] sm:$0xff] }
 0x641   : > { %v3366_v0 = vadd.f32 %v3312_v14, %v2468_v38  ;;  %v4198_v38 = vadd.f32 %v4197_v41, %v4109_v40  ;;  %v2481_v5 = vadd.f32 %v7635_v57, %v2392_v19 }
 0x643   : > { %v4242_v44 = vadd.f32 %v4188_v63, %v3366_v0  ;;  %v4116_v63 = vpop.f32.mrf.mxu1  ;;  %v4205_v55 = vpop.f32.mrf.mxu2 }
 0x644   : > { %v4117_v39 = vadd.f32 %v4116_v63, %v4027_v13  ;;  %v7652_v13 = vld [vmem:[#allocation72_spill] sm:$0xff] }
 0x645   : > { %4354 = vxpose.xlu2.b32.cont [2/16] %v4242_v44, 128  ;;  %v7636_v44 = vld [vmem:[#allocation61_spill] sm:$0xff] }
 0x646   : > { %v3314_v33 = vpop.f32.mrf.mxu3 }
 0x647   : > { %v3315_v12 = vadd.f32 %v3314_v33, %v7620_v15  ;;  %v7638_v15 = vld [vmem:[#allocation97_spill] sm:$0xff]  ;;  %v4029_v21 = vpop.f32.mrf.mxu0 }
 0x649   : > { %v3367_v30 = vadd.f32 %v3315_v12, %v2471_v47  ;;  %v4201_v47 = vadd.f32 %v4200_v25, %v4112_v23  ;;  %v2394_v12 = vadd.f32 %v7638_v15, %v7637_v11  ;;  %v4206_v25 = vadd.f32 %v4205_v55, %v4117_v39  ;;  %v7654_v23 = vld [vmem:[#allocation101_spill] sm:$0xff] }
 0x64a   : > { %v7655_v11 = vld [vmem:[#allocation85_spill] sm:$0xff] }
 0x64b   : > { %v4243_v9 = vadd.f32 %v4191_v16, %v3367_v30  ;;  %v7639_v30 = vld [vmem:[#allocation71_spill] sm:$0xff]  ;;  %v4207_v2 = vpop.f32.mrf.mxu2 }
 0x64c   : > { %v2483_v41 = vadd.f32 %v7639_v30, %v2394_v12 }
 0x64d   : > { %4355 = vxpose.xlu2.b32.cont [3/16] %v4243_v9, 128 }
 0x64e   : > { %v3316_v29 = vpop.f32.mrf.mxu3 }
 0x64f   : > { %v3317_v6 = vadd.f32 %v3316_v29, %v7624_v22  ;;  %v4118_v29 = vpop.f32.mrf.mxu1  ;;  %v7641_v22 = vld [vmem:[#allocation24_spill] sm:$0xff] }
 0x650   : > { %v4119_v50 = vadd.f32 %v4118_v29, %v4029_v21  ;;  %v7657_v21 = vld [vmem:[#allocation35_spill] sm:$0xff] }
 0x651   : > { %v3368_v56 = vadd.f32 %v3317_v6, %v2473_v4  ;;  %v7642_v6 = vld [vmem:[#allocation98_spill] sm:$0xff] }
 0x652   : > { %v4208_v51 = vadd.f32 %v4207_v2, %v4119_v50  ;;  %v7659_v2 = vld [vmem:[#allocation88_spill] sm:$0xff] }
 0x653   : > { %v4244_v28 = vadd.f32 %v4193_v10, %v3368_v56  ;;  %v2397_v10 = vadd.f32 %v7642_v6, %v7641_v22 }
 0x655   : > { %4356 = vxpose.xlu2.b32.cont [4/16] %v4244_v28, 128  ;;  %v2486_v7 = vadd.f32 %v7643_v18, %v2397_v10  ;;  %v7660_v10 = vld [vmem:[#allocation78_spill] sm:$0xff] }
 0x656   : > { %v3319_v3 = vpop.f32.mrf.mxu3 }
 0x657   : > { %v3320_v37 = vadd.f32 %v3319_v3, %v7628_v27  ;;  %v4032_v3 = vpop.f32.mrf.mxu0  ;;  %v7646_v27 = vld [vmem:[#allocation99_spill] sm:$0xff] }
 0x659   : > { %v3369_v52 = vadd.f32 %v3320_v37, %v2476_v17  ;;  %v4121_v17 = vpop.f32.mrf.mxu1  ;;  %v2399_v37 = vadd.f32 %v7646_v27, %v7645_v62  ;;  %v7663_v62 = vld [vmem:[#allocation90_spill] sm:$0xff] }
 0x65b   : > { %v4245_v49 = vadd.f32 %v4196_v43, %v3369_v52  ;;  %v4210_v52 = vpop.f32.mrf.mxu2  ;;  %v2488_v36 = vadd.f32 %v7647_v54, %v2399_v37 }
 0x65d   : > { %4357 = vxpose.xlu2.b32.cont [5/16] %v4245_v49, 128  ;;  %v7648_v49 = vld [vmem:[#allocation69_spill] sm:$0xff] }
 0x65e   : > { %v3321_v60 = vpop.f32.mrf.mxu3 }
 0x65f   : > { %v3322_v48 = vadd.f32 %v3321_v60, %v7632_v31  ;;  %v4034_v31 = vpop.f32.mrf.mxu0 }
 0x661   : > { %v3370_v59 = vadd.f32 %v3322_v48, %v2478_v1  ;;  %v7650_v1 = vld [vmem:[#allocation100_spill] sm:$0xff] }
 0x662   : > { %v2402_v40 = vadd.f32 %v7650_v1, %v7649_v26 }
 0x663   : > { %v4246_v14 = vadd.f32 %v4198_v38, %v3370_v59  ;;  %v4123_v38 = vpop.f32.mrf.mxu1  ;;  %v4212_v59 = vpop.f32.mrf.mxu2 }
 0x664   : > { %v2491_v19 = vadd.f32 %v7651_v61, %v2402_v40  ;;  %v4124_v12 = vadd.f32 %v4123_v38, %v4034_v31  ;;  %v7667_v40 = vld [vmem:[#allocation92_spill] sm:$0xff]  ;;  %v7668_v38 = vld [vmem:[#allocation83_spill] sm:$0xff] }
 0x665   : > { %4358 = vxpose.xlu2.b32.cont [6/16] %v4246_v14, 128  ;;  %v4122_v14 = vadd.f32 %v4121_v17, %v4032_v3 }
 0x666   : > { %v3324_v0 = vpop.f32.mrf.mxu3 }
 0x667   : > { %v3325_v33 = vadd.f32 %v3324_v0, %v7636_v44  ;;  %v4211_v0 = vadd.f32 %v4210_v52, %v4122_v14  ;;  %v4037_v55 = vpop.f32.mrf.mxu0  ;;  %v7670_v14 = vld [vmem:[#allocation106_spill] sm:$0xff] }
 0x669   : > { %v3371_v58 = vadd.f32 %v3325_v33, %v2481_v5  ;;  %v7653_v5 = vld [vmem:[#allocation33_spill] sm:$0xff] }
 0x66a   : > { %v2404_v44 = vadd.f32 %v7654_v23, %v7653_v5 }
 0x66b   : > { %v4247_v35 = vadd.f32 %v4201_v47, %v3371_v58  ;;  %v4126_v47 = vpop.f32.mrf.mxu1  ;;  %v4215_v30 = vpop.f32.mrf.mxu2 }
 0x66c   : > { %v2493_v15 = vadd.f32 %v7655_v11, %v2404_v44  ;;  %v4127_v6 = vadd.f32 %v4126_v47, %v4037_v55  ;;  %v7671_v44 = vld [vmem:[#allocation95_spill] sm:$0xff]  ;;  %v7672_v47 = vld [vmem:[#allocation86_spill] sm:$0xff] }
 0x66d   : > { %4359 = vxpose.xlu2.b32.cont [7/16] %v4247_v35, 128  ;;  %v7656_v35 = vld [vmem:[#allocation75_spill] sm:$0xff] }
 0x66e   : > { %v3326_v16 = vpop.f32.mrf.mxu3 }
 0x66f   : > { %v3327_v9 = vadd.f32 %v3326_v16, %v7640_v45  ;;  %v7658_v45 = vld [vmem:[#allocation102_spill] sm:$0xff] }
 0x671   : > { %v3372_v4 = vadd.f32 %v3327_v9, %v2483_v41  ;;  %v4213_v41 = vadd.f32 %v4212_v59, %v4124_v12  ;;  %v2407_v9 = vadd.f32 %v7658_v45, %v7657_v21 }
 0x673   : > { %v4248_v34 = vadd.f32 %v4203_v8, %v3372_v4  ;;  %v4337_v8 = vpop.trf.xlu0  ;;  %v2496_v22 = vadd.f32 %v7659_v2, %v2407_v9  ;;  %v4128_v18 = vpop.f32.mrf.mxu1 }
 0x674   : > { %4385 = vst [vmem:[%s7409_s25] sm:$0xff] %v4337_v8 }
 0x675   : > { %4360 = vxpose.xlu2.b32.cont [8/16] %v4248_v34, 128 }
 0x676   : > { %v3329_v56 = vpop.f32.mrf.mxu3 }
 0x677   : > { %v3330_v28 = vadd.f32 %v3329_v56, %v7644_v24  ;;  %v4039_v56 = vpop.f32.mrf.mxu0  ;;  %v4217_v24 = vpop.f32.mrf.mxu2 }
 0x678   : > { %v4129_v37 = vadd.f32 %v4128_v18, %v4039_v56 }
 0x679   : > { %v3373_v42 = vadd.f32 %v3330_v28, %v2486_v7  ;;  %v4216_v7 = vadd.f32 %v4215_v30, %v4127_v6  ;;  %v7661_v28 = vld [vmem:[#allocation38_spill] sm:$0xff] }
 0x67b   : > { %v4249_v43 = vadd.f32 %v4206_v25, %v3373_v42  ;;  %v7662_v25 = vld [vmem:[#allocation103_spill] sm:$0xff]  ;;  %v4131_v50 = vpop.f32.mrf.mxu1 }
 0x67c   : > { %v2409_v3 = vadd.f32 %v7662_v25, %v7661_v28 }
 0x67d   : > { %4361 = vxpose.xlu2.b32.cont [9/16] %v4249_v43, 128  ;;  %v7664_v43 = vld [vmem:[#allocation81_spill] sm:$0xff] }
 0x67e   : > { %v3331_v20 = vpop.f32.mrf.mxu3  ;;  %v2498_v27 = vadd.f32 %v7663_v62, %v2409_v3 }
 0x67f   : > { %v3332_v46 = vadd.f32 %v3331_v20, %v7648_v49  ;;  %v4218_v20 = vadd.f32 %v4217_v24, %v4129_v37  ;;  %v7665_v49 = vld [vmem:[#allocation41_spill] sm:$0xff]  ;;  %v4220_v26 = vpop.f32.mrf.mxu2 }
 0x681   : > { %v3374_v60 = vadd.f32 %v3332_v46, %v2488_v36  ;;  %v4042_v36 = vpop.f32.mrf.mxu0  ;;  %v7666_v46 = vld [vmem:[#allocation104_spill] sm:$0xff] }
 0x683   : > { %v4250_v48 = vadd.f32 %v4208_v51, %v3374_v60  ;;  %v2412_v51 = vadd.f32 %v7666_v46, %v7665_v49 }
 0x685   : > { %4362 = vxpose.xlu2.b32.cont [10/16] %v4250_v48, 128  ;;  %v2501_v31 = vadd.f32 %v7667_v40, %v2412_v51  ;;  %v4132_v48 = vadd.f32 %v4131_v50, %v4042_v36 }
 0x686   : > { %v3334_v32 = vpop.f32.mrf.mxu3 }
 0x687   : > { %v3335_v63 = vadd.f32 %v3334_v32, %v7652_v13  ;;  %v4221_v32 = vadd.f32 %v4220_v26, %v4132_v48  ;;  %v4222_v5 = vpop.f32.mrf.mxu2 }
 0x689   : > { %v3375_v57 = vadd.f32 %v3335_v63, %v2491_v19  ;;  %v7669_v19 = vld [vmem:[#allocation44_spill] sm:$0xff] }
 0x68a   : > { %v2414_v13 = vadd.f32 %v7670_v14, %v7669_v19 }
 0x68b   : > { %v4251_v33 = vadd.f32 %v4211_v0, %v3375_v57  ;;  %v4044_v0 = vpop.f32.mrf.mxu0  ;;  %v4133_v57 = vpop.f32.mrf.mxu1 }
 0x68c   : > { %v4134_v55 = vadd.f32 %v4133_v57, %v4044_v0 }
 0x68d   : > { %4363 = vxpose.xlu2.b32.cont [11/16] %v4251_v33, 128  ;;  %v2503_v33 = vadd.f32 %v7671_v44, %v2414_v13 }
 0x68e   : > { %v3336_v58 = vpop.f32.mrf.mxu3  ;;  %v4223_v11 = vadd.f32 %v4222_v5, %v4134_v55 }
 0x68f   : > { %v3337_v16 = vadd.f32 %v3336_v58, %v7656_v35  ;;  %v4338_v35 = vpop.trf.xlu0 }
 0x690   : > { %4387 = vst [vmem:[%s7409_s25 + $0x10] sm:$0xff] %v4338_v35 }
 0x691   : > { %v3376_v53 = vadd.f32 %v3337_v16, %v2493_v15 }
 0x693   : > { %v4252_v29 = vadd.f32 %v4213_v41, %v3376_v53 }
 0x695   : > { %4364 = vxpose.xlu2.b32.cont [12/16] %v4252_v29, 128 }
 0x696   : > { %v3339_v4 = vpop.f32.mrf.mxu3 }
 0x697   : > { %v3340_v34 = vadd.f32 %v3339_v4, %v7660_v10  ;;  %v4339_v16 = vpop.trf.xlu0 }
 0x698   : > { %4389 = vst [vmem:[%s7409_s25 + $0x20] sm:$0xff] %v4339_v16 }
 0x699   : > { %v3377_v39 = vadd.f32 %v3340_v34, %v2496_v22 }
 0x69b   : > { %v4253_v42 = vadd.f32 %v4216_v7, %v3377_v39 }
 0x69d   : > { %4365 = vxpose.xlu2.b32.cont [13/16] %v4253_v42, 128 }
 0x69e   : > { %v3341_v17 = vpop.f32.mrf.mxu3 }
 0x69f   : > { %v3342_v52 = vadd.f32 %v3341_v17, %v7664_v43  ;;  %v4340_v30 = vpop.trf.xlu0 }
 0x6a0   : > { %4391 = vst [vmem:[%s7409_s25 + $0x30] sm:$0xff] %v4340_v30 }
 0x6a1   : > { %v3378_v54 = vadd.f32 %v3342_v52, %v2498_v27 }
 0x6a3   : > { %v4254_v60 = vadd.f32 %v4218_v20, %v3378_v54 }
 0x6a5   : > { %4366 = vxpose.xlu2.b32.cont [14/16] %v4254_v60, 128 }
 0x6a6   : > { %v3344_v1 = vpop.f32.mrf.mxu3 }
 0x6a7   : > { %v3345_v59 = vadd.f32 %v3344_v1, %v7668_v38  ;;  %v4341_v41 = vpop.trf.xlu0 }
 0x6a8   : > { %4393 = vst [vmem:[%s7409_s25 + $0x40] sm:$0xff] %v4341_v41 }
 0x6a9   : > { %v3379_v61 = vadd.f32 %v3345_v59, %v2501_v31 }
 0x6ab   : > { %v4255_v63 = vadd.f32 %v4221_v32, %v3379_v61 }
 0x6ad   : > { %4367 = vxpose.xlu2.b32.cont [15/16] %v4255_v63, 128 }
 0x6ae   : > { %v3346_v23 = vpop.f32.mrf.mxu3 }
 0x6af   : > { %v3347_v58 = vadd.f32 %v3346_v23, %v7672_v47  ;;  %v4342_v21 = vpop.trf.xlu0 }
 0x6b0   : > { %4395 = vst [vmem:[%s7409_s25 + $0x50] sm:$0xff] %v4342_v21 }
 0x6b1   : > { %v3380_v15 = vadd.f32 %v3347_v58, %v2503_v33 }
 0x6b3   : > { %v4256_v12 = vadd.f32 %v4223_v11, %v3380_v15 }
 0x6b5   : > { %4368 = vxpose.xlu2.b32.end [16/16] %v4256_v12, 128 }
 0x6b7   : > { %v4343_v9 = vpop.trf.xlu0 }
 0x6b8   : > { %4397 = vst [vmem:[%s7409_s25 + $0x60] sm:$0xff] %v4343_v9 }
 0x6bf   : > { %v4344_v8 = vpop.trf.xlu0 }
 0x6c0   : > { %4399 = vst [vmem:[%s7409_s25 + $0x70] sm:$0xff] %v4344_v8 }
 0x6c7   : > { %v4345_v2 = vpop.trf.xlu0 }
 0x6c8   : > { %4401 = vst [vmem:[%s7409_s25 + $0x80] sm:$0xff] %v4345_v2 }
 0x6cf   : > { %v4346_v6 = vpop.trf.xlu0 }
 0x6d0   : > { %4403 = vst [vmem:[%s7409_s25 + $0x90] sm:$0xff] %v4346_v6 }
 0x6d6   : > { %v4369_v53 = vpop.trf.xlu2 }
 0x6d7   : > { %4386 = vst [vmem:[%s7409_s25 + $0x8] sm:$0xff] %v4369_v53  ;;  %v4347_v34 = vpop.trf.xlu0 }
 0x6d8   : > { %4405 = vst [vmem:[%s7409_s25 + $0xa0] sm:$0xff] %v4347_v34 }
 0x6de   : > { %v4370_v45 = vpop.trf.xlu2 }
 0x6df   : > { %4388 = vst [vmem:[%s7409_s25 + $0x18] sm:$0xff] %v4370_v45  ;;  %v4348_v18 = vpop.trf.xlu0 }
 0x6e0   : > { %4407 = vst [vmem:[%s7409_s25 + $0xb0] sm:$0xff] %v4348_v18 }
 0x6e6   : > { %v4371_v29 = vpop.trf.xlu2 }
 0x6e7   : > { %4390 = vst [vmem:[%s7409_s25 + $0x28] sm:$0xff] %v4371_v29  ;;  %v4349_v39 = vpop.trf.xlu0 }
 0x6e8   : > { %4409 = vst [vmem:[%s7409_s25 + $0xc0] sm:$0xff] %v4349_v39 }
 0x6ee   : > { %v4372_v4 = vpop.trf.xlu2 }
 0x6ef   : > { %4392 = vst [vmem:[%s7409_s25 + $0x38] sm:$0xff] %v4372_v4  ;;  %v4350_v28 = vpop.trf.xlu0 }
 0x6f0   : > { %4411 = vst [vmem:[%s7409_s25 + $0xd0] sm:$0xff] %v4350_v28 }
 0x6f6   : > { %v4373_v22 = vpop.trf.xlu2 }
 0x6f7   : > { %4394 = vst [vmem:[%s7409_s25 + $0x48] sm:$0xff] %v4373_v22  ;;  %v4351_v3 = vpop.trf.xlu0 }
 0x6f8   : > { %4413 = vst [vmem:[%s7409_s25 + $0xe0] sm:$0xff] %v4351_v3 }
 0x6fe   : > { %v4374_v10 = vpop.trf.xlu2 }
 0x6ff   : > { %4396 = vst [vmem:[%s7409_s25 + $0x58] sm:$0xff] %v4374_v10  ;;  %v4352_v17 = vpop.trf.xlu0 }
 0x700   : > { %4415 = vst [vmem:[%s7409_s25 + $0xf0] sm:$0xff] %v4352_v17 }
 0x706   : > { %v4375_v56 = vpop.trf.xlu2 }
 0x707   : > { %4398 = vst [vmem:[%s7409_s25 + $0x68] sm:$0xff] %v4375_v56 }
 0x70e   : > { %v4376_v7 = vpop.trf.xlu2 }
 0x70f   : > { %4400 = vst [vmem:[%s7409_s25 + $0x78] sm:$0xff] %v4376_v7 }
 0x716   : > { %v4377_v24 = vpop.trf.xlu2 }
 0x717   : > { %4402 = vst [vmem:[%s7409_s25 + $0x88] sm:$0xff] %v4377_v24 }
 0x71e   : > { %v4378_v25 = vpop.trf.xlu2 }
 0x71f   : > { %4404 = vst [vmem:[%s7409_s25 + $0x98] sm:$0xff] %v4378_v25 }
 0x726   : > { %v4379_v42 = vpop.trf.xlu2 }
 0x727   : > { %4406 = vst [vmem:[%s7409_s25 + $0xa8] sm:$0xff] %v4379_v42 }
 0x72e   : > { %v4380_v62 = vpop.trf.xlu2 }
 0x72f   : > { %4408 = vst [vmem:[%s7409_s25 + $0xb8] sm:$0xff] %v4380_v62 }
 0x736   : > { %v4381_v27 = vpop.trf.xlu2 }
 0x737   : > { %4410 = vst [vmem:[%s7409_s25 + $0xc8] sm:$0xff] %v4381_v27 }
 0x73e   : > { %v4382_v37 = vpop.trf.xlu2 }
 0x73f   : > { %4412 = vst [vmem:[%s7409_s25 + $0xd8] sm:$0xff] %v4382_v37 }
 0x746   : > { %v4383_v43 = vpop.trf.xlu2 }
 0x747   : > { %4414 = vst [vmem:[%s7409_s25 + $0xe8] sm:$0xff] %v4383_v43 }
 0x74e   : > { %v4384_v52 = vpop.trf.xlu2 }
 0x74f   : > { %4416 = vst [vmem:[%s7409_s25 + $0xf8] sm:$0xff] %v4384_v52 }
 0x750 PF: > { %s16_s21 = sadd.s32 1, %s6120_s21  }
 0x751   : > { %p13_p4 = scmp.ge.s32.totalorder %s16_s21, 4  }
 0x753   :  { %15 = sbr.rel (!%p13_p4) target bundleno = 1 (0x1), region = 82 }

</bundles_post_ra>
